<compile_context>
chip_gen: v7x
topology: tpu7x:2x2x1
jax: 0.10.0
libtpu: 0.0.40
codegen_flags: <defaults>
</compile_context>

<pallas_src>
import functools

import jax
import jax.numpy as jnp
from jax.experimental import pallas as pl
from jax.experimental.pallas import tpu as pltpu


_LANE_PAD = 128  # zero apron (lanes) on each side of the flattened H*W axis


def _mh_kernel(w_ref, x_ref, y_ref, xp_ref, *, C, H, W):
    """One grid step: Bt fused batch elements in a lane-dense (C, H*W) layout.

    w_ref : SMEM f32[127] = [conv5 weight (125, row-major over (D,H,W) taps),
                             conv5 bias, gamma]
    x_ref : VMEM f32[Bt, C, H*W]   unpadded input (lane-dense)
    y_ref : VMEM f32[Bt, C, H*W]   output
    xp_ref: VMEM f32[Bt, C+4, H*W + 2*_LANE_PAD]   zero-padded scratch
    """
    Bt = x_ref.shape[0]
    HW = H * W
    b5 = w_ref[125]
    gamma = w_ref[126]

    # ---- in-kernel zero padding (no pre-padded HBM tensor) -----------------
    # Full-buffer zero on purpose: (C+4)=8 rows is exactly one sublane tile,
    # so this is 6 unmasked vsts per batch element; zeroing only the border
    # would need ~14 sublane-masked vsts of the same vreg tiles.  Done
    # unconditionally so it is correct under megacore partitioning of the
    # parallel grid axis (and with the 1-step grid on v5e/v6e it runs once).
    xp_ref[...] = jnp.zeros_like(xp_ref)
    xp_ref[:, 2:2 + C, _LANE_PAD:_LANE_PAD + HW] = x_ref[...]

    # ---- hoisted W-wrap masks ----------------------------------------------
    # A flattened-H*W shift wraps W-overflowing taps into the neighbouring
    # image row; only 4 distinct masks exist (ow in {-2,-1,1,2}).  H/depth
    # overflows land in the zero apron / zero depth rows and need no mask.
    col = jax.lax.broadcasted_iota(jnp.int32, (1, 1, HW), 2) % W
    wrap_ok = {ow: jnp.logical_and(col + ow >= 0, col + ow < W)
               for ow in (-2, -1, 1, 2)}

    # ---- conv5 (5x5x5, pad=2) over the (depth=C, H, W) volume --------------
    #   acc[c] = sum_{i,j,k} w[i,j,k] * xpad[c+i, p+off(j,k)]
    #          = sum_i S_i[c+i],   S_i = sum_{j,k} w[i,j,k] * win_{j,k}
    # S_i is accumulated at FULL padded depth (C+4 rows): no sublane slicing
    # inside the 125-tap loop, and 5 independent accumulators for ILP.
    part = [None] * 5                                 # S_0 .. S_4
    for j in range(5):                                # H tap
        for k in range(5):                            # W tap
            ow = k - 2
            start = _LANE_PAD + (j - 2) * W + ow      # flattened tap offset
            win = xp_ref[:, :, start:start + HW]      # slice from the ref
            if ow != 0:                               # zero row-crossing reads
                win = jnp.where(wrap_ok[ow], win, 0.0)
            for i in range(5):                        # depth (channel) tap
                t = w_ref[(i * 5 + j) * 5 + k] * win
                part[i] = t if part[i] is None else part[i] + t

    # Combine the 5 partials: only 5 sublane-offset slices in the whole kernel.
    acc = b5 + (((part[0][:, 0:C, :] + part[1][:, 1:1 + C, :])
                 + (part[2][:, 2:2 + C, :] + part[3][:, 3:3 + C, :]))
                + part[4][:, 4:4 + C, :])             # (Bt, C, HW)

    # ---- attention == 1 (see module analysis), so out == sigmoid(conv5) ----
    # EUP-only epilogue: exp on the EUP, exact reciprocal (stays inside the
    # 1e-4 tolerance vs jax.nn.sigmoid in the reference).
    gate = gamma * pl.reciprocal(1.0 + jnp.exp(-acc), approx=False)
    x = x_ref[...]
    y_ref[...] = (x * gate + x).astype(y_ref.dtype)


def _pick_bt(B):
    """Batch elements fused per grid step.

    Bt is capped at 2: the 5 full-depth partial accumulators cost ~10*Bt live
    vregs each step, so Bt=2 keeps the kernel around ~35 live vregs (well
    under the 64-vreg file) while per-step VMEM stays at a few tens of KiB.
    Single-TC parts (v5e/v6e): one grid step for small B (per-step overhead
    ~0.35us dominates otherwise).  v7x (2 TensorCores): keep the parallel
    grid a multiple of 2 so both cores get equal work.
    """
    BT_CAP = 2
    try:
        kind = jax.devices()[0].device_kind.lower()
    except Exception:
        kind = ""
    two_tc = ("v7" in kind) or ("7x" in kind)
    if two_tc and B >= 2:
        bt = 1 if B == 2 else min(BT_CAP, max(1, B // 2))
    else:
        bt = min(BT_CAP, B)
    while B % bt != 0:                                # bt must divide B
        bt -= 1
    return bt


def mh_module_forward(x, params):
    """Pallas TPU forward of MH_Module.  x: (B, C, H, W) float32."""
    B, C, H, W = x.shape
    HW = H * W
    if HW % 128 != 0:
        raise ValueError("H*W must be a multiple of 128 for the lane-dense layout")
    if 2 * W + 2 > _LANE_PAD:
        raise ValueError("W too large for the fixed 128-lane zero apron")

    # Only conv5 weight/bias and gamma reach the output (attention == 1);
    # the dead conv1/conv3 parameters are not shipped to the kernel.
    w_flat = jnp.concatenate([
        params["w5"].reshape(-1),
        params["b5"].reshape(-1),
        params["gamma"].reshape(-1),
    ]).astype(jnp.float32)                            # (127,) -> SMEM

    x_flat = x.reshape(B, C, HW)                      # free contiguous view

    Bt = _pick_bt(B)

    kernel = functools.partial(_mh_kernel, C=C, H=H, W=W)
    y_flat = pl.pallas_call(
        kernel,
        out_shape=jax.ShapeDtypeStruct((B, C, HW), x.dtype),
        grid=(B // Bt,),
        in_specs=[
            pl.BlockSpec(memory_space=pltpu.MemorySpace.SMEM),    # weights
            pl.BlockSpec((Bt, C, HW), lambda b: (b, 0, 0)),       # x, lane-dense
        ],
        out_specs=pl.BlockSpec((Bt, C, HW), lambda b: (b, 0, 0)),
        scratch_shapes=[
            pltpu.VMEM((Bt, C + 4, HW + 2 * _LANE_PAD), jnp.float32),
        ],
        compiler_params=pltpu.CompilerParams(
            dimension_semantics=("parallel",)),
    )(w_flat, x_flat)
    return y_flat.reshape(B, C, H, W)


def reference_forward(x, params):
    """Pure-JAX reference of the FULL PyTorch module (conv1/conv3/attention
    included), used to verify that eliding the attention branch is exact."""
    B, C, H, W = x.shape
    xin = x[:, None].astype(jnp.float32)              # (B, 1, C, H, W) NCDHW

    def conv3d(inp, w, b, pad):
        out = jax.lax.conv_general_dilated(
            inp, w.astype(jnp.float32), window_strides=(1, 1, 1),
            padding=[(pad, pad)] * 3,
            dimension_numbers=("NCDHW", "OIDHW", "NCDHW"))
        return out + b.reshape(1, 1, 1, 1, 1)

    out1 = conv3d(xin, params["w1"], params["b1"], 0)
    out2 = conv3d(xin, params["w3"], params["b3"], 1)
    out3 = conv3d(xin, params["w5"], params["b5"], 2)

    proj_query = out1.reshape(B, 1, -1)
    proj_key = out2.reshape(B, 1, -1).transpose(0, 2, 1)
    energy = jnp.matmul(proj_query, proj_key)                     # (B, 1, 1)
    energy_new = jnp.max(energy, axis=-1, keepdims=True) - energy
    attention = jax.nn.softmax(energy_new, axis=-1)               # == 1
    proj_value = out3.reshape(B, 1, -1)
    out = jnp.matmul(attention, proj_value).reshape(B, 1, C, H, W)
    out = jax.nn.sigmoid(out)
    out = params["gamma"].reshape(1, 1, 1, 1, 1) * out
    out = out.reshape(B, C, H, W)
    return x * out + x


if __name__ == "__main__":
    key = jax.random.PRNGKey(0)
    k_x, k1, k2, k3, k4, k5, k6 = jax.random.split(key, 7)

    B, C, H, W = 2, 4, 16, 16
    x = jax.random.normal(k_x, (B, C, H, W), dtype=jnp.float32)

    # Parameter shapes per the PyTorch module's __init__.  NOTE: torch inits
    # gamma to zeros(1) (output would equal x); use a nonzero value so the
    # conv/sigmoid path actually contributes.
    params = {
        "w1": jax.random.normal(k1, (1, 1, 1, 1, 1), jnp.float32) * 0.5,
        "b1": jax.random.normal(k2, (1,), jnp.float32) * 0.1,
        "w3": jax.random.normal(k3, (1, 1, 3, 3, 3), jnp.float32) * 0.1,
        "b3": jax.random.normal(k4, (1,), jnp.float32) * 0.1,
        "w5": jax.random.normal(k5, (1, 1, 5, 5, 5), jnp.float32) * 0.05,
        "b5": jax.random.normal(k6, (1,), jnp.float32) * 0.1,
        "gamma": jnp.full((1,), 0.5, dtype=jnp.float32),
    }

    y = jax.block_until_ready(mh_module_forward(x, params))
    y_ref = jax.block_until_ready(reference_forward(x, params))

    assert y.shape == (B, C, H, W)
    assert jnp.allclose(y, y_ref, atol=1e-4, rtol=1e-4), (
        "kernel output does not match full-module reference")

    print("KERNEL_OK")
</pallas_src>

<mosaic_0001>
module attributes {stable_mosaic.version = 11 : i64} {
  func.func @_mh_kernel(%arg0: i32, %arg1: memref<127xf32, #tpu.memory_space<smem>>, %arg2: memref<2x4x256xf32, #tpu.memory_space<vmem>>, %arg3: memref<2x4x256xf32, #tpu.memory_space<vmem>>, %arg4: memref<2x8x512xf32, #tpu.memory_space<vmem>>) attributes {dimension_semantics = [#tpu.dimension_semantics<parallel>], iteration_bounds = array<i64: 1>, scalar_prefetch = 0 : i64, scratch_operands = 1 : i64, tpu.core_type = #tpu.core_type<tc>, window_params = [{transform_indices = @transform_0, window_bounds = array<i64: 127>}, {transform_indices = @transform_1, window_bounds = array<i64: 2, 4, 256>}, {transform_indices = @transform_2, window_bounds = array<i64: 2, 4, 256>}]} {
    %c125 = arith.constant 125 : index
    %0 = memref.load %arg1[%c125] : memref<127xf32, #tpu.memory_space<smem>>
    %c126 = arith.constant 126 : index
    %1 = memref.load %arg1[%c126] : memref<127xf32, #tpu.memory_space<smem>>
    %cst = arith.constant 0.000000e+00 : f32
    %2 = vector.broadcast %cst : f32 to vector<2x8x512xf32>
    %c0 = arith.constant 0 : index
    %c0_0 = arith.constant 0 : index
    %c0_1 = arith.constant 0 : index
    %3 = vector.load %arg4[%c0, %c0_0, %c0_1] : memref<2x8x512xf32, #tpu.memory_space<vmem>>, vector<2x8x512xf32>
    tpu.vector_store %arg4[%c0, %c0_0, %c0_1], %2 {strides = array<i32>} : memref<2x8x512xf32, #tpu.memory_space<vmem>>, vector<2x8x512xf32>,
    %c0_2 = arith.constant 0 : index
    %c0_3 = arith.constant 0 : index
    %c0_4 = arith.constant 0 : index
    %4 = vector.load %arg2[%c0_2, %c0_3, %c0_4] : memref<2x4x256xf32, #tpu.memory_space<vmem>>, vector<2x4x256xf32>
    %c0_5 = arith.constant 0 : index
    %c2 = arith.constant 2 : index
    %c128 = arith.constant 128 : index
    %5 = vector.load %arg4[%c0_5, %c2, %c128] : memref<2x8x512xf32, #tpu.memory_space<vmem>>, vector<2x4x256xf32>
    tpu.vector_store %arg4[%c0_5, %c2, %c128], %4 {strides = array<i32>} : memref<2x8x512xf32, #tpu.memory_space<vmem>>, vector<2x4x256xf32>,
    %6 = tpu.iota {dimensions = array<i32: 2>} : vector<1x1x256xi32>
    %c16_i32 = arith.constant 16 : i32
    %c0_i32 = arith.constant 0 : i32
    %7 = arith.cmpi eq, %c16_i32, %c0_i32 : i32
    %c1_i32 = arith.constant 1 : i32
    %8 = arith.select %7, %c1_i32, %c16_i32 : i32
    %9 = vector.broadcast %8 : i32 to vector<1x1x256xi32>
    %10 = arith.remsi %6, %9 : vector<1x1x256xi32>
    %c0_i32_6 = arith.constant 0 : i32
    %11 = vector.broadcast %c0_i32_6 : i32 to vector<1x1x256xi32>
    %12 = arith.cmpi ne, %10, %11 : vector<1x1x256xi32>
    %c0_i32_7 = arith.constant 0 : i32
    %13 = vector.broadcast %c0_i32_7 : i32 to vector<1x1x256xi32>
    %14 = arith.cmpi slt, %10, %13 : vector<1x1x256xi32>
    %c0_i32_8 = arith.constant 0 : i32
    %15 = arith.cmpi slt, %8, %c0_i32_8 : i32
    %16 = vector.broadcast %15 : i1 to vector<1x1x256xi1>
    %17 = vector.broadcast %16 : vector<1x1x256xi1> to vector<1x1x256xi1>
    %18 = arith.xori %14, %17 : vector<1x1x256xi1>
    %19 = arith.andi %18, %12 : vector<1x1x256xi1>
    %20 = vector.broadcast %8 : i32 to vector<1x1x256xi32>
    %21 = arith.addi %10, %20 : vector<1x1x256xi32>
    %22 = arith.select %19, %21, %10 : vector<1x1x256xi1>, vector<1x1x256xi32>
    %c-2_i32 = arith.constant -2 : i32
    %23 = vector.broadcast %c-2_i32 : i32 to vector<1x1x256xi32>
    %24 = arith.addi %22, %23 : vector<1x1x256xi32>
    %c0_i32_9 = arith.constant 0 : i32
    %25 = vector.broadcast %c0_i32_9 : i32 to vector<1x1x256xi32>
    %26 = arith.cmpi sge, %24, %25 : vector<1x1x256xi32>
    %c-2_i32_10 = arith.constant -2 : i32
    %27 = vector.broadcast %c-2_i32_10 : i32 to vector<1x1x256xi32>
    %28 = arith.addi %22, %27 : vector<1x1x256xi32>
    %c16_i32_11 = arith.constant 16 : i32
    %29 = vector.broadcast %c16_i32_11 : i32 to vector<1x1x256xi32>
    %30 = arith.cmpi slt, %28, %29 : vector<1x1x256xi32>
    %31 = arith.andi %26, %30 : vector<1x1x256xi1>
    %c-1_i32 = arith.constant -1 : i32
    %32 = vector.broadcast %c-1_i32 : i32 to vector<1x1x256xi32>
    %33 = arith.addi %22, %32 : vector<1x1x256xi32>
    %c0_i32_12 = arith.constant 0 : i32
    %34 = vector.broadcast %c0_i32_12 : i32 to vector<1x1x256xi32>
    %35 = arith.cmpi sge, %33, %34 : vector<1x1x256xi32>
    %c-1_i32_13 = arith.constant -1 : i32
    %36 = vector.broadcast %c-1_i32_13 : i32 to vector<1x1x256xi32>
    %37 = arith.addi %22, %36 : vector<1x1x256xi32>
    %c16_i32_14 = arith.constant 16 : i32
    %38 = vector.broadcast %c16_i32_14 : i32 to vector<1x1x256xi32>
    %39 = arith.cmpi slt, %37, %38 : vector<1x1x256xi32>
    %40 = arith.andi %35, %39 : vector<1x1x256xi1>
    %c1_i32_15 = arith.constant 1 : i32
    %41 = vector.broadcast %c1_i32_15 : i32 to vector<1x1x256xi32>
    %42 = arith.addi %22, %41 : vector<1x1x256xi32>
    %c0_i32_16 = arith.constant 0 : i32
    %43 = vector.broadcast %c0_i32_16 : i32 to vector<1x1x256xi32>
    %44 = arith.cmpi sge, %42, %43 : vector<1x1x256xi32>
    %c1_i32_17 = arith.constant 1 : i32
    %45 = vector.broadcast %c1_i32_17 : i32 to vector<1x1x256xi32>
    %46 = arith.addi %22, %45 : vector<1x1x256xi32>
    %c16_i32_18 = arith.constant 16 : i32
    %47 = vector.broadcast %c16_i32_18 : i32 to vector<1x1x256xi32>
    %48 = arith.cmpi slt, %46, %47 : vector<1x1x256xi32>
    %49 = arith.andi %44, %48 : vector<1x1x256xi1>
    %c2_i32 = arith.constant 2 : i32
    %50 = vector.broadcast %c2_i32 : i32 to vector<1x1x256xi32>
    %51 = arith.addi %22, %50 : vector<1x1x256xi32>
    %c0_i32_19 = arith.constant 0 : i32
    %52 = vector.broadcast %c0_i32_19 : i32 to vector<1x1x256xi32>
    %53 = arith.cmpi sge, %51, %52 : vector<1x1x256xi32>
    %c2_i32_20 = arith.constant 2 : i32
    %54 = vector.broadcast %c2_i32_20 : i32 to vector<1x1x256xi32>
    %55 = arith.addi %22, %54 : vector<1x1x256xi32>
    %c16_i32_21 = arith.constant 16 : i32
    %56 = vector.broadcast %c16_i32_21 : i32 to vector<1x1x256xi32>
    %57 = arith.cmpi slt, %55, %56 : vector<1x1x256xi32>
    %58 = arith.andi %53, %57 : vector<1x1x256xi1>
    %c0_22 = arith.constant 0 : index
    %c0_23 = arith.constant 0 : index
    %c94 = arith.constant 94 : index
    %59 = vector.load %arg4[%c0_22, %c0_23, %c94] : memref<2x8x512xf32, #tpu.memory_space<vmem>>, vector<2x8x256xf32>
    %cst_24 = arith.constant 0.000000e+00 : f32
    %60 = vector.shape_cast %31 : vector<1x1x256xi1> to vector<1x1x256xi1>
    %61 = vector.broadcast %60 : vector<1x1x256xi1> to vector<2x8x256xi1>
    %62 = vector.broadcast %cst_24 : f32 to vector<2x8x256xf32>
    %63 = arith.select %61, %59, %62 : vector<2x8x256xi1>, vector<2x8x256xf32>
    %c0_25 = arith.constant 0 : index
    %64 = memref.load %arg1[%c0_25] : memref<127xf32, #tpu.memory_space<smem>>
    %65 = vector.broadcast %64 : f32 to vector<2x8x256xf32>
    %66 = arith.mulf %65, %63 : vector<2x8x256xf32>
    %c25 = arith.constant 25 : index
    %67 = memref.load %arg1[%c25] : memref<127xf32, #tpu.memory_space<smem>>
    %68 = vector.broadcast %67 : f32 to vector<2x8x256xf32>
    %69 = arith.mulf %68, %63 : vector<2x8x256xf32>
    %c50 = arith.constant 50 : index
    %70 = memref.load %arg1[%c50] : memref<127xf32, #tpu.memory_space<smem>>
    %71 = vector.broadcast %70 : f32 to vector<2x8x256xf32>
    %72 = arith.mulf %71, %63 : vector<2x8x256xf32>
    %c75 = arith.constant 75 : index
    %73 = memref.load %arg1[%c75] : memref<127xf32, #tpu.memory_space<smem>>
    %74 = vector.broadcast %73 : f32 to vector<2x8x256xf32>
    %75 = arith.mulf %74, %63 : vector<2x8x256xf32>
    %c100 = arith.constant 100 : index
    %76 = memref.load %arg1[%c100] : memref<127xf32, #tpu.memory_space<smem>>
    %77 = vector.broadcast %76 : f32 to vector<2x8x256xf32>
    %78 = arith.mulf %77, %63 : vector<2x8x256xf32>
    %c0_26 = arith.constant 0 : index
    %c0_27 = arith.constant 0 : index
    %c95 = arith.constant 95 : index
    %79 = vector.load %arg4[%c0_26, %c0_27, %c95] : memref<2x8x512xf32, #tpu.memory_space<vmem>>, vector<2x8x256xf32>
    %cst_28 = arith.constant 0.000000e+00 : f32
    %80 = vector.shape_cast %40 : vector<1x1x256xi1> to vector<1x1x256xi1>
    %81 = vector.broadcast %80 : vector<1x1x256xi1> to vector<2x8x256xi1>
    %82 = vector.broadcast %cst_28 : f32 to vector<2x8x256xf32>
    %83 = arith.select %81, %79, %82 : vector<2x8x256xi1>, vector<2x8x256xf32>
    %c1 = arith.constant 1 : index
    %84 = memref.load %arg1[%c1] : memref<127xf32, #tpu.memory_space<smem>>
    %85 = vector.broadcast %84 : f32 to vector<2x8x256xf32>
    %86 = arith.mulf %85, %83 : vector<2x8x256xf32>
    %87 = arith.addf %66, %86 : vector<2x8x256xf32>
    %c26 = arith.constant 26 : index
    %88 = memref.load %arg1[%c26] : memref<127xf32, #tpu.memory_space<smem>>
    %89 = vector.broadcast %88 : f32 to vector<2x8x256xf32>
    %90 = arith.mulf %89, %83 : vector<2x8x256xf32>
    %91 = arith.addf %69, %90 : vector<2x8x256xf32>
    %c51 = arith.constant 51 : index
    %92 = memref.load %arg1[%c51] : memref<127xf32, #tpu.memory_space<smem>>
    %93 = vector.broadcast %92 : f32 to vector<2x8x256xf32>
    %94 = arith.mulf %93, %83 : vector<2x8x256xf32>
    %95 = arith.addf %72, %94 : vector<2x8x256xf32>
    %c76 = arith.constant 76 : index
    %96 = memref.load %arg1[%c76] : memref<127xf32, #tpu.memory_space<smem>>
    %97 = vector.broadcast %96 : f32 to vector<2x8x256xf32>
    %98 = arith.mulf %97, %83 : vector<2x8x256xf32>
    %99 = arith.addf %75, %98 : vector<2x8x256xf32>
    %c101 = arith.constant 101 : index
    %100 = memref.load %arg1[%c101] : memref<127xf32, #tpu.memory_space<smem>>
    %101 = vector.broadcast %100 : f32 to vector<2x8x256xf32>
    %102 = arith.mulf %101, %83 : vector<2x8x256xf32>
    %103 = arith.addf %78, %102 : vector<2x8x256xf32>
    %c0_29 = arith.constant 0 : index
    %c0_30 = arith.constant 0 : index
    %c96 = arith.constant 96 : index
    %104 = vector.load %arg4[%c0_29, %c0_30, %c96] : memref<2x8x512xf32, #tpu.memory_space<vmem>>, vector<2x8x256xf32>
    %c2_31 = arith.constant 2 : index
    %105 = memref.load %arg1[%c2_31] : memref<127xf32, #tpu.memory_space<smem>>
    %106 = vector.broadcast %105 : f32 to vector<2x8x256xf32>
    %107 = arith.mulf %106, %104 : vector<2x8x256xf32>
    %108 = arith.addf %87, %107 : vector<2x8x256xf32>
    %c27 = arith.constant 27 : index
    %109 = memref.load %arg1[%c27] : memref<127xf32, #tpu.memory_space<smem>>
    %110 = vector.broadcast %109 : f32 to vector<2x8x256xf32>
    %111 = arith.mulf %110, %104 : vector<2x8x256xf32>
    %112 = arith.addf %91, %111 : vector<2x8x256xf32>
    %c52 = arith.constant 52 : index
    %113 = memref.load %arg1[%c52] : memref<127xf32, #tpu.memory_space<smem>>
    %114 = vector.broadcast %113 : f32 to vector<2x8x256xf32>
    %115 = arith.mulf %114, %104 : vector<2x8x256xf32>
    %116 = arith.addf %95, %115 : vector<2x8x256xf32>
    %c77 = arith.constant 77 : index
    %117 = memref.load %arg1[%c77] : memref<127xf32, #tpu.memory_space<smem>>
    %118 = vector.broadcast %117 : f32 to vector<2x8x256xf32>
    %119 = arith.mulf %118, %104 : vector<2x8x256xf32>
    %120 = arith.addf %99, %119 : vector<2x8x256xf32>
    %c102 = arith.constant 102 : index
    %121 = memref.load %arg1[%c102] : memref<127xf32, #tpu.memory_space<smem>>
    %122 = vector.broadcast %121 : f32 to vector<2x8x256xf32>
    %123 = arith.mulf %122, %104 : vector<2x8x256xf32>
    %124 = arith.addf %103, %123 : vector<2x8x256xf32>
    %c0_32 = arith.constant 0 : index
    %c0_33 = arith.constant 0 : index
    %c97 = arith.constant 97 : index
    %125 = vector.load %arg4[%c0_32, %c0_33, %c97] : memref<2x8x512xf32, #tpu.memory_space<vmem>>, vector<2x8x256xf32>
    %cst_34 = arith.constant 0.000000e+00 : f32
    %126 = vector.shape_cast %49 : vector<1x1x256xi1> to vector<1x1x256xi1>
    %127 = vector.broadcast %126 : vector<1x1x256xi1> to vector<2x8x256xi1>
    %128 = vector.broadcast %cst_34 : f32 to vector<2x8x256xf32>
    %129 = arith.select %127, %125, %128 : vector<2x8x256xi1>, vector<2x8x256xf32>
    %c3 = arith.constant 3 : index
    %130 = memref.load %arg1[%c3] : memref<127xf32, #tpu.memory_space<smem>>
    %131 = vector.broadcast %130 : f32 to vector<2x8x256xf32>
    %132 = arith.mulf %131, %129 : vector<2x8x256xf32>
    %133 = arith.addf %108, %132 : vector<2x8x256xf32>
    %c28 = arith.constant 28 : index
    %134 = memref.load %arg1[%c28] : memref<127xf32, #tpu.memory_space<smem>>
    %135 = vector.broadcast %134 : f32 to vector<2x8x256xf32>
    %136 = arith.mulf %135, %129 : vector<2x8x256xf32>
    %137 = arith.addf %112, %136 : vector<2x8x256xf32>
    %c53 = arith.constant 53 : index
    %138 = memref.load %arg1[%c53] : memref<127xf32, #tpu.memory_space<smem>>
    %139 = vector.broadcast %138 : f32 to vector<2x8x256xf32>
    %140 = arith.mulf %139, %129 : vector<2x8x256xf32>
    %141 = arith.addf %116, %140 : vector<2x8x256xf32>
    %c78 = arith.constant 78 : index
    %142 = memref.load %arg1[%c78] : memref<127xf32, #tpu.memory_space<smem>>
    %143 = vector.broadcast %142 : f32 to vector<2x8x256xf32>
    %144 = arith.mulf %143, %129 : vector<2x8x256xf32>
    %145 = arith.addf %120, %144 : vector<2x8x256xf32>
    %c103 = arith.constant 103 : index
    %146 = memref.load %arg1[%c103] : memref<127xf32, #tpu.memory_space<smem>>
    %147 = vector.broadcast %146 : f32 to vector<2x8x256xf32>
    %148 = arith.mulf %147, %129 : vector<2x8x256xf32>
    %149 = arith.addf %124, %148 : vector<2x8x256xf32>
    %c0_35 = arith.constant 0 : index
    %c0_36 = arith.constant 0 : index
    %c98 = arith.constant 98 : index
    %150 = vector.load %arg4[%c0_35, %c0_36, %c98] : memref<2x8x512xf32, #tpu.memory_space<vmem>>, vector<2x8x256xf32>
    %cst_37 = arith.constant 0.000000e+00 : f32
    %151 = vector.shape_cast %58 : vector<1x1x256xi1> to vector<1x1x256xi1>
    %152 = vector.broadcast %151 : vector<1x1x256xi1> to vector<2x8x256xi1>
    %153 = vector.broadcast %cst_37 : f32 to vector<2x8x256xf32>
    %154 = arith.select %152, %150, %153 : vector<2x8x256xi1>, vector<2x8x256xf32>
    %c4 = arith.constant 4 : index
    %155 = memref.load %arg1[%c4] : memref<127xf32, #tpu.memory_space<smem>>
    %156 = vector.broadcast %155 : f32 to vector<2x8x256xf32>
    %157 = arith.mulf %156, %154 : vector<2x8x256xf32>
    %158 = arith.addf %133, %157 : vector<2x8x256xf32>
    %c29 = arith.constant 29 : index
    %159 = memref.load %arg1[%c29] : memref<127xf32, #tpu.memory_space<smem>>
    %160 = vector.broadcast %159 : f32 to vector<2x8x256xf32>
    %161 = arith.mulf %160, %154 : vector<2x8x256xf32>
    %162 = arith.addf %137, %161 : vector<2x8x256xf32>
    %c54 = arith.constant 54 : index
    %163 = memref.load %arg1[%c54] : memref<127xf32, #tpu.memory_space<smem>>
    %164 = vector.broadcast %163 : f32 to vector<2x8x256xf32>
    %165 = arith.mulf %164, %154 : vector<2x8x256xf32>
    %166 = arith.addf %141, %165 : vector<2x8x256xf32>
    %c79 = arith.constant 79 : index
    %167 = memref.load %arg1[%c79] : memref<127xf32, #tpu.memory_space<smem>>
    %168 = vector.broadcast %167 : f32 to vector<2x8x256xf32>
    %169 = arith.mulf %168, %154 : vector<2x8x256xf32>
    %170 = arith.addf %145, %169 : vector<2x8x256xf32>
    %c104 = arith.constant 104 : index
    %171 = memref.load %arg1[%c104] : memref<127xf32, #tpu.memory_space<smem>>
    %172 = vector.broadcast %171 : f32 to vector<2x8x256xf32>
    %173 = arith.mulf %172, %154 : vector<2x8x256xf32>
    %174 = arith.addf %149, %173 : vector<2x8x256xf32>
    %c0_38 = arith.constant 0 : index
    %c0_39 = arith.constant 0 : index
    %c110 = arith.constant 110 : index
    %175 = vector.load %arg4[%c0_38, %c0_39, %c110] : memref<2x8x512xf32, #tpu.memory_space<vmem>>, vector<2x8x256xf32>
    %cst_40 = arith.constant 0.000000e+00 : f32
    %176 = vector.shape_cast %31 : vector<1x1x256xi1> to vector<1x1x256xi1>
    %177 = vector.broadcast %176 : vector<1x1x256xi1> to vector<2x8x256xi1>
    %178 = vector.broadcast %cst_40 : f32 to vector<2x8x256xf32>
    %179 = arith.select %177, %175, %178 : vector<2x8x256xi1>, vector<2x8x256xf32>
    %c5 = arith.constant 5 : index
    %180 = memref.load %arg1[%c5] : memref<127xf32, #tpu.memory_space<smem>>
    %181 = vector.broadcast %180 : f32 to vector<2x8x256xf32>
    %182 = arith.mulf %181, %179 : vector<2x8x256xf32>
    %183 = arith.addf %158, %182 : vector<2x8x256xf32>
    %c30 = arith.constant 30 : index
    %184 = memref.load %arg1[%c30] : memref<127xf32, #tpu.memory_space<smem>>
    %185 = vector.broadcast %184 : f32 to vector<2x8x256xf32>
    %186 = arith.mulf %185, %179 : vector<2x8x256xf32>
    %187 = arith.addf %162, %186 : vector<2x8x256xf32>
    %c55 = arith.constant 55 : index
    %188 = memref.load %arg1[%c55] : memref<127xf32, #tpu.memory_space<smem>>
    %189 = vector.broadcast %188 : f32 to vector<2x8x256xf32>
    %190 = arith.mulf %189, %179 : vector<2x8x256xf32>
    %191 = arith.addf %166, %190 : vector<2x8x256xf32>
    %c80 = arith.constant 80 : index
    %192 = memref.load %arg1[%c80] : memref<127xf32, #tpu.memory_space<smem>>
    %193 = vector.broadcast %192 : f32 to vector<2x8x256xf32>
    %194 = arith.mulf %193, %179 : vector<2x8x256xf32>
    %195 = arith.addf %170, %194 : vector<2x8x256xf32>
    %c105 = arith.constant 105 : index
    %196 = memref.load %arg1[%c105] : memref<127xf32, #tpu.memory_space<smem>>
    %197 = vector.broadcast %196 : f32 to vector<2x8x256xf32>
    %198 = arith.mulf %197, %179 : vector<2x8x256xf32>
    %199 = arith.addf %174, %198 : vector<2x8x256xf32>
    %c0_41 = arith.constant 0 : index
    %c0_42 = arith.constant 0 : index
    %c111 = arith.constant 111 : index
    %200 = vector.load %arg4[%c0_41, %c0_42, %c111] : memref<2x8x512xf32, #tpu.memory_space<vmem>>, vector<2x8x256xf32>
    %cst_43 = arith.constant 0.000000e+00 : f32
    %201 = vector.shape_cast %40 : vector<1x1x256xi1> to vector<1x1x256xi1>
    %202 = vector.broadcast %201 : vector<1x1x256xi1> to vector<2x8x256xi1>
    %203 = vector.broadcast %cst_43 : f32 to vector<2x8x256xf32>
    %204 = arith.select %202, %200, %203 : vector<2x8x256xi1>, vector<2x8x256xf32>
    %c6 = arith.constant 6 : index
    %205 = memref.load %arg1[%c6] : memref<127xf32, #tpu.memory_space<smem>>
    %206 = vector.broadcast %205 : f32 to vector<2x8x256xf32>
    %207 = arith.mulf %206, %204 : vector<2x8x256xf32>
    %208 = arith.addf %183, %207 : vector<2x8x256xf32>
    %c31 = arith.constant 31 : index
    %209 = memref.load %arg1[%c31] : memref<127xf32, #tpu.memory_space<smem>>
    %210 = vector.broadcast %209 : f32 to vector<2x8x256xf32>
    %211 = arith.mulf %210, %204 : vector<2x8x256xf32>
    %212 = arith.addf %187, %211 : vector<2x8x256xf32>
    %c56 = arith.constant 56 : index
    %213 = memref.load %arg1[%c56] : memref<127xf32, #tpu.memory_space<smem>>
    %214 = vector.broadcast %213 : f32 to vector<2x8x256xf32>
    %215 = arith.mulf %214, %204 : vector<2x8x256xf32>
    %216 = arith.addf %191, %215 : vector<2x8x256xf32>
    %c81 = arith.constant 81 : index
    %217 = memref.load %arg1[%c81] : memref<127xf32, #tpu.memory_space<smem>>
    %218 = vector.broadcast %217 : f32 to vector<2x8x256xf32>
    %219 = arith.mulf %218, %204 : vector<2x8x256xf32>
    %220 = arith.addf %195, %219 : vector<2x8x256xf32>
    %c106 = arith.constant 106 : index
    %221 = memref.load %arg1[%c106] : memref<127xf32, #tpu.memory_space<smem>>
    %222 = vector.broadcast %221 : f32 to vector<2x8x256xf32>
    %223 = arith.mulf %222, %204 : vector<2x8x256xf32>
    %224 = arith.addf %199, %223 : vector<2x8x256xf32>
    %c0_44 = arith.constant 0 : index
    %c0_45 = arith.constant 0 : index
    %c112 = arith.constant 112 : index
    %225 = vector.load %arg4[%c0_44, %c0_45, %c112] : memref<2x8x512xf32, #tpu.memory_space<vmem>>, vector<2x8x256xf32>
    %c7 = arith.constant 7 : index
    %226 = memref.load %arg1[%c7] : memref<127xf32, #tpu.memory_space<smem>>
    %227 = vector.broadcast %226 : f32 to vector<2x8x256xf32>
    %228 = arith.mulf %227, %225 : vector<2x8x256xf32>
    %229 = arith.addf %208, %228 : vector<2x8x256xf32>
    %c32 = arith.constant 32 : index
    %230 = memref.load %arg1[%c32] : memref<127xf32, #tpu.memory_space<smem>>
    %231 = vector.broadcast %230 : f32 to vector<2x8x256xf32>
    %232 = arith.mulf %231, %225 : vector<2x8x256xf32>
    %233 = arith.addf %212, %232 : vector<2x8x256xf32>
    %c57 = arith.constant 57 : index
    %234 = memref.load %arg1[%c57] : memref<127xf32, #tpu.memory_space<smem>>
    %235 = vector.broadcast %234 : f32 to vector<2x8x256xf32>
    %236 = arith.mulf %235, %225 : vector<2x8x256xf32>
    %237 = arith.addf %216, %236 : vector<2x8x256xf32>
    %c82 = arith.constant 82 : index
    %238 = memref.load %arg1[%c82] : memref<127xf32, #tpu.memory_space<smem>>
    %239 = vector.broadcast %238 : f32 to vector<2x8x256xf32>
    %240 = arith.mulf %239, %225 : vector<2x8x256xf32>
    %241 = arith.addf %220, %240 : vector<2x8x256xf32>
    %c107 = arith.constant 107 : index
    %242 = memref.load %arg1[%c107] : memref<127xf32, #tpu.memory_space<smem>>
    %243 = vector.broadcast %242 : f32 to vector<2x8x256xf32>
    %244 = arith.mulf %243, %225 : vector<2x8x256xf32>
    %245 = arith.addf %224, %244 : vector<2x8x256xf32>
    %c0_46 = arith.constant 0 : index
    %c0_47 = arith.constant 0 : index
    %c113 = arith.constant 113 : index
    %246 = vector.load %arg4[%c0_46, %c0_47, %c113] : memref<2x8x512xf32, #tpu.memory_space<vmem>>, vector<2x8x256xf32>
    %cst_48 = arith.constant 0.000000e+00 : f32
    %247 = vector.shape_cast %49 : vector<1x1x256xi1> to vector<1x1x256xi1>
    %248 = vector.broadcast %247 : vector<1x1x256xi1> to vector<2x8x256xi1>
    %249 = vector.broadcast %cst_48 : f32 to vector<2x8x256xf32>
    %250 = arith.select %248, %246, %249 : vector<2x8x256xi1>, vector<2x8x256xf32>
    %c8 = arith.constant 8 : index
    %251 = memref.load %arg1[%c8] : memref<127xf32, #tpu.memory_space<smem>>
    %252 = vector.broadcast %251 : f32 to vector<2x8x256xf32>
    %253 = arith.mulf %252, %250 : vector<2x8x256xf32>
    %254 = arith.addf %229, %253 : vector<2x8x256xf32>
    %c33 = arith.constant 33 : index
    %255 = memref.load %arg1[%c33] : memref<127xf32, #tpu.memory_space<smem>>
    %256 = vector.broadcast %255 : f32 to vector<2x8x256xf32>
    %257 = arith.mulf %256, %250 : vector<2x8x256xf32>
    %258 = arith.addf %233, %257 : vector<2x8x256xf32>
    %c58 = arith.constant 58 : index
    %259 = memref.load %arg1[%c58] : memref<127xf32, #tpu.memory_space<smem>>
    %260 = vector.broadcast %259 : f32 to vector<2x8x256xf32>
    %261 = arith.mulf %260, %250 : vector<2x8x256xf32>
    %262 = arith.addf %237, %261 : vector<2x8x256xf32>
    %c83 = arith.constant 83 : index
    %263 = memref.load %arg1[%c83] : memref<127xf32, #tpu.memory_space<smem>>
    %264 = vector.broadcast %263 : f32 to vector<2x8x256xf32>
    %265 = arith.mulf %264, %250 : vector<2x8x256xf32>
    %266 = arith.addf %241, %265 : vector<2x8x256xf32>
    %c108 = arith.constant 108 : index
    %267 = memref.load %arg1[%c108] : memref<127xf32, #tpu.memory_space<smem>>
    %268 = vector.broadcast %267 : f32 to vector<2x8x256xf32>
    %269 = arith.mulf %268, %250 : vector<2x8x256xf32>
    %270 = arith.addf %245, %269 : vector<2x8x256xf32>
    %c0_49 = arith.constant 0 : index
    %c0_50 = arith.constant 0 : index
    %c114 = arith.constant 114 : index
    %271 = vector.load %arg4[%c0_49, %c0_50, %c114] : memref<2x8x512xf32, #tpu.memory_space<vmem>>, vector<2x8x256xf32>
    %cst_51 = arith.constant 0.000000e+00 : f32
    %272 = vector.shape_cast %58 : vector<1x1x256xi1> to vector<1x1x256xi1>
    %273 = vector.broadcast %272 : vector<1x1x256xi1> to vector<2x8x256xi1>
    %274 = vector.broadcast %cst_51 : f32 to vector<2x8x256xf32>
    %275 = arith.select %273, %271, %274 : vector<2x8x256xi1>, vector<2x8x256xf32>
    %c9 = arith.constant 9 : index
    %276 = memref.load %arg1[%c9] : memref<127xf32, #tpu.memory_space<smem>>
    %277 = vector.broadcast %276 : f32 to vector<2x8x256xf32>
    %278 = arith.mulf %277, %275 : vector<2x8x256xf32>
    %279 = arith.addf %254, %278 : vector<2x8x256xf32>
    %c34 = arith.constant 34 : index
    %280 = memref.load %arg1[%c34] : memref<127xf32, #tpu.memory_space<smem>>
    %281 = vector.broadcast %280 : f32 to vector<2x8x256xf32>
    %282 = arith.mulf %281, %275 : vector<2x8x256xf32>
    %283 = arith.addf %258, %282 : vector<2x8x256xf32>
    %c59 = arith.constant 59 : index
    %284 = memref.load %arg1[%c59] : memref<127xf32, #tpu.memory_space<smem>>
    %285 = vector.broadcast %284 : f32 to vector<2x8x256xf32>
    %286 = arith.mulf %285, %275 : vector<2x8x256xf32>
    %287 = arith.addf %262, %286 : vector<2x8x256xf32>
    %c84 = arith.constant 84 : index
    %288 = memref.load %arg1[%c84] : memref<127xf32, #tpu.memory_space<smem>>
    %289 = vector.broadcast %288 : f32 to vector<2x8x256xf32>
    %290 = arith.mulf %289, %275 : vector<2x8x256xf32>
    %291 = arith.addf %266, %290 : vector<2x8x256xf32>
    %c109 = arith.constant 109 : index
    %292 = memref.load %arg1[%c109] : memref<127xf32, #tpu.memory_space<smem>>
    %293 = vector.broadcast %292 : f32 to vector<2x8x256xf32>
    %294 = arith.mulf %293, %275 : vector<2x8x256xf32>
    %295 = arith.addf %270, %294 : vector<2x8x256xf32>
    %c0_52 = arith.constant 0 : index
    %c0_53 = arith.constant 0 : index
    %c126_54 = arith.constant 126 : index
    %296 = vector.load %arg4[%c0_52, %c0_53, %c126_54] : memref<2x8x512xf32, #tpu.memory_space<vmem>>, vector<2x8x256xf32>
    %cst_55 = arith.constant 0.000000e+00 : f32
    %297 = vector.shape_cast %31 : vector<1x1x256xi1> to vector<1x1x256xi1>
    %298 = vector.broadcast %297 : vector<1x1x256xi1> to vector<2x8x256xi1>
    %299 = vector.broadcast %cst_55 : f32 to vector<2x8x256xf32>
    %300 = arith.select %298, %296, %299 : vector<2x8x256xi1>, vector<2x8x256xf32>
    %c10 = arith.constant 10 : index
    %301 = memref.load %arg1[%c10] : memref<127xf32, #tpu.memory_space<smem>>
    %302 = vector.broadcast %301 : f32 to vector<2x8x256xf32>
    %303 = arith.mulf %302, %300 : vector<2x8x256xf32>
    %304 = arith.addf %279, %303 : vector<2x8x256xf32>
    %c35 = arith.constant 35 : index
    %305 = memref.load %arg1[%c35] : memref<127xf32, #tpu.memory_space<smem>>
    %306 = vector.broadcast %305 : f32 to vector<2x8x256xf32>
    %307 = arith.mulf %306, %300 : vector<2x8x256xf32>
    %308 = arith.addf %283, %307 : vector<2x8x256xf32>
    %c60 = arith.constant 60 : index
    %309 = memref.load %arg1[%c60] : memref<127xf32, #tpu.memory_space<smem>>
    %310 = vector.broadcast %309 : f32 to vector<2x8x256xf32>
    %311 = arith.mulf %310, %300 : vector<2x8x256xf32>
    %312 = arith.addf %287, %311 : vector<2x8x256xf32>
    %c85 = arith.constant 85 : index
    %313 = memref.load %arg1[%c85] : memref<127xf32, #tpu.memory_space<smem>>
    %314 = vector.broadcast %313 : f32 to vector<2x8x256xf32>
    %315 = arith.mulf %314, %300 : vector<2x8x256xf32>
    %316 = arith.addf %291, %315 : vector<2x8x256xf32>
    %c110_56 = arith.constant 110 : index
    %317 = memref.load %arg1[%c110_56] : memref<127xf32, #tpu.memory_space<smem>>
    %318 = vector.broadcast %317 : f32 to vector<2x8x256xf32>
    %319 = arith.mulf %318, %300 : vector<2x8x256xf32>
    %320 = arith.addf %295, %319 : vector<2x8x256xf32>
    %c0_57 = arith.constant 0 : index
    %c0_58 = arith.constant 0 : index
    %c127 = arith.constant 127 : index
    %321 = vector.load %arg4[%c0_57, %c0_58, %c127] : memref<2x8x512xf32, #tpu.memory_space<vmem>>, vector<2x8x256xf32>
    %cst_59 = arith.constant 0.000000e+00 : f32
    %322 = vector.shape_cast %40 : vector<1x1x256xi1> to vector<1x1x256xi1>
    %323 = vector.broadcast %322 : vector<1x1x256xi1> to vector<2x8x256xi1>
    %324 = vector.broadcast %cst_59 : f32 to vector<2x8x256xf32>
    %325 = arith.select %323, %321, %324 : vector<2x8x256xi1>, vector<2x8x256xf32>
    %c11 = arith.constant 11 : index
    %326 = memref.load %arg1[%c11] : memref<127xf32, #tpu.memory_space<smem>>
    %327 = vector.broadcast %326 : f32 to vector<2x8x256xf32>
    %328 = arith.mulf %327, %325 : vector<2x8x256xf32>
    %329 = arith.addf %304, %328 : vector<2x8x256xf32>
    %c36 = arith.constant 36 : index
    %330 = memref.load %arg1[%c36] : memref<127xf32, #tpu.memory_space<smem>>
    %331 = vector.broadcast %330 : f32 to vector<2x8x256xf32>
    %332 = arith.mulf %331, %325 : vector<2x8x256xf32>
    %333 = arith.addf %308, %332 : vector<2x8x256xf32>
    %c61 = arith.constant 61 : index
    %334 = memref.load %arg1[%c61] : memref<127xf32, #tpu.memory_space<smem>>
    %335 = vector.broadcast %334 : f32 to vector<2x8x256xf32>
    %336 = arith.mulf %335, %325 : vector<2x8x256xf32>
    %337 = arith.addf %312, %336 : vector<2x8x256xf32>
    %c86 = arith.constant 86 : index
    %338 = memref.load %arg1[%c86] : memref<127xf32, #tpu.memory_space<smem>>
    %339 = vector.broadcast %338 : f32 to vector<2x8x256xf32>
    %340 = arith.mulf %339, %325 : vector<2x8x256xf32>
    %341 = arith.addf %316, %340 : vector<2x8x256xf32>
    %c111_60 = arith.constant 111 : index
    %342 = memref.load %arg1[%c111_60] : memref<127xf32, #tpu.memory_space<smem>>
    %343 = vector.broadcast %342 : f32 to vector<2x8x256xf32>
    %344 = arith.mulf %343, %325 : vector<2x8x256xf32>
    %345 = arith.addf %320, %344 : vector<2x8x256xf32>
    %c0_61 = arith.constant 0 : index
    %c0_62 = arith.constant 0 : index
    %c128_63 = arith.constant 128 : index
    %346 = vector.load %arg4[%c0_61, %c0_62, %c128_63] : memref<2x8x512xf32, #tpu.memory_space<vmem>>, vector<2x8x256xf32>
    %c12 = arith.constant 12 : index
    %347 = memref.load %arg1[%c12] : memref<127xf32, #tpu.memory_space<smem>>
    %348 = vector.broadcast %347 : f32 to vector<2x8x256xf32>
    %349 = arith.mulf %348, %346 : vector<2x8x256xf32>
    %350 = arith.addf %329, %349 : vector<2x8x256xf32>
    %c37 = arith.constant 37 : index
    %351 = memref.load %arg1[%c37] : memref<127xf32, #tpu.memory_space<smem>>
    %352 = vector.broadcast %351 : f32 to vector<2x8x256xf32>
    %353 = arith.mulf %352, %346 : vector<2x8x256xf32>
    %354 = arith.addf %333, %353 : vector<2x8x256xf32>
    %c62 = arith.constant 62 : index
    %355 = memref.load %arg1[%c62] : memref<127xf32, #tpu.memory_space<smem>>
    %356 = vector.broadcast %355 : f32 to vector<2x8x256xf32>
    %357 = arith.mulf %356, %346 : vector<2x8x256xf32>
    %358 = arith.addf %337, %357 : vector<2x8x256xf32>
    %c87 = arith.constant 87 : index
    %359 = memref.load %arg1[%c87] : memref<127xf32, #tpu.memory_space<smem>>
    %360 = vector.broadcast %359 : f32 to vector<2x8x256xf32>
    %361 = arith.mulf %360, %346 : vector<2x8x256xf32>
    %362 = arith.addf %341, %361 : vector<2x8x256xf32>
    %c112_64 = arith.constant 112 : index
    %363 = memref.load %arg1[%c112_64] : memref<127xf32, #tpu.memory_space<smem>>
    %364 = vector.broadcast %363 : f32 to vector<2x8x256xf32>
    %365 = arith.mulf %364, %346 : vector<2x8x256xf32>
    %366 = arith.addf %345, %365 : vector<2x8x256xf32>
    %c0_65 = arith.constant 0 : index
    %c0_66 = arith.constant 0 : index
    %c129 = arith.constant 129 : index
    %367 = vector.load %arg4[%c0_65, %c0_66, %c129] : memref<2x8x512xf32, #tpu.memory_space<vmem>>, vector<2x8x256xf32>
    %cst_67 = arith.constant 0.000000e+00 : f32
    %368 = vector.shape_cast %49 : vector<1x1x256xi1> to vector<1x1x256xi1>
    %369 = vector.broadcast %368 : vector<1x1x256xi1> to vector<2x8x256xi1>
    %370 = vector.broadcast %cst_67 : f32 to vector<2x8x256xf32>
    %371 = arith.select %369, %367, %370 : vector<2x8x256xi1>, vector<2x8x256xf32>
    %c13 = arith.constant 13 : index
    %372 = memref.load %arg1[%c13] : memref<127xf32, #tpu.memory_space<smem>>
    %373 = vector.broadcast %372 : f32 to vector<2x8x256xf32>
    %374 = arith.mulf %373, %371 : vector<2x8x256xf32>
    %375 = arith.addf %350, %374 : vector<2x8x256xf32>
    %c38 = arith.constant 38 : index
    %376 = memref.load %arg1[%c38] : memref<127xf32, #tpu.memory_space<smem>>
    %377 = vector.broadcast %376 : f32 to vector<2x8x256xf32>
    %378 = arith.mulf %377, %371 : vector<2x8x256xf32>
    %379 = arith.addf %354, %378 : vector<2x8x256xf32>
    %c63 = arith.constant 63 : index
    %380 = memref.load %arg1[%c63] : memref<127xf32, #tpu.memory_space<smem>>
    %381 = vector.broadcast %380 : f32 to vector<2x8x256xf32>
    %382 = arith.mulf %381, %371 : vector<2x8x256xf32>
    %383 = arith.addf %358, %382 : vector<2x8x256xf32>
    %c88 = arith.constant 88 : index
    %384 = memref.load %arg1[%c88] : memref<127xf32, #tpu.memory_space<smem>>
    %385 = vector.broadcast %384 : f32 to vector<2x8x256xf32>
    %386 = arith.mulf %385, %371 : vector<2x8x256xf32>
    %387 = arith.addf %362, %386 : vector<2x8x256xf32>
    %c113_68 = arith.constant 113 : index
    %388 = memref.load %arg1[%c113_68] : memref<127xf32, #tpu.memory_space<smem>>
    %389 = vector.broadcast %388 : f32 to vector<2x8x256xf32>
    %390 = arith.mulf %389, %371 : vector<2x8x256xf32>
    %391 = arith.addf %366, %390 : vector<2x8x256xf32>
    %c0_69 = arith.constant 0 : index
    %c0_70 = arith.constant 0 : index
    %c130 = arith.constant 130 : index
    %392 = vector.load %arg4[%c0_69, %c0_70, %c130] : memref<2x8x512xf32, #tpu.memory_space<vmem>>, vector<2x8x256xf32>
    %cst_71 = arith.constant 0.000000e+00 : f32
    %393 = vector.shape_cast %58 : vector<1x1x256xi1> to vector<1x1x256xi1>
    %394 = vector.broadcast %393 : vector<1x1x256xi1> to vector<2x8x256xi1>
    %395 = vector.broadcast %cst_71 : f32 to vector<2x8x256xf32>
    %396 = arith.select %394, %392, %395 : vector<2x8x256xi1>, vector<2x8x256xf32>
    %c14 = arith.constant 14 : index
    %397 = memref.load %arg1[%c14] : memref<127xf32, #tpu.memory_space<smem>>
    %398 = vector.broadcast %397 : f32 to vector<2x8x256xf32>
    %399 = arith.mulf %398, %396 : vector<2x8x256xf32>
    %400 = arith.addf %375, %399 : vector<2x8x256xf32>
    %c39 = arith.constant 39 : index
    %401 = memref.load %arg1[%c39] : memref<127xf32, #tpu.memory_space<smem>>
    %402 = vector.broadcast %401 : f32 to vector<2x8x256xf32>
    %403 = arith.mulf %402, %396 : vector<2x8x256xf32>
    %404 = arith.addf %379, %403 : vector<2x8x256xf32>
    %c64 = arith.constant 64 : index
    %405 = memref.load %arg1[%c64] : memref<127xf32, #tpu.memory_space<smem>>
    %406 = vector.broadcast %405 : f32 to vector<2x8x256xf32>
    %407 = arith.mulf %406, %396 : vector<2x8x256xf32>
    %408 = arith.addf %383, %407 : vector<2x8x256xf32>
    %c89 = arith.constant 89 : index
    %409 = memref.load %arg1[%c89] : memref<127xf32, #tpu.memory_space<smem>>
    %410 = vector.broadcast %409 : f32 to vector<2x8x256xf32>
    %411 = arith.mulf %410, %396 : vector<2x8x256xf32>
    %412 = arith.addf %387, %411 : vector<2x8x256xf32>
    %c114_72 = arith.constant 114 : index
    %413 = memref.load %arg1[%c114_72] : memref<127xf32, #tpu.memory_space<smem>>
    %414 = vector.broadcast %413 : f32 to vector<2x8x256xf32>
    %415 = arith.mulf %414, %396 : vector<2x8x256xf32>
    %416 = arith.addf %391, %415 : vector<2x8x256xf32>
    %c0_73 = arith.constant 0 : index
    %c0_74 = arith.constant 0 : index
    %c142 = arith.constant 142 : index
    %417 = vector.load %arg4[%c0_73, %c0_74, %c142] : memref<2x8x512xf32, #tpu.memory_space<vmem>>, vector<2x8x256xf32>
    %cst_75 = arith.constant 0.000000e+00 : f32
    %418 = vector.shape_cast %31 : vector<1x1x256xi1> to vector<1x1x256xi1>
    %419 = vector.broadcast %418 : vector<1x1x256xi1> to vector<2x8x256xi1>
    %420 = vector.broadcast %cst_75 : f32 to vector<2x8x256xf32>
    %421 = arith.select %419, %417, %420 : vector<2x8x256xi1>, vector<2x8x256xf32>
    %c15 = arith.constant 15 : index
    %422 = memref.load %arg1[%c15] : memref<127xf32, #tpu.memory_space<smem>>
    %423 = vector.broadcast %422 : f32 to vector<2x8x256xf32>
    %424 = arith.mulf %423, %421 : vector<2x8x256xf32>
    %425 = arith.addf %400, %424 : vector<2x8x256xf32>
    %c40 = arith.constant 40 : index
    %426 = memref.load %arg1[%c40] : memref<127xf32, #tpu.memory_space<smem>>
    %427 = vector.broadcast %426 : f32 to vector<2x8x256xf32>
    %428 = arith.mulf %427, %421 : vector<2x8x256xf32>
    %429 = arith.addf %404, %428 : vector<2x8x256xf32>
    %c65 = arith.constant 65 : index
    %430 = memref.load %arg1[%c65] : memref<127xf32, #tpu.memory_space<smem>>
    %431 = vector.broadcast %430 : f32 to vector<2x8x256xf32>
    %432 = arith.mulf %431, %421 : vector<2x8x256xf32>
    %433 = arith.addf %408, %432 : vector<2x8x256xf32>
    %c90 = arith.constant 90 : index
    %434 = memref.load %arg1[%c90] : memref<127xf32, #tpu.memory_space<smem>>
    %435 = vector.broadcast %434 : f32 to vector<2x8x256xf32>
    %436 = arith.mulf %435, %421 : vector<2x8x256xf32>
    %437 = arith.addf %412, %436 : vector<2x8x256xf32>
    %c115 = arith.constant 115 : index
    %438 = memref.load %arg1[%c115] : memref<127xf32, #tpu.memory_space<smem>>
    %439 = vector.broadcast %438 : f32 to vector<2x8x256xf32>
    %440 = arith.mulf %439, %421 : vector<2x8x256xf32>
    %441 = arith.addf %416, %440 : vector<2x8x256xf32>
    %c0_76 = arith.constant 0 : index
    %c0_77 = arith.constant 0 : index
    %c143 = arith.constant 143 : index
    %442 = vector.load %arg4[%c0_76, %c0_77, %c143] : memref<2x8x512xf32, #tpu.memory_space<vmem>>, vector<2x8x256xf32>
    %cst_78 = arith.constant 0.000000e+00 : f32
    %443 = vector.shape_cast %40 : vector<1x1x256xi1> to vector<1x1x256xi1>
    %444 = vector.broadcast %443 : vector<1x1x256xi1> to vector<2x8x256xi1>
    %445 = vector.broadcast %cst_78 : f32 to vector<2x8x256xf32>
    %446 = arith.select %444, %442, %445 : vector<2x8x256xi1>, vector<2x8x256xf32>
    %c16 = arith.constant 16 : index
    %447 = memref.load %arg1[%c16] : memref<127xf32, #tpu.memory_space<smem>>
    %448 = vector.broadcast %447 : f32 to vector<2x8x256xf32>
    %449 = arith.mulf %448, %446 : vector<2x8x256xf32>
    %450 = arith.addf %425, %449 : vector<2x8x256xf32>
    %c41 = arith.constant 41 : index
    %451 = memref.load %arg1[%c41] : memref<127xf32, #tpu.memory_space<smem>>
    %452 = vector.broadcast %451 : f32 to vector<2x8x256xf32>
    %453 = arith.mulf %452, %446 : vector<2x8x256xf32>
    %454 = arith.addf %429, %453 : vector<2x8x256xf32>
    %c66 = arith.constant 66 : index
    %455 = memref.load %arg1[%c66] : memref<127xf32, #tpu.memory_space<smem>>
    %456 = vector.broadcast %455 : f32 to vector<2x8x256xf32>
    %457 = arith.mulf %456, %446 : vector<2x8x256xf32>
    %458 = arith.addf %433, %457 : vector<2x8x256xf32>
    %c91 = arith.constant 91 : index
    %459 = memref.load %arg1[%c91] : memref<127xf32, #tpu.memory_space<smem>>
    %460 = vector.broadcast %459 : f32 to vector<2x8x256xf32>
    %461 = arith.mulf %460, %446 : vector<2x8x256xf32>
    %462 = arith.addf %437, %461 : vector<2x8x256xf32>
    %c116 = arith.constant 116 : index
    %463 = memref.load %arg1[%c116] : memref<127xf32, #tpu.memory_space<smem>>
    %464 = vector.broadcast %463 : f32 to vector<2x8x256xf32>
    %465 = arith.mulf %464, %446 : vector<2x8x256xf32>
    %466 = arith.addf %441, %465 : vector<2x8x256xf32>
    %c0_79 = arith.constant 0 : index
    %c0_80 = arith.constant 0 : index
    %c144 = arith.constant 144 : index
    %467 = vector.load %arg4[%c0_79, %c0_80, %c144] : memref<2x8x512xf32, #tpu.memory_space<vmem>>, vector<2x8x256xf32>
    %c17 = arith.constant 17 : index
    %468 = memref.load %arg1[%c17] : memref<127xf32, #tpu.memory_space<smem>>
    %469 = vector.broadcast %468 : f32 to vector<2x8x256xf32>
    %470 = arith.mulf %469, %467 : vector<2x8x256xf32>
    %471 = arith.addf %450, %470 : vector<2x8x256xf32>
    %c42 = arith.constant 42 : index
    %472 = memref.load %arg1[%c42] : memref<127xf32, #tpu.memory_space<smem>>
    %473 = vector.broadcast %472 : f32 to vector<2x8x256xf32>
    %474 = arith.mulf %473, %467 : vector<2x8x256xf32>
    %475 = arith.addf %454, %474 : vector<2x8x256xf32>
    %c67 = arith.constant 67 : index
    %476 = memref.load %arg1[%c67] : memref<127xf32, #tpu.memory_space<smem>>
    %477 = vector.broadcast %476 : f32 to vector<2x8x256xf32>
    %478 = arith.mulf %477, %467 : vector<2x8x256xf32>
    %479 = arith.addf %458, %478 : vector<2x8x256xf32>
    %c92 = arith.constant 92 : index
    %480 = memref.load %arg1[%c92] : memref<127xf32, #tpu.memory_space<smem>>
    %481 = vector.broadcast %480 : f32 to vector<2x8x256xf32>
    %482 = arith.mulf %481, %467 : vector<2x8x256xf32>
    %483 = arith.addf %462, %482 : vector<2x8x256xf32>
    %c117 = arith.constant 117 : index
    %484 = memref.load %arg1[%c117] : memref<127xf32, #tpu.memory_space<smem>>
    %485 = vector.broadcast %484 : f32 to vector<2x8x256xf32>
    %486 = arith.mulf %485, %467 : vector<2x8x256xf32>
    %487 = arith.addf %466, %486 : vector<2x8x256xf32>
    %c0_81 = arith.constant 0 : index
    %c0_82 = arith.constant 0 : index
    %c145 = arith.constant 145 : index
    %488 = vector.load %arg4[%c0_81, %c0_82, %c145] : memref<2x8x512xf32, #tpu.memory_space<vmem>>, vector<2x8x256xf32>
    %cst_83 = arith.constant 0.000000e+00 : f32
    %489 = vector.shape_cast %49 : vector<1x1x256xi1> to vector<1x1x256xi1>
    %490 = vector.broadcast %489 : vector<1x1x256xi1> to vector<2x8x256xi1>
    %491 = vector.broadcast %cst_83 : f32 to vector<2x8x256xf32>
    %492 = arith.select %490, %488, %491 : vector<2x8x256xi1>, vector<2x8x256xf32>
    %c18 = arith.constant 18 : index
    %493 = memref.load %arg1[%c18] : memref<127xf32, #tpu.memory_space<smem>>
    %494 = vector.broadcast %493 : f32 to vector<2x8x256xf32>
    %495 = arith.mulf %494, %492 : vector<2x8x256xf32>
    %496 = arith.addf %471, %495 : vector<2x8x256xf32>
    %c43 = arith.constant 43 : index
    %497 = memref.load %arg1[%c43] : memref<127xf32, #tpu.memory_space<smem>>
    %498 = vector.broadcast %497 : f32 to vector<2x8x256xf32>
    %499 = arith.mulf %498, %492 : vector<2x8x256xf32>
    %500 = arith.addf %475, %499 : vector<2x8x256xf32>
    %c68 = arith.constant 68 : index
    %501 = memref.load %arg1[%c68] : memref<127xf32, #tpu.memory_space<smem>>
    %502 = vector.broadcast %501 : f32 to vector<2x8x256xf32>
    %503 = arith.mulf %502, %492 : vector<2x8x256xf32>
    %504 = arith.addf %479, %503 : vector<2x8x256xf32>
    %c93 = arith.constant 93 : index
    %505 = memref.load %arg1[%c93] : memref<127xf32, #tpu.memory_space<smem>>
    %506 = vector.broadcast %505 : f32 to vector<2x8x256xf32>
    %507 = arith.mulf %506, %492 : vector<2x8x256xf32>
    %508 = arith.addf %483, %507 : vector<2x8x256xf32>
    %c118 = arith.constant 118 : index
    %509 = memref.load %arg1[%c118] : memref<127xf32, #tpu.memory_space<smem>>
    %510 = vector.broadcast %509 : f32 to vector<2x8x256xf32>
    %511 = arith.mulf %510, %492 : vector<2x8x256xf32>
    %512 = arith.addf %487, %511 : vector<2x8x256xf32>
    %c0_84 = arith.constant 0 : index
    %c0_85 = arith.constant 0 : index
    %c146 = arith.constant 146 : index
    %513 = vector.load %arg4[%c0_84, %c0_85, %c146] : memref<2x8x512xf32, #tpu.memory_space<vmem>>, vector<2x8x256xf32>
    %cst_86 = arith.constant 0.000000e+00 : f32
    %514 = vector.shape_cast %58 : vector<1x1x256xi1> to vector<1x1x256xi1>
    %515 = vector.broadcast %514 : vector<1x1x256xi1> to vector<2x8x256xi1>
    %516 = vector.broadcast %cst_86 : f32 to vector<2x8x256xf32>
    %517 = arith.select %515, %513, %516 : vector<2x8x256xi1>, vector<2x8x256xf32>
    %c19 = arith.constant 19 : index
    %518 = memref.load %arg1[%c19] : memref<127xf32, #tpu.memory_space<smem>>
    %519 = vector.broadcast %518 : f32 to vector<2x8x256xf32>
    %520 = arith.mulf %519, %517 : vector<2x8x256xf32>
    %521 = arith.addf %496, %520 : vector<2x8x256xf32>
    %c44 = arith.constant 44 : index
    %522 = memref.load %arg1[%c44] : memref<127xf32, #tpu.memory_space<smem>>
    %523 = vector.broadcast %522 : f32 to vector<2x8x256xf32>
    %524 = arith.mulf %523, %517 : vector<2x8x256xf32>
    %525 = arith.addf %500, %524 : vector<2x8x256xf32>
    %c69 = arith.constant 69 : index
    %526 = memref.load %arg1[%c69] : memref<127xf32, #tpu.memory_space<smem>>
    %527 = vector.broadcast %526 : f32 to vector<2x8x256xf32>
    %528 = arith.mulf %527, %517 : vector<2x8x256xf32>
    %529 = arith.addf %504, %528 : vector<2x8x256xf32>
    %c94_87 = arith.constant 94 : index
    %530 = memref.load %arg1[%c94_87] : memref<127xf32, #tpu.memory_space<smem>>
    %531 = vector.broadcast %530 : f32 to vector<2x8x256xf32>
    %532 = arith.mulf %531, %517 : vector<2x8x256xf32>
    %533 = arith.addf %508, %532 : vector<2x8x256xf32>
    %c119 = arith.constant 119 : index
    %534 = memref.load %arg1[%c119] : memref<127xf32, #tpu.memory_space<smem>>
    %535 = vector.broadcast %534 : f32 to vector<2x8x256xf32>
    %536 = arith.mulf %535, %517 : vector<2x8x256xf32>
    %537 = arith.addf %512, %536 : vector<2x8x256xf32>
    %c0_88 = arith.constant 0 : index
    %c0_89 = arith.constant 0 : index
    %c158 = arith.constant 158 : index
    %538 = vector.load %arg4[%c0_88, %c0_89, %c158] : memref<2x8x512xf32, #tpu.memory_space<vmem>>, vector<2x8x256xf32>
    %cst_90 = arith.constant 0.000000e+00 : f32
    %539 = vector.shape_cast %31 : vector<1x1x256xi1> to vector<1x1x256xi1>
    %540 = vector.broadcast %539 : vector<1x1x256xi1> to vector<2x8x256xi1>
    %541 = vector.broadcast %cst_90 : f32 to vector<2x8x256xf32>
    %542 = arith.select %540, %538, %541 : vector<2x8x256xi1>, vector<2x8x256xf32>
    %c20 = arith.constant 20 : index
    %543 = memref.load %arg1[%c20] : memref<127xf32, #tpu.memory_space<smem>>
    %544 = vector.broadcast %543 : f32 to vector<2x8x256xf32>
    %545 = arith.mulf %544, %542 : vector<2x8x256xf32>
    %546 = arith.addf %521, %545 : vector<2x8x256xf32>
    %c45 = arith.constant 45 : index
    %547 = memref.load %arg1[%c45] : memref<127xf32, #tpu.memory_space<smem>>
    %548 = vector.broadcast %547 : f32 to vector<2x8x256xf32>
    %549 = arith.mulf %548, %542 : vector<2x8x256xf32>
    %550 = arith.addf %525, %549 : vector<2x8x256xf32>
    %c70 = arith.constant 70 : index
    %551 = memref.load %arg1[%c70] : memref<127xf32, #tpu.memory_space<smem>>
    %552 = vector.broadcast %551 : f32 to vector<2x8x256xf32>
    %553 = arith.mulf %552, %542 : vector<2x8x256xf32>
    %554 = arith.addf %529, %553 : vector<2x8x256xf32>
    %c95_91 = arith.constant 95 : index
    %555 = memref.load %arg1[%c95_91] : memref<127xf32, #tpu.memory_space<smem>>
    %556 = vector.broadcast %555 : f32 to vector<2x8x256xf32>
    %557 = arith.mulf %556, %542 : vector<2x8x256xf32>
    %558 = arith.addf %533, %557 : vector<2x8x256xf32>
    %c120 = arith.constant 120 : index
    %559 = memref.load %arg1[%c120] : memref<127xf32, #tpu.memory_space<smem>>
    %560 = vector.broadcast %559 : f32 to vector<2x8x256xf32>
    %561 = arith.mulf %560, %542 : vector<2x8x256xf32>
    %562 = arith.addf %537, %561 : vector<2x8x256xf32>
    %c0_92 = arith.constant 0 : index
    %c0_93 = arith.constant 0 : index
    %c159 = arith.constant 159 : index
    %563 = vector.load %arg4[%c0_92, %c0_93, %c159] : memref<2x8x512xf32, #tpu.memory_space<vmem>>, vector<2x8x256xf32>
    %cst_94 = arith.constant 0.000000e+00 : f32
    %564 = vector.shape_cast %40 : vector<1x1x256xi1> to vector<1x1x256xi1>
    %565 = vector.broadcast %564 : vector<1x1x256xi1> to vector<2x8x256xi1>
    %566 = vector.broadcast %cst_94 : f32 to vector<2x8x256xf32>
    %567 = arith.select %565, %563, %566 : vector<2x8x256xi1>, vector<2x8x256xf32>
    %c21 = arith.constant 21 : index
    %568 = memref.load %arg1[%c21] : memref<127xf32, #tpu.memory_space<smem>>
    %569 = vector.broadcast %568 : f32 to vector<2x8x256xf32>
    %570 = arith.mulf %569, %567 : vector<2x8x256xf32>
    %571 = arith.addf %546, %570 : vector<2x8x256xf32>
    %c46 = arith.constant 46 : index
    %572 = memref.load %arg1[%c46] : memref<127xf32, #tpu.memory_space<smem>>
    %573 = vector.broadcast %572 : f32 to vector<2x8x256xf32>
    %574 = arith.mulf %573, %567 : vector<2x8x256xf32>
    %575 = arith.addf %550, %574 : vector<2x8x256xf32>
    %c71 = arith.constant 71 : index
    %576 = memref.load %arg1[%c71] : memref<127xf32, #tpu.memory_space<smem>>
    %577 = vector.broadcast %576 : f32 to vector<2x8x256xf32>
    %578 = arith.mulf %577, %567 : vector<2x8x256xf32>
    %579 = arith.addf %554, %578 : vector<2x8x256xf32>
    %c96_95 = arith.constant 96 : index
    %580 = memref.load %arg1[%c96_95] : memref<127xf32, #tpu.memory_space<smem>>
    %581 = vector.broadcast %580 : f32 to vector<2x8x256xf32>
    %582 = arith.mulf %581, %567 : vector<2x8x256xf32>
    %583 = arith.addf %558, %582 : vector<2x8x256xf32>
    %c121 = arith.constant 121 : index
    %584 = memref.load %arg1[%c121] : memref<127xf32, #tpu.memory_space<smem>>
    %585 = vector.broadcast %584 : f32 to vector<2x8x256xf32>
    %586 = arith.mulf %585, %567 : vector<2x8x256xf32>
    %587 = arith.addf %562, %586 : vector<2x8x256xf32>
    %c0_96 = arith.constant 0 : index
    %c0_97 = arith.constant 0 : index
    %c160 = arith.constant 160 : index
    %588 = vector.load %arg4[%c0_96, %c0_97, %c160] : memref<2x8x512xf32, #tpu.memory_space<vmem>>, vector<2x8x256xf32>
    %c22 = arith.constant 22 : index
    %589 = memref.load %arg1[%c22] : memref<127xf32, #tpu.memory_space<smem>>
    %590 = vector.broadcast %589 : f32 to vector<2x8x256xf32>
    %591 = arith.mulf %590, %588 : vector<2x8x256xf32>
    %592 = arith.addf %571, %591 : vector<2x8x256xf32>
    %c47 = arith.constant 47 : index
    %593 = memref.load %arg1[%c47] : memref<127xf32, #tpu.memory_space<smem>>
    %594 = vector.broadcast %593 : f32 to vector<2x8x256xf32>
    %595 = arith.mulf %594, %588 : vector<2x8x256xf32>
    %596 = arith.addf %575, %595 : vector<2x8x256xf32>
    %c72 = arith.constant 72 : index
    %597 = memref.load %arg1[%c72] : memref<127xf32, #tpu.memory_space<smem>>
    %598 = vector.broadcast %597 : f32 to vector<2x8x256xf32>
    %599 = arith.mulf %598, %588 : vector<2x8x256xf32>
    %600 = arith.addf %579, %599 : vector<2x8x256xf32>
    %c97_98 = arith.constant 97 : index
    %601 = memref.load %arg1[%c97_98] : memref<127xf32, #tpu.memory_space<smem>>
    %602 = vector.broadcast %601 : f32 to vector<2x8x256xf32>
    %603 = arith.mulf %602, %588 : vector<2x8x256xf32>
    %604 = arith.addf %583, %603 : vector<2x8x256xf32>
    %c122 = arith.constant 122 : index
    %605 = memref.load %arg1[%c122] : memref<127xf32, #tpu.memory_space<smem>>
    %606 = vector.broadcast %605 : f32 to vector<2x8x256xf32>
    %607 = arith.mulf %606, %588 : vector<2x8x256xf32>
    %608 = arith.addf %587, %607 : vector<2x8x256xf32>
    %c0_99 = arith.constant 0 : index
    %c0_100 = arith.constant 0 : index
    %c161 = arith.constant 161 : index
    %609 = vector.load %arg4[%c0_99, %c0_100, %c161] : memref<2x8x512xf32, #tpu.memory_space<vmem>>, vector<2x8x256xf32>
    %cst_101 = arith.constant 0.000000e+00 : f32
    %610 = vector.shape_cast %49 : vector<1x1x256xi1> to vector<1x1x256xi1>
    %611 = vector.broadcast %610 : vector<1x1x256xi1> to vector<2x8x256xi1>
    %612 = vector.broadcast %cst_101 : f32 to vector<2x8x256xf32>
    %613 = arith.select %611, %609, %612 : vector<2x8x256xi1>, vector<2x8x256xf32>
    %c23 = arith.constant 23 : index
    %614 = memref.load %arg1[%c23] : memref<127xf32, #tpu.memory_space<smem>>
    %615 = vector.broadcast %614 : f32 to vector<2x8x256xf32>
    %616 = arith.mulf %615, %613 : vector<2x8x256xf32>
    %617 = arith.addf %592, %616 : vector<2x8x256xf32>
    %c48 = arith.constant 48 : index
    %618 = memref.load %arg1[%c48] : memref<127xf32, #tpu.memory_space<smem>>
    %619 = vector.broadcast %618 : f32 to vector<2x8x256xf32>
    %620 = arith.mulf %619, %613 : vector<2x8x256xf32>
    %621 = arith.addf %596, %620 : vector<2x8x256xf32>
    %c73 = arith.constant 73 : index
    %622 = memref.load %arg1[%c73] : memref<127xf32, #tpu.memory_space<smem>>
    %623 = vector.broadcast %622 : f32 to vector<2x8x256xf32>
    %624 = arith.mulf %623, %613 : vector<2x8x256xf32>
    %625 = arith.addf %600, %624 : vector<2x8x256xf32>
    %c98_102 = arith.constant 98 : index
    %626 = memref.load %arg1[%c98_102] : memref<127xf32, #tpu.memory_space<smem>>
    %627 = vector.broadcast %626 : f32 to vector<2x8x256xf32>
    %628 = arith.mulf %627, %613 : vector<2x8x256xf32>
    %629 = arith.addf %604, %628 : vector<2x8x256xf32>
    %c123 = arith.constant 123 : index
    %630 = memref.load %arg1[%c123] : memref<127xf32, #tpu.memory_space<smem>>
    %631 = vector.broadcast %630 : f32 to vector<2x8x256xf32>
    %632 = arith.mulf %631, %613 : vector<2x8x256xf32>
    %633 = arith.addf %608, %632 : vector<2x8x256xf32>
    %c0_103 = arith.constant 0 : index
    %c0_104 = arith.constant 0 : index
    %c162 = arith.constant 162 : index
    %634 = vector.load %arg4[%c0_103, %c0_104, %c162] : memref<2x8x512xf32, #tpu.memory_space<vmem>>, vector<2x8x256xf32>
    %cst_105 = arith.constant 0.000000e+00 : f32
    %635 = vector.shape_cast %58 : vector<1x1x256xi1> to vector<1x1x256xi1>
    %636 = vector.broadcast %635 : vector<1x1x256xi1> to vector<2x8x256xi1>
    %637 = vector.broadcast %cst_105 : f32 to vector<2x8x256xf32>
    %638 = arith.select %636, %634, %637 : vector<2x8x256xi1>, vector<2x8x256xf32>
    %c24 = arith.constant 24 : index
    %639 = memref.load %arg1[%c24] : memref<127xf32, #tpu.memory_space<smem>>
    %640 = vector.broadcast %639 : f32 to vector<2x8x256xf32>
    %641 = arith.mulf %640, %638 : vector<2x8x256xf32>
    %642 = arith.addf %617, %641 : vector<2x8x256xf32>
    %c49 = arith.constant 49 : index
    %643 = memref.load %arg1[%c49] : memref<127xf32, #tpu.memory_space<smem>>
    %644 = vector.broadcast %643 : f32 to vector<2x8x256xf32>
    %645 = arith.mulf %644, %638 : vector<2x8x256xf32>
    %646 = arith.addf %621, %645 : vector<2x8x256xf32>
    %c74 = arith.constant 74 : index
    %647 = memref.load %arg1[%c74] : memref<127xf32, #tpu.memory_space<smem>>
    %648 = vector.broadcast %647 : f32 to vector<2x8x256xf32>
    %649 = arith.mulf %648, %638 : vector<2x8x256xf32>
    %650 = arith.addf %625, %649 : vector<2x8x256xf32>
    %c99 = arith.constant 99 : index
    %651 = memref.load %arg1[%c99] : memref<127xf32, #tpu.memory_space<smem>>
    %652 = vector.broadcast %651 : f32 to vector<2x8x256xf32>
    %653 = arith.mulf %652, %638 : vector<2x8x256xf32>
    %654 = arith.addf %629, %653 : vector<2x8x256xf32>
    %c124 = arith.constant 124 : index
    %655 = memref.load %arg1[%c124] : memref<127xf32, #tpu.memory_space<smem>>
    %656 = vector.broadcast %655 : f32 to vector<2x8x256xf32>
    %657 = arith.mulf %656, %638 : vector<2x8x256xf32>
    %658 = arith.addf %633, %657 : vector<2x8x256xf32>
    %659 = vector.extract_strided_slice %642 {offsets = [0, 0, 0], sizes = [2, 4, 256], strides = [1, 1, 1]} : vector<2x8x256xf32> to vector<2x4x256xf32>
    %660 = vector.extract_strided_slice %646 {offsets = [0, 1, 0], sizes = [2, 4, 256], strides = [1, 1, 1]} : vector<2x8x256xf32> to vector<2x4x256xf32>
    %661 = arith.addf %659, %660 : vector<2x4x256xf32>
    %662 = vector.extract_strided_slice %650 {offsets = [0, 2, 0], sizes = [2, 4, 256], strides = [1, 1, 1]} : vector<2x8x256xf32> to vector<2x4x256xf32>
    %663 = vector.extract_strided_slice %654 {offsets = [0, 3, 0], sizes = [2, 4, 256], strides = [1, 1, 1]} : vector<2x8x256xf32> to vector<2x4x256xf32>
    %664 = arith.addf %662, %663 : vector<2x4x256xf32>
    %665 = arith.addf %661, %664 : vector<2x4x256xf32>
    %666 = vector.extract_strided_slice %658 {offsets = [0, 4, 0], sizes = [2, 4, 256], strides = [1, 1, 1]} : vector<2x8x256xf32> to vector<2x4x256xf32>
    %667 = arith.addf %665, %666 : vector<2x4x256xf32>
    %668 = vector.broadcast %0 : f32 to vector<2x4x256xf32>
    %669 = arith.addf %668, %667 : vector<2x4x256xf32>
    %cst_106 = arith.constant 0.000000e+00 : f32
    %670 = vector.broadcast %cst_106 : f32 to vector<2x4x256xf32>
    %671 = arith.subf %670, %669 : vector<2x4x256xf32>
    %672 = math.exp %671 : vector<2x4x256xf32>
    %cst_107 = arith.constant 1.000000e+00 : f32
    %673 = vector.broadcast %cst_107 : f32 to vector<2x4x256xf32>
    %674 = arith.addf %673, %672 : vector<2x4x256xf32>
    %675 = tpu.reciprocal %674 : vector<2x4x256xf32> -> vector<2x4x256xf32>
    %676 = vector.broadcast %1 : f32 to vector<2x4x256xf32>
    %677 = arith.mulf %676, %675 : vector<2x4x256xf32>
    %c0_108 = arith.constant 0 : index
    %c0_109 = arith.constant 0 : index
    %c0_110 = arith.constant 0 : index
    %678 = vector.load %arg2[%c0_108, %c0_109, %c0_110] : memref<2x4x256xf32, #tpu.memory_space<vmem>>, vector<2x4x256xf32>
    %679 = arith.mulf %678, %677 : vector<2x4x256xf32>
    %680 = arith.addf %679, %678 : vector<2x4x256xf32>
    %c0_111 = arith.constant 0 : index
    %c0_112 = arith.constant 0 : index
    %c0_113 = arith.constant 0 : index
    %681 = vector.load %arg3[%c0_111, %c0_112, %c0_113] : memref<2x4x256xf32, #tpu.memory_space<vmem>>, vector<2x4x256xf32>
    tpu.vector_store %arg3[%c0_111, %c0_112, %c0_113], %680 {strides = array<i32>} : memref<2x4x256xf32, #tpu.memory_space<vmem>>, vector<2x4x256xf32>,
    return
  }
  func.func @transform_0(%arg0: i32) -> i32 {
    %c0_i32 = arith.constant 0 : i32
    %c0_i32_0 = arith.constant 0 : i32
    return %c0_i32 : i32
  }
  func.func @transform_1(%arg0: i32) -> (i32, i32, i32) {
    %c0_i32 = arith.constant 0 : i32
    %c0_i32_0 = arith.constant 0 : i32
    %c0_i32_1 = arith.constant 0 : i32
    return %arg0, %c0_i32, %c0_i32_0 : i32, i32, i32
  }
  func.func @transform_2(%arg0: i32) -> (i32, i32, i32) {
    %c0_i32 = arith.constant 0 : i32
    %c0_i32_0 = arith.constant 0 : i32
    %c0_i32_1 = arith.constant 0 : i32
    return %arg0, %c0_i32, %c0_i32_0 : i32, i32, i32
  }
}

</mosaic_0001>

<bundles_post_ra>
// kernel: tpu_custom_call.1
= control target key start
LH: loop header
LB: loop body
LE: loop exit
PB: predicated region body
PF: predicated region fallthrough
CT: control target
= control target key end

     0   :  { %7 = vsyncpa [#allocation6], 0  ;;  %s6173_s0 = inlined_call_operand.hbm [shape: f32[127], index: 0, kind: input, shape index: {}]   ;;  %s6174_s1 = inlined_call_operand.hbm [shape: f32[2,4,256], index: 1, kind: input, shape index: {}]   ;;  %s6175_s2 = inlined_call_operand.hbm [shape: f32[2,4,256], index: 2, kind: output, shape index: {}]  }
   0x1   :  { %8 = vsyncpa [#allocation4], 0 }
   0x2   :  { %9 = vsyncpa [#allocation5], 0  ;;  %s2872_s11 = scalar_lea.hbm %s6173_s0, 16 }
   0x3   :  { %p2873_p0 = scmp.ne.s32.totalorder %s6173_s0, %s2872_s11  ;;  %p2876_p1 = scmp.lt.u32.totalorder %s2872_s11, %s6173_s0 }
   0x5   :  { %p2878_p2 = pnand %p2876_p1, %p2873_p0 }
   0x7   :  { %2881 = shalt.err (!%p2878_p2)
}
   0x8   :  { %s2932_s16 = smov [#allocation3]   ;;  %s2933_s19 = smov [#allocation7]  }
   0x9   :  { %17 = dma.hbm_to_smem %s6173_s0, 16, %s2932_s16, [#allocation6]  }
   0xa   :  { %s23_s20 = sshll.u32 %s2933_s19, 4  ;;  %s2882_s23 = scalar_lea.hbm %s6174_s1, 256  ;;  %s24_s20 = int_to_ptr.vmem [resolvable:$true] %s23_s20 }
   0xb   :  { %p2883_p3 = scmp.ne.s32.totalorder %s6174_s1, %s2882_s23  ;;  %p2886_p4 = scmp.lt.u32.totalorder %s2882_s23, %s6174_s1 }
   0xd   :  { %p2888_p5 = pnand %p2886_p4, %p2883_p3 }
   0xf   :  { %2891 = shalt.err (!%p2888_p5)
}
  0x10   :  { %s2892_s28 = scalar_lea.vmem %s24_s20, 256  ;;  %p2897_p7 = scmp.lt.s32.totalorder %s24_s20, %s24_s20 }
  0x11   :  { %p2893_p6 = scmp.ne.s32.totalorder %s24_s20, %s2892_s28  ;;  %p2898_p8 = scmp.lt.s32.totalorder %s2892_s28, %s2892_s28 }
  0x13   :  { %p2899_p9 = por %p2898_p8, %p2897_p7 }
  0x15   :  { %p2900_p10 = pnand %p2899_p9, %p2893_p6 }
  0x17   :  { %2903 = shalt.err (!%p2900_p10)
}
  0x18   :  { %s2934_s0 = smov 128   ;;  %s2935_s29 = smov 8  }
  0x19   :  { %29 = dma.hbm_to_vmem [thread:$0]  %s6174_s1, 256, %s24_s20, [#allocation4], %s2934_s0, %s2934_s0, %s2935_s29  }
  0x1a   :  { %2926 = dma.done.wait [#allocation6], 16  }
  0x1b   :  { %2927 = vsyncadd [#allocation6], 4294967280 }
  0x1c   :  { %2928 = dma.done.wait [#allocation4], 256  }
  0x1d   :  { %2929 = vsyncadd [#allocation4], 4294967040 }
  0x1e   :  { %36 = sfence }
  0x1f   :  { %v47_v0 = vld [vmem:[#allocation7] sm:$0xff]  ;;  %v48_v1 = vld [vmem:[#allocation7 + $0x8] sm:$0xff]  ;;  %v6179_v2 = vmov 0.0   ;;  %s2937_s1 = smov 33   ;;  %s2938_s4 = smov 34   ;;  %vm152_vm0 = vcmask 277504  }
  0x20   :  { %39 = vst [vmem:[#allocation2] sm:$0xff] %v6179_v2  ;;  %40 = vst [vmem:[#allocation2 + $0x8] sm:$0xff] %v6179_v2  ;;  %v51_v3 = vcombine.high %v47_v0, %v47_v0  ;;  %v52_v4 = vcombine.high %v48_v1, %v48_v1  ;;  %v53_v5 = vrot.slane %v47_v0, 6  ;;  %v55_v6 = vrot.slane %v48_v1, 6  ;;  %2748 = vrot.lane.b32.xlu1 %v6179_v2, %s2937_s1  ;;  %s2597_s5 = sld [smem:[#allocation3 + $0x2]]  ;;  %s2598_s6 = sld [smem:[#allocation3 + $0x1b]] }
  0x21   :  { %41 = vst [vmem:[#allocation2 + $0x10] sm:$0xff] %v6179_v2  ;;  %44 = vst [vmem:[#allocation2 + $0x28] sm:$0xff] %v6179_v2  ;;  %2743 = vrot.lane.b32.xlu0 %v6179_v2, %s2938_s4  ;;  %s2939_s7 = smov 32   ;;  %s2599_s8 = sld [smem:[#allocation3 + $0x34]]  ;;  %vm211_vm1 = vcmask 269312   ;;  %vm300_vm6 = vcmask 261120  }
  0x22   :  { %45 = vst [vmem:[#allocation2 + $0x30] sm:$0xff] %v6179_v2  ;;  %v54_v7 = vrot.slane %v51_v3, 6  ;;  %v56_v8 = vrot.slane %v52_v4, 6  ;;  %61 = vst [vmem:[#allocation2 + $0x8] sm:$0x3c] %v53_v5  ;;  %s2600_s9 = sld [smem:[#allocation3 + $0x4d]] }
  0x23   :  { %63 = vst [vmem:[#allocation2 + $0x28] sm:$0x3c] %v55_v6  ;;  %s2601_s10 = sld [smem:[#allocation3 + $0x66]]  ;;  %s2940_s11 = smov 31   ;;  %vm481_vm7 = vcmask 252928   ;;  %vm560_vm10 = vcmask 244736  }
  0x24   :  { %62 = vst [vmem:[#allocation2 + $0x10] sm:$0x3c] %v54_v7  ;;  %64 = vst [vmem:[#allocation2 + $0x30] sm:$0x3c] %v56_v8  ;;  %s2941_s12 = smov 30   ;;  %s2942_s13 = smov 18  }
  0x25   :  { %s2622_s14 = sld [smem:[#allocation3 + $0x7]]  ;;  %s2943_s15 = smov 17   ;;  %vm635_vm13 = vcmask 146432   ;;  %vm710_vm14 = vcmask 138240   ;;  %vm799_vm15 = vcmask 130048  }
  0x26   :  { %v275_v13 = vstv %s2597_s5  ;;  %v314_v19 = vstv %s2598_s6  ;;  %s2623_s16 = sld [smem:[#allocation3 + $0x20]]  ;;  %s2944_s17 = smov 16  }
  0x27   :  { %v276_v15 = vmul.f32 0.0, %v275_v13  ;;  %v315_v21 = vmul.f32 0.0, %v314_v19  ;;  %v352_v25 = vstv %s2599_s8  ;;  %s2624_s18 = sld [smem:[#allocation3 + $0x39]]  ;;  %s2625_s19 = sld [smem:[#allocation3 + $0x52]] }
  0x28   :  { %v353_v27 = vmul.f32 0.0, %v352_v25  ;;  %v390_v31 = vstv %s2600_s9  ;;  %s2626_s20 = sld [smem:[#allocation3 + $0x6b]]  ;;  %s3187_s21 = sld [smem:[#allocation3]] }
  0x29   :  { %v3013_v10 = vld [vmem:[#allocation2 + $0x8] sm:$0xff]  ;;  %v391_v33 = vmul.f32 0.0, %v390_v31  ;;  %v428_v37 = vstv %s2601_s10  ;;  %s3192_s22 = sld [smem:[#allocation3 + $0x1]]  ;;  %s3198_s24 = sld [smem:[#allocation3 + $0x1a]] }
  0x2a   :  { %v3011_v9 = vld [vmem:[#allocation2 + $0x28] sm:$0xff]  ;;  %142 = vrot.lane.b32.xlu0 %v3013_v10, %s2938_s4  ;;  %v277_v14 = vmul.f32 %v275_v13, %v3013_v10  ;;  %v316_v20 = vmul.f32 %v314_v19, %v3013_v10  ;;  %v354_v26 = vmul.f32 %v352_v25, %v3013_v10  ;;  %v392_v32 = vmul.f32 %v390_v31, %v3013_v10  ;;  %s3194_s23 = sld [smem:[#allocation3 + $0x19]]  ;;  %s3200_s25 = sld [smem:[#allocation3 + $0x32]] }
  0x2b   :  { %148 = vrot.lane.b32.xlu1 %v3011_v9, %s2938_s4  ;;  %v3017_v11 = vld [vmem:[#allocation2 + $0x10] sm:$0xff]  ;;  %v280_v18 = vmul.f32 %v275_v13, %v3011_v9  ;;  %v319_v24 = vmul.f32 %v314_v19, %v3011_v9  ;;  %v357_v30 = vmul.f32 %v352_v25, %v3011_v9  ;;  %v395_v36 = vmul.f32 %v390_v31, %v3011_v9  ;;  %s3206_s26 = sld [smem:[#allocation3 + $0x33]]  ;;  %s3214_s28 = sld [smem:[#allocation3 + $0x4c]] }
  0x2c   :  { %v3021_v12 = vld [vmem:[#allocation2 + $0x30] sm:$0xff]  ;;  %v278_v16 = vmul.f32 %v275_v13, %v3017_v11  ;;  %v317_v22 = vmul.f32 %v314_v19, %v3017_v11  ;;  %v355_v28 = vmul.f32 %v352_v25, %v3017_v11  ;;  %v393_v34 = vmul.f32 %v390_v31, %v3017_v11  ;;  %s3208_s27 = sld [smem:[#allocation3 + $0x4b]]  ;;  %s3217_s30 = sld [smem:[#allocation3 + $0x64]] }
  0x2d   :  { %v281_v17 = vmul.f32 %v275_v13, %v3021_v12  ;;  %v320_v23 = vmul.f32 %v314_v19, %v3021_v12  ;;  %v358_v29 = vmul.f32 %v352_v25, %v3021_v12  ;;  %v396_v35 = vmul.f32 %v390_v31, %v3021_v12  ;;  %s3219_s3 = sld [smem:[#allocation3 + $0x65]]  ;;  %s3234_s6 = sld [smem:[#allocation3 + $0x4e]] }
  0x2e   :  { %201 = vrot.lane.b32.xlu0 %v3013_v10, %s2937_s1  ;;  %v430_v38 = vmul.f32 %v428_v37, %v3013_v10  ;;  %v429_v39 = vmul.f32 0.0, %v428_v37  ;;  %v431_v40 = vmul.f32 %v428_v37, %v3017_v11  ;;  %v434_v41 = vmul.f32 %v428_v37, %v3021_v12  ;;  %s3232_s5 = sld [smem:[#allocation3 + $0x35]]  ;;  %s3248_s8 = sld [smem:[#allocation3 + $0x4]] }
  0x2f   :  { %144 = vrot.lane.b32.xlu1 %v3017_v11, %s2938_s4  ;;  %v433_v42 = vmul.f32 %v428_v37, %v3011_v9  ;;  %v774_v45 = vstv %s2622_s14  ;;  %v813_v55 = vstv %s2623_s16  ;;  %v851_v4 = vstv %s2624_s18  ;;  %s3250_s9 = sld [smem:[#allocation3 + $0x1d]]  ;;  %s3252_s10 = sld [smem:[#allocation3 + $0x36]] }
  0x30   :  { %v776_v46 = vmul.f32 %v774_v45, %v3013_v10  ;;  %v775_v47 = vmul.f32 0.0, %v774_v45  ;;  %v777_v50 = vmul.f32 %v774_v45, %v3017_v11  ;;  %v780_v53 = vmul.f32 %v774_v45, %v3021_v12  ;;  %s3283_s14 = sld [smem:[#allocation3 + $0x1e]]  ;;  %s3297_s16 = sld [smem:[#allocation3 + $0x50]] }
  0x31   :  { %v779_v54 = vmul.f32 %v774_v45, %v3011_v9  ;;  %v815_v58 = vmul.f32 %v813_v55, %v3013_v10  ;;  %v814_v59 = vmul.f32 0.0, %v813_v55  ;;  %v816_v62 = vmul.f32 %v813_v55, %v3017_v11  ;;  %s3299_s18 = sld [smem:[#allocation3 + $0x69]] }
  0x32   :  { %150 = vrot.lane.b32.xlu0 %v3021_v12, %s2938_s4  ;;  %v819_v1 = vmul.f32 %v813_v55, %v3021_v12  ;;  %v818_v3 = vmul.f32 %v813_v55, %v3011_v9  ;;  %v853_v7 = vmul.f32 %v851_v4, %v3013_v10  ;;  %v852_v8 = vmul.f32 0.0, %v851_v4  ;;  %s3230_s4 = sld [smem:[#allocation3 + $0x1c]] }
  0x33   :  { %203 = vrot.lane.b32.xlu1 %v3017_v11, %s2937_s1  ;;  %v856_v19 = vmul.f32 %v851_v4, %v3011_v9 }
  0x36   :  { %207 = vrot.lane.b32.xlu0 %v3011_v9, %s2937_s1 }
  0x37   :  { %209 = vrot.lane.b32.xlu1 %v3021_v12, %s2937_s1  ;;  %s3221_s1 = sld [smem:[#allocation3 + $0x3]] }
  0x3a   :  { %288 = vrot.lane.b32.xlu0 %v276_v15, %s2939_s7 }
  0x3b   :  { %290 = vrot.lane.b32.xlu1 %v277_v14, %s2939_s7 }
  0x3e   :  { %292 = vrot.lane.b32.xlu0 %v278_v16, %s2939_s7 }
  0x3f   :  { %294 = vrot.lane.b32.xlu1 %v276_v15, %s2939_s7  ;;  %v854_v15 = vmul.f32 %v851_v4, %v3017_v11 }
  0x42   :  { %296 = vrot.lane.b32.xlu0 %v280_v18, %s2939_s7  ;;  %v857_v18 = vmul.f32 %v851_v4, %v3021_v12 }
  0x43   :  { %298 = vrot.lane.b32.xlu1 %v281_v17, %s2939_s7 }
  0x46   :  { %327 = vrot.lane.b32.xlu0 %v315_v21, %s2939_s7 }
  0x47   :  { %329 = vrot.lane.b32.xlu1 %v316_v20, %s2939_s7  ;;  %v889_v20 = vstv %s2625_s19  ;;  %s3350_s19 = sld [smem:[#allocation3 + $0x6]] }
  0x48   :  { %v895_v31 = vmul.f32 %v889_v20, %v3021_v12 }
  0x4a   :  { %331 = vrot.lane.b32.xlu0 %v317_v22, %s2939_s7 }
  0x4b   :  { %333 = vrot.lane.b32.xlu1 %v315_v21, %s2939_s7 }
  0x4e   :  { %335 = vrot.lane.b32.xlu0 %v319_v24, %s2939_s7  ;;  %v890_v24 = vmul.f32 0.0, %v889_v20 }
  0x4f   :  { %337 = vrot.lane.b32.xlu1 %v320_v23, %s2939_s7  ;;  %v891_v23 = vmul.f32 %v889_v20, %v3013_v10 }
  0x52   :  { %365 = vrot.lane.b32.xlu0 %v353_v27, %s2939_s7 }
  0x53   :  { %367 = vrot.lane.b32.xlu1 %v354_v26, %s2939_s7 }
  0x56   :  { %369 = vrot.lane.b32.xlu0 %v355_v28, %s2939_s7  ;;  %v65_v28 = vlaneseq }
  0x57   :  { %371 = vrot.lane.b32.xlu1 %v353_v27, %s2939_s7  ;;  %v892_v27 = vmul.f32 %v889_v20, %v3017_v11 }
  0x5a   :  { %373 = vrot.lane.b32.xlu0 %v357_v30, %s2939_s7 }
  0x5b   :  { %375 = vrot.lane.b32.xlu1 %v358_v29, %s2939_s7 }
  0x5e   :  { %403 = vrot.lane.b32.xlu0 %v391_v33, %s2939_s7 }
  0x5f   :  { %405 = vrot.lane.b32.xlu1 %v392_v32, %s2939_s7  ;;  %v894_v32 = vmul.f32 %v889_v20, %v3011_v9  ;;  %v3293_v20 = vstv %s3208_s27  ;;  %s2947_s27 = smov 2  }
  0x62   :  { %407 = vrot.lane.b32.xlu0 %v393_v34, %s2939_s7  ;;  %v66_v34 = vand.u32 127, %v65_v28  ;;  %v3307_v28 = vstv %s3217_s30  ;;  %s3613_s30 = sld [smem:[#allocation3 + $0x5c]] }
  0x63   :  { %409 = vrot.lane.b32.xlu1 %v391_v33, %s2939_s7  ;;  %v927_v33 = vstv %s2626_s20  ;;  %s2946_s20 = smov 14  }
  0x64   :  { %v67_v37 = vadd.s32 128, %v66_v34 }
  0x66   :  { %411 = vrot.lane.b32.xlu0 %v395_v36, %s2939_s7  ;;  %v3210_v45 = vand.u32 15, %v67_v37  ;;  %v3321_v37 = vstv %s3221_s1  ;;  %s3667_s1 = sld [smem:[#allocation3 + $0x8]] }
  0x67   :  { %413 = vrot.lane.b32.xlu1 %v396_v35, %s2939_s7  ;;  %6313 = vst [vmem:[#allocation27_spill] sm:$0xff] %v3321_v37  ;;  %v3356_v37 = vstv %s3248_s8  ;;  %s3743_s8 = sld [smem:[#allocation3 + $0x9]] }
  0x68   :  { %6321 = vst [vmem:[#allocation35_spill] sm:$0xff] %v3356_v37 }
  0x6a   :  { %441 = vrot.lane.b32.xlu0 %v429_v39, %s2939_s7 }
  0x6b   :  { %443 = vrot.lane.b32.xlu1 %v430_v38, %s2939_s7  ;;  %v929_v38 = vmul.f32 %v927_v33, %v3013_v10 }
  0x6e   :  { %445 = vrot.lane.b32.xlu0 %v431_v40, %s2939_s7  ;;  %v3196_v40 = vand.u32 15, %v66_v34 }
  0x6f   :  { %447 = vrot.lane.b32.xlu1 %v429_v39, %s2939_s7  ;;  %v928_v39 = vmul.f32 0.0, %v927_v33 }
  0x70   :  { %v3242_v55 = vadd.s32 4294967295, %v3196_v40  ;;  %v3318_v34 = vadd.s32 1, %v3196_v40 }
  0x72   :  { %449 = vrot.lane.b32.xlu0 %v433_v42, %s2939_s7  ;;  %6306 = vst [vmem:[#allocation20_spill] sm:$0xff] %v3242_v55  ;;  %vm102_vm4 = vcmp.ge.s32.totalorder %v3242_v55, 0  ;;  %6312 = vst [vmem:[#allocation26_spill] sm:$0xff] %v3318_v34 }
  0x73   :  { %451 = vrot.lane.b32.xlu1 %v434_v41, %s2939_s7  ;;  %s3236_s7 = sld [smem:[#allocation3 + $0x67]] }
  0x76   :  { %2753 = vrot.lane.b32.xlu0 %v6179_v2, %s2940_s11 }
  0x77   :  { %471 = vrot.lane.b32.xlu1 %v3013_v10, %s2940_s11 }
  0x7a   :  { %473 = vrot.lane.b32.xlu0 %v3017_v11, %s2940_s11 }
  0x7b   :  { %477 = vrot.lane.b32.xlu1 %v3011_v9, %s2940_s11 }
  0x7e   :  { %479 = vrot.lane.b32.xlu0 %v3021_v12, %s2940_s11  ;;  %s3254_s11 = sld [smem:[#allocation3 + $0x4f]] }
  0x7f   :  { %2758 = vrot.lane.b32.xlu1 %v6179_v2, %s2941_s12 }
  0x82   :  { %550 = vrot.lane.b32.xlu0 %v3013_v10, %s2941_s12 }
  0x83   :  { %552 = vrot.lane.b32.xlu1 %v3017_v11, %s2941_s12 }
  0x84   :  { %v3375_v37 = vstv %s3254_s11  ;;  %s3764_s11 = sld [smem:[#allocation3 + $0x3b]] }
  0x85   :  { %6326 = vst [vmem:[#allocation40_spill] sm:$0xff] %v3375_v37 }
  0x86   :  { %556 = vrot.lane.b32.xlu0 %v3011_v9, %s2941_s12 }
  0x87   :  { %558 = vrot.lane.b32.xlu1 %v3021_v12, %s2941_s12  ;;  %s3267_s12 = sld [smem:[#allocation3 + $0x68]] }
  0x8a   :  { %2763 = vrot.lane.b32.xlu0 %v6179_v2, %s2942_s13 }
  0x8b   :  { %625 = vrot.lane.b32.xlu1 %v3013_v10, %s2942_s13 }
  0x8e   :  { %627 = vrot.lane.b32.xlu0 %v3017_v11, %s2942_s13 }
  0x8f   :  { %631 = vrot.lane.b32.xlu1 %v3011_v9, %s2942_s13 }
  0x92   :  { %633 = vrot.lane.b32.xlu0 %v3021_v12, %s2942_s13  ;;  %v3095_v43 = vpop.permute.xlu1 %2748  ;;  %s3269_s13 = sld [smem:[#allocation3 + $0x5]] }
  0x93   :  { %2768 = vrot.lane.b32.xlu1 %v6179_v2, %s2943_s15  ;;  %v3097_v44 = vpop.permute.xlu0 %2743 }
  0x96   :  { %700 = vrot.lane.b32.xlu0 %v3013_v10, %s2943_s15 }
  0x97   :  { %702 = vrot.lane.b32.xlu1 %v3017_v11, %s2943_s15 }
  0x9a   :  { %706 = vrot.lane.b32.xlu0 %v3011_v9, %s2943_s15 }
  0x9b   :  { %708 = vrot.lane.b32.xlu1 %v3021_v12, %s2943_s15  ;;  %s3285_s15 = sld [smem:[#allocation3 + $0x37]] }
  0x9c   :  { %v3104_v49 = vpop.permute.xlu0 %142 }
  0x9d   :  { %v3102_v48 = vpop.permute.xlu1 %148 }
  0x9e   :  { %787 = vrot.lane.b32.xlu0 %v775_v47, %s2944_s17 }
  0x9f   :  { %789 = vrot.lane.b32.xlu1 %v776_v46, %s2944_s17  ;;  %v930_v46 = vmul.f32 %v927_v33, %v3017_v11 }
  0xa0   :  { %v3111_v52 = vpop.permute.xlu0 %201 }
  0xa1   :  { %v3109_v51 = vpop.permute.xlu1 %144 }
  0xa2   :  { %791 = vrot.lane.b32.xlu0 %v777_v50, %s2944_s17 }
  0xa3   :  { %793 = vrot.lane.b32.xlu1 %v775_v47, %s2944_s17  ;;  %v3224_v47 = vadd.s32 4294967294, %v3196_v40 }
  0xa4   :  { %v3119_v57 = vpop.permute.xlu0 %150 }
  0xa5   :  { %v3117_v56 = vpop.permute.xlu1 %203  ;;  %6302 = vst [vmem:[#allocation16_spill] sm:$0xff] %v3224_v47  ;;  %vm94_vm2 = vcmp.ge.s32.totalorder %v3224_v47, 0 }
  0xa6   :  { %795 = vrot.lane.b32.xlu0 %v779_v54, %s2944_s17  ;;  %v3239_v54 = vadd.s32 4294967294, %v3210_v45 }
  0xa7   :  { %797 = vrot.lane.b32.xlu1 %v780_v53, %s2944_s17 }
  0xa8   :  { %v3126_v61 = vpop.permute.xlu0 %207  ;;  %6305 = vst [vmem:[#allocation19_spill] sm:$0xff] %v3239_v54  ;;  %vm95_vm3 = vcmp.ge.s32.totalorder %v3239_v54, 0 }
  0xa9   :  { %v3124_v60 = vpop.permute.xlu1 %209 }
  0xaa   :  { %826 = vrot.lane.b32.xlu0 %v814_v59, %s2944_s17 }
  0xab   :  { %828 = vrot.lane.b32.xlu1 %v815_v58, %s2944_s17  ;;  %v933_v58 = vmul.f32 %v927_v33, %v3021_v12 }
  0xac   :  { %v3133_v0 = vpop.permute.xlu0 %288 }
  0xad   :  { %v3131_v63 = vpop.permute.xlu1 %290 }
  0xae   :  { %830 = vrot.lane.b32.xlu0 %v816_v62, %s2944_s17  ;;  %v3258_v62 = vadd.s32 4294967295, %v3210_v45 }
  0xaf   :  { %832 = vrot.lane.b32.xlu1 %v814_v59, %s2944_s17  ;;  %v932_v59 = vmul.f32 %v927_v33, %v3011_v9  ;;  %v3315_v33 = vstv %s3219_s3  ;;  %s2948_s3 = smov 1  }
  0xb0   :  { %v3141_v6 = vpop.permute.xlu0 %292  ;;  %6307 = vst [vmem:[#allocation21_spill] sm:$0xff] %v3258_v62  ;;  %vm103_vm5 = vcmp.ge.s32.totalorder %v3258_v62, 0 }
  0xb1   :  { %v3139_v5 = vpop.permute.xlu1 %294 }
  0xb2   :  { %834 = vrot.lane.b32.xlu0 %v818_v3, %s2944_s17 }
  0xb3   :  { %836 = vrot.lane.b32.xlu1 %v819_v1, %s2944_s17  ;;  %v3261_v1 = vstv %s3187_s21  ;;  %s3449_s21 = sld [smem:[#allocation3 + $0x1f]] }
  0xb4   :  { %v3148_v14 = vpop.permute.xlu0 %296 }
  0xb5   :  { %v3146_v13 = vpop.permute.xlu1 %298 }
  0xb6   :  { %864 = vrot.lane.b32.xlu0 %v852_v8, %s2944_s17 }
  0xb7   :  { %866 = vrot.lane.b32.xlu1 %v853_v7, %s2944_s17  ;;  %v3272_v7 = vstv %s3192_s22  ;;  %s3493_s22 = sld [smem:[#allocation3 + $0x38]] }
  0xb8   :  { %v3155_v17 = vpop.permute.xlu0 %327 }
  0xb9   :  { %v3153_v16 = vpop.permute.xlu1 %329 }
  0xba   :  { %868 = vrot.lane.b32.xlu0 %v854_v15, %s2944_s17  ;;  %v3278_v15 = vstv %s3198_s24  ;;  %s3529_s24 = sld [smem:[#allocation3 + $0x51]] }
  0xbb   :  { %870 = vrot.lane.b32.xlu1 %v852_v8, %s2944_s17  ;;  %v3275_v8 = vstv %s3194_s23  ;;  %s3516_s23 = sld [smem:[#allocation3 + $0x11]] }
  0xbc   :  { %v3163_v22 = vpop.permute.xlu0 %331 }
  0xbd   :  { %v3161_v21 = vpop.permute.xlu1 %333 }
  0xbe   :  { %872 = vrot.lane.b32.xlu0 %v856_v19, %s2944_s17  ;;  %v3290_v19 = vstv %s3206_s26  ;;  %s3549_s26 = sld [smem:[#allocation3 + $0x2a]] }
  0xbf   :  { %874 = vrot.lane.b32.xlu1 %v857_v18, %s2944_s17  ;;  %v3281_v18 = vstv %s3200_s25  ;;  %s3537_s25 = sld [smem:[#allocation3 + $0x6a]] }
  0xc0   :  { %v3170_v26 = vpop.permute.xlu0 %335 }
  0xc1   :  { %v3168_v25 = vpop.permute.xlu1 %337 }
  0xc2   :  { %902 = vrot.lane.b32.xlu0 %v890_v24, %s2944_s17 }
  0xc3   :  { %904 = vrot.lane.b32.xlu1 %v891_v23, %s2944_s17  ;;  %v2746_v23 = vunpack.i.h.bf16 %v3097_v44 }
  0xc4   :  { %v3177_v30 = vpop.permute.xlu0 %365 }
  0xc5   :  { %v3175_v29 = vpop.permute.xlu1 %367 }
  0xc6   :  { %906 = vrot.lane.b32.xlu0 %v892_v27, %s2944_s17  ;;  %v3304_v27 = vstv %s3214_s28  ;;  %s3588_s28 = sld [smem:[#allocation3 + $0x43]] }
  0xc7   :  { %908 = vrot.lane.b32.xlu1 %v890_v24, %s2944_s17  ;;  %v2745_v24 = vunpack.i.l.bf16 %v3097_v44  ;;  %v3324_v44 = vstv %s3230_s4  ;;  %s3683_s4 = sld [smem:[#allocation3 + $0x21]] }
  0xc8   :  { %v3185_v36 = vpop.permute.xlu0 %369  ;;  %6314 = vst [vmem:[#allocation28_spill] sm:$0xff] %v3324_v44  ;;  %v3353_v44 = vadd.s32 2, %v3210_v45 }
  0xc9   :  { %v3183_v35 = vpop.permute.xlu1 %371  ;;  %6299 = vst [vmem:[#allocation13_spill] sm:$0xff] %v3185_v36 }
  0xca   :  { %6298 = vst [vmem:[#allocation12_spill] sm:$0xff] %v3183_v35  ;;  %910 = vrot.lane.b32.xlu0 %v894_v32, %s2944_s17  ;;  %6320 = vst [vmem:[#allocation34_spill] sm:$0xff] %v3353_v44  ;;  %v3378_v44 = vstv %s3267_s12  ;;  %s3778_s12 = sld [smem:[#allocation3 + $0x54]] }
  0xcb   :  { %912 = vrot.lane.b32.xlu1 %v895_v31, %s2944_s17  ;;  %6327 = vst [vmem:[#allocation41_spill] sm:$0xff] %v3378_v44 }
  0xcc   :  { %v3204_v42 = vpop.permute.xlu0 %373 }
  0xcd   :  { %v3202_v41 = vpop.permute.xlu1 %375  ;;  %6301 = vst [vmem:[#allocation15_spill] sm:$0xff] %v3204_v42 }
  0xce   :  { %6300 = vst [vmem:[#allocation14_spill] sm:$0xff] %v3202_v41  ;;  %940 = vrot.lane.b32.xlu0 %v928_v39, %s2944_s17 }
  0xcf   :  { %942 = vrot.lane.b32.xlu1 %v929_v38, %s2944_s17  ;;  %v155_v38 = vsel %vm152_vm0, %v2746_v23, %v3102_v48  ;;  %v3342_v23 = vstv %s3234_s6  ;;  %s3700_s6 = sld [smem:[#allocation3 + $0x53]] }
  0xd0   :  { %v3228_v53 = vpop.permute.xlu0 %403  ;;  %6317 = vst [vmem:[#allocation31_spill] sm:$0xff] %v3342_v23 }
  0xd1   :  { %v3226_v50 = vpop.permute.xlu1 %405  ;;  %6304 = vst [vmem:[#allocation18_spill] sm:$0xff] %v3228_v53 }
  0xd2   :  { %6303 = vst [vmem:[#allocation17_spill] sm:$0xff] %v3226_v50  ;;  %944 = vrot.lane.b32.xlu0 %v930_v46, %s2944_s17  ;;  %v3331_v46 = vstv %s3232_s5  ;;  %s3685_s5 = sld [smem:[#allocation3 + $0x3a]] }
  0xd3   :  { %946 = vrot.lane.b32.xlu1 %v928_v39, %s2944_s17  ;;  %v153_v39 = vsel %vm152_vm0, %v2745_v24, %v3104_v49  ;;  %6315 = vst [vmem:[#allocation29_spill] sm:$0xff] %v3331_v46  ;;  %v3345_v24 = vstv %s3236_s7  ;;  %v3348_v46 = vadd.s32 2, %v3196_v40  ;;  %s3702_s7 = sld [smem:[#allocation3 + $0x6c]] }
  0xd4   :  { %v3265_v4 = vpop.permute.xlu0 %407  ;;  %6318 = vst [vmem:[#allocation32_spill] sm:$0xff] %v3345_v24  ;;  %v163_v24 = vsel %vm94_vm2, %v155_v38, 0.0  ;;  %v161_v40 = vsel %vm94_vm2, %v153_v39, 0.0  ;;  %v154_v38 = vsel %vm152_vm0, %v3104_v49, %v3109_v51  ;;  %v3397_v39 = vstv %s3297_s16  ;;  %s2950_s16 = smov 126  }
  0xd5   :  { %v3263_v3 = vpop.permute.xlu1 %409  ;;  %6309 = vst [vmem:[#allocation23_spill] sm:$0xff] %v3265_v4  ;;  %6319 = vst [vmem:[#allocation33_spill] sm:$0xff] %v3348_v46  ;;  %v3409_v49 = vmul.f32 %v3261_v1, %v163_v24  ;;  %v213_v51 = vsel %vm211_vm1, %v3111_v52, %v3117_v56  ;;  %v173_v44 = vmul.f32 %v3275_v8, %v161_v40  ;;  %v3425_v37 = vsel %vm95_vm3, %v154_v38, 0.0 }
  0xd6   :  { %6308 = vst [vmem:[#allocation22_spill] sm:$0xff] %v3263_v3  ;;  %948 = vrot.lane.b32.xlu0 %v932_v59, %s2944_s17  ;;  %v2750_v59 = vunpack.i.l.bf16 %v3095_v43  ;;  %v3387_v3 = vstv %s3285_s15  ;;  %6331 = vst [vmem:[#allocation45_spill] sm:$0xff] %v3397_v39  ;;  %v3428_v47 = vmul.f32 %v3281_v18, %v163_v24  ;;  %v3432_v56 = vmul.f32 %v3293_v20, %v163_v24  ;;  %s3920_s15 = sld [smem:[#allocation3 + $0xa]] }
  0xd7   :  { %950 = vrot.lane.b32.xlu1 %v933_v58, %s2944_s17  ;;  %v3334_v58 = vadd.s32 1, %v3210_v45  ;;  %s2945_s17 = smov 15   ;;  %6330 = vst [vmem:[#allocation44_spill] sm:$0xff] %v3387_v3  ;;  %v167_v3 = vmul.f32 %v3261_v1, %v161_v40  ;;  %v6335_v38 = vmov 0.0   ;;  %v168_v4 = vmul.f32 %v3261_v1, %v3425_v37 }
  0xd8   :  { %v3312_v32 = vpop.permute.xlu0 %411  ;;  %v212_v23 = vsel %vm211_vm1, %v2750_v59, %v3111_v52  ;;  %v3400_v59 = vstv %s3299_s18  ;;  %v185_v52 = vmul.f32 %v3293_v20, %v161_v40  ;;  %v180_v53 = vmul.f32 %v3281_v18, %v3425_v37  ;;  %s2951_s18 = smov 114  }
  0xd9   :  { %v3310_v31 = vpop.permute.xlu1 %413  ;;  %6311 = vst [vmem:[#allocation25_spill] sm:$0xff] %v3312_v32  ;;  %6316 = vst [vmem:[#allocation30_spill] sm:$0xff] %v3334_v58  ;;  %v186_v50 = vmul.f32 %v3293_v20, %v3425_v37 }
  0xda   :  { %6310 = vst [vmem:[#allocation24_spill] sm:$0xff] %v3310_v31  ;;  %2773 = vrot.lane.b32.xlu0 %v6179_v2, %s2945_s17  ;;  %v3359_v31 = vstv %s3250_s9  ;;  %v3362_v2 = vstv %s3252_s10  ;;  %6332 = vst [vmem:[#allocation46_spill] sm:$0xff] %v3400_v59  ;;  %v3416_v59 = vmul.f32 %v3275_v8, %v163_v24  ;;  %s3745_s9 = sld [smem:[#allocation3 + $0x75]]  ;;  %s3762_s10 = sld [smem:[#allocation3 + $0x22]] }
  0xdb   :  { %966 = vrot.lane.b32.xlu1 %v3013_v10, %s2945_s17  ;;  %6322 = vst [vmem:[#allocation36_spill] sm:$0xff] %v3359_v31  ;;  %6323 = vst [vmem:[#allocation37_spill] sm:$0xff] %v3362_v2  ;;  %v3381_v31 = vstv %s3269_s13  ;;  %v3384_v2 = vstv %s3283_s14  ;;  %s3780_s13 = sld [smem:[#allocation3 + $0x6d]]  ;;  %s2949_s14 = smov 127  }
  0xdc   :  { %v3372_v45 = vpop.permute.xlu0 %441  ;;  %6328 = vst [vmem:[#allocation42_spill] sm:$0xff] %v3381_v31  ;;  %6329 = vst [vmem:[#allocation43_spill] sm:$0xff] %v3384_v2  ;;  %v2751_v31 = vunpack.i.h.bf16 %v3095_v43  ;;  %v3405_v2 = vsel %vm102_vm4, %v212_v23, 0.0  ;;  %v179_v43 = vmul.f32 %v3281_v18, %v161_v40 }
  0xdd   :  { %v3370_v46 = vpop.permute.xlu1 %443  ;;  %6325 = vst [vmem:[#allocation39_spill] sm:$0xff] %v3372_v45  ;;  %v156_v45 = vsel %vm152_vm0, %v3102_v48, %v3119_v57  ;;  %v221_v48 = vsel %vm103_vm5, %v213_v51, 0.0  ;;  %v236_v32 = vmul.f32 %v3278_v15, %v3405_v2  ;;  %v256_v58 = vmul.f32 %v3304_v27, %v3405_v2 }
  0xde   :  { %6324 = vst [vmem:[#allocation38_spill] sm:$0xff] %v3370_v46  ;;  %968 = vrot.lane.b32.xlu0 %v3017_v11, %s2945_s17  ;;  %v3447_v46 = vstv %s3350_s19  ;;  %v214_v57 = vsel %vm211_vm1, %v2751_v31, %v3126_v61  ;;  %v3469_v31 = vmul.f32 %v3307_v28, %v163_v24  ;;  %v257_v62 = vmul.f32 %v3304_v27, %v221_v48  ;;  %s2953_s19 = smov 112  }
  0xdf   :  { %972 = vrot.lane.b32.xlu1 %v3011_v9, %s2945_s17  ;;  %6336 = vst [vmem:[#allocation49_spill] sm:$0xff] %v3447_v46  ;;  %v246_v46 = vmul.f32 %v3290_v19, %v3405_v2  ;;  %v3495_v41 = vadd.f32 %v236_v32, %v173_v44  ;;  %v3505_v42 = vadd.f32 %v256_v58, %v185_v52  ;;  %vm976_vm0 = vcmask 121856  }
  0xe0   :  { %v3421_v23 = vpop.permute.xlu0 %445 }
  0xe1   :  { %v3419_v39 = vpop.permute.xlu1 %447  ;;  %6334 = vst [vmem:[#allocation48_spill] sm:$0xff] %v3421_v23  ;;  %v3440_v23 = vmul.f32 %v3307_v28, %v161_v40  ;;  %v215_v40 = vsel %vm211_vm1, %v3126_v61, %v3124_v60  ;;  %v3475_v60 = vsel %vm95_vm3, %v156_v45, 0.0  ;;  %v174_v61 = vmul.f32 %v3275_v8, %v3425_v37 }
  0xe2   :  { %6333 = vst [vmem:[#allocation47_spill] sm:$0xff] %v3419_v39  ;;  %v226_v39 = vmul.f32 %v3272_v7, %v3405_v2  ;;  %974 = vrot.lane.b32.xlu0 %v3021_v12, %s2945_s17  ;;  %v223_v24 = vsel %vm103_vm5, %v215_v40, 0.0  ;;  %v237_v45 = vmul.f32 %v3278_v15, %v221_v48  ;;  %v170_v40 = vmul.f32 %v3261_v1, %v3475_v60  ;;  %s2952_s17 = smov 113  }
  0xe3   :  { %2778 = vrot.lane.b32.xlu1 %v6335_v38, %s2946_s20  ;;  %v176_v55 = vmul.f32 %v3275_v8, %v3475_v60  ;;  %v3503_v35 = vadd.f32 %v246_v46, %v179_v43  ;;  %v229_v44 = vmul.f32 %v3272_v7, %v223_v24  ;;  %v182_v1 = vmul.f32 %v3281_v18, %v3475_v60 }
  0xe4   :  { %v3471_v34 = vpop.permute.xlu0 %449  ;;  %v230_v54 = vadd.f32 %v226_v39, %v167_v3  ;;  %v3518_v46 = vadd.f32 %v237_v45, %v174_v61  ;;  %v188_v58 = vmul.f32 %v3293_v20, %v3475_v60  ;;  %v239_v18 = vmul.f32 %v3278_v15, %v223_v24 }
  0xe5   :  { %v3466_v51 = vpop.permute.xlu1 %451  ;;  %6338 = vst [vmem:[#allocation51_spill] sm:$0xff] %v3471_v34  ;;  %v227_v34 = vmul.f32 %v3272_v7, %v221_v48  ;;  %v301_v20 = vsel %vm300_vm6, %v3133_v0, %v3131_v63  ;;  %v249_v52 = vmul.f32 %v3290_v19, %v223_v24  ;;  %v259_v45 = vmul.f32 %v3304_v27, %v223_v24 }
  0xe6   :  { %6337 = vst [vmem:[#allocation50_spill] sm:$0xff] %v3466_v51  ;;  %v222_v51 = vsel %vm102_vm4, %v214_v57, 0.0  ;;  %1041 = vrot.lane.b32.xlu0 %v3013_v10, %s2946_s20  ;;  %v247_v57 = vmul.f32 %v3290_v19, %v221_v48  ;;  %v266_v0 = vmul.f32 %v3315_v33, %v3405_v2  ;;  %v243_v2 = vadd.f32 %v239_v18, %v176_v55 }
  0xe7   :  { %1043 = vrot.lane.b32.xlu1 %v3017_v11, %s2946_s20  ;;  %v228_v32 = vmul.f32 %v3272_v7, %v222_v51  ;;  %v238_v39 = vmul.f32 %v3278_v15, %v222_v51  ;;  %v231_v8 = vadd.f32 %v227_v34, %v168_v4  ;;  %v3527_v7 = vstv %s3449_s21  ;;  %s4285_s21 = sld [smem:[#allocation3 + $0x3c]] }
  0xe8   :  { %v3509_v3 = vpop.permute.xlu0 %2753  ;;  %6339 = vst [vmem:[#allocation52_spill] sm:$0xff] %v3527_v7  ;;  %v3532_v43 = vadd.f32 %v247_v57, %v180_v53  ;;  %v248_v4 = vmul.f32 %v3290_v19, %v222_v51  ;;  %v3535_v34 = vadd.f32 %v257_v62, %v186_v50  ;;  %v258_v61 = vmul.f32 %v3304_v27, %v222_v51 }
  0xe9   :  { %v3507_v36 = vpop.permute.xlu1 %471  ;;  %v232_v50 = vadd.f32 %v228_v32, %v3409_v49  ;;  %v233_v62 = vadd.f32 %v229_v44, %v170_v40  ;;  %v3553_v57 = vadd.f32 %v238_v39, %v3416_v59  ;;  %v302_v19 = vsel %vm300_vm6, %v3131_v63, %v3141_v6 }
  0xea   :  { %1047 = vrot.lane.b32.xlu0 %v3011_v9, %s2946_s20  ;;  %v267_v27 = vmul.f32 %v3315_v33, %v221_v48  ;;  %v268_v7 = vmul.f32 %v3315_v33, %v222_v51  ;;  %v3567_v59 = vstv %s3493_s22  ;;  %v3569_v49 = vadd.f32 %v301_v20, %v230_v54  ;;  %s4287_s22 = sld [smem:[#allocation3 + $0x55]] }
  0xeb   :  { %1049 = vrot.lane.b32.xlu1 %v3021_v12, %s2946_s20  ;;  %v3572_v40 = vadd.f32 %v248_v4, %v3428_v47  ;;  %v269_v63 = vmul.f32 %v3315_v33, %v223_v24  ;;  %v3575_v6 = vadd.f32 %v249_v52, %v182_v1  ;;  %v3578_v48 = vadd.f32 %v258_v61, %v3432_v56  ;;  %s4272_s20 = sld [smem:[#allocation3 + $0x23]] }
  0xec   :  { %v3547_v53 = vpop.permute.xlu0 %473  ;;  %v3580_v51 = vadd.f32 %v259_v45, %v188_v58  ;;  %v192_v32 = vmul.f32 %v3307_v28, %v3425_v37  ;;  %v3590_v47 = vadd.f32 %v302_v19, %v231_v8  ;;  %v3593_v55 = vadd.f32 %v266_v0, %v3440_v23 }
  0xed   :  { %v3545_v15 = vpop.permute.xlu1 %477  ;;  %v194_v33 = vmul.f32 %v3307_v28, %v3475_v60  ;;  %v1627_v56 = vstv %s3516_s23  ;;  %v303_v37 = vsel %vm300_vm6, %v3139_v5, %v3148_v14  ;;  %v3604_v39 = vadd.f32 %v268_v7, %v3469_v31  ;;  %v3623_v60 = vld [vmem:[#allocation2 + $0x28] sm:$0xff]  ;;  %v3632_v7 = vld [vmem:[#allocation2 + $0x30] sm:$0xff]  ;;  %s4297_s23 = sld [smem:[#allocation3 + $0x6e]] }
  0xee   :  { %2783 = vrot.lane.b32.xlu0 %v6335_v38, %s2947_s27  ;;  %v3601_v24 = vadd.f32 %v267_v27, %v192_v32  ;;  %v3611_v23 = vstv %s3529_s24  ;;  %v304_v5 = vsel %vm300_vm6, %v3148_v14, %v3146_v13  ;;  %v339_v28 = vsel %vm300_vm6, %v3155_v17, %v3153_v16  ;;  %6340 = vst [vmem:[#allocation53_spill] sm:$0xff] %v3623_v60  ;;  %s4299_s24 = sld [smem:[#allocation3 + $0xb]] }
  0xef   :  { %1116 = vrot.lane.b32.xlu1 %v3013_v10, %s2947_s27  ;;  %v3621_v31 = vadd.f32 %v269_v63, %v194_v33  ;;  %v3626_v1 = vstv %s3537_s25  ;;  %6342 = vst [vmem:[#allocation55_spill] sm:$0xff] %v3632_v7  ;;  %v3635_v18 = vmul.f32 %v1627_v56, %v3017_v11  ;;  %v3638_v13 = vmul.f32 %v1627_v56, %v3013_v10  ;;  %s4309_s25 = sld [smem:[#allocation3 + $0x24]] }
  0xf0   :  { %v3586_v54 = vpop.permute.xlu0 %479  ;;  %6341 = vst [vmem:[#allocation54_spill] sm:$0xff] %v3626_v1  ;;  %v3641_v14 = vmul.f32 %v1627_v56, %v3623_v60  ;;  %v1666_v17 = vstv %s3549_s26  ;;  %v3644_v4 = vadd.f32 %v303_v37, %v232_v50  ;;  %v340_v20 = vsel %vm300_vm6, %v3153_v16, %v3163_v22  ;;  %v6352_v37 = vld [vmem:[#allocation12_spill] sm:$0xff]  ;;  %s4311_s26 = sld [smem:[#allocation3 + $0x3d]] }
  0xf1   :  { %v3584_v44 = vpop.permute.xlu1 %2758  ;;  %v3649_v52 = vmul.f32 0.0, %v1627_v56  ;;  %v3652_v61 = vmul.f32 %v1627_v56, %v3632_v7  ;;  %v3654_v45 = vadd.f32 %v304_v5, %v233_v62  ;;  %v3657_v0 = vadd.f32 %v339_v28, %v3495_v41  ;;  %v6351_v56 = vld [vmem:[#allocation15_spill] sm:$0xff] }
  0xf2   :  { %1118 = vrot.lane.b32.xlu0 %v3017_v11, %s2947_s27  ;;  %6343 = vst [vmem:[#allocation56_spill] sm:$0xff] %v3641_v14  ;;  %v341_v19 = vsel %vm300_vm6, %v3161_v21, %v3170_v26  ;;  %v342_v50 = vsel %vm300_vm6, %v3170_v26, %v3168_v25  ;;  %v377_v16 = vsel %vm300_vm6, %v3177_v30, %v3175_v29  ;;  %v6349_v30 = vld [vmem:[#allocation13_spill] sm:$0xff]  ;;  %v3697_v63 = vmul.f32 0.0, %v1666_v17 }
  0xf3   :  { %1122 = vrot.lane.b32.xlu1 %v3011_v9, %s2947_s27  ;;  %6344 = vst [vmem:[#allocation57_spill] sm:$0xff] %v3649_v52  ;;  %6345 = vst [vmem:[#allocation58_spill] sm:$0xff] %v3652_v61  ;;  %v3675_v21 = vmul.f32 %v1666_v17, %v3017_v11  ;;  %v3678_v22 = vmul.f32 %v1666_v17, %v3013_v10  ;;  %v3681_v25 = vmul.f32 %v1666_v17, %v3623_v60  ;;  %vm1051_vm1 = vcmask 113664  }
  0xf4   :  { %v3630_v58 = vpop.permute.xlu0 %550  ;;  %v3688_v26 = vadd.f32 %v340_v20, %v3518_v46  ;;  %v378_v41 = vsel %vm300_vm6, %v3175_v29, %v6349_v30  ;;  %6350 = vst [vmem:[#allocation13_spill] sm:$0xff] %v3697_v63  ;;  %v1704_v32 = vstv %s3588_s28  ;;  %v3705_v33 = vadd.f32 %v341_v19, %v3553_v57  ;;  %v6354_v20 = vld [vmem:[#allocation14_spill] sm:$0xff]  ;;  %v6355_v63 = vld [vmem:[#allocation17_spill] sm:$0xff]  ;;  %s4324_s28 = sld [smem:[#allocation3 + $0x6f]] }
  0xf5   :  { %v3628_v8 = vpop.permute.xlu1 %552  ;;  %6346 = vst [vmem:[#allocation59_spill] sm:$0xff] %v3675_v21  ;;  %6347 = vst [vmem:[#allocation60_spill] sm:$0xff] %v3678_v22  ;;  %v3707_v46 = vadd.f32 %v342_v50, %v243_v2  ;;  %v379_v29 = vsel %vm300_vm6, %v6352_v37, %v6351_v56  ;;  %v3713_v5 = vmul.f32 %v1666_v17, %v3632_v7  ;;  %v6357_v2 = vld [vmem:[#allocation26_spill] sm:$0xff]  ;;  %v1742_v19 = vstv %s3613_s30  ;;  %v6383_v21 = vld [vmem:[#allocation51_spill] sm:$0xff]  ;;  %s4337_s30 = sld [smem:[#allocation3 + $0xd]] }
  0xf6   :  { %1124 = vrot.lane.b32.xlu0 %v3021_v12, %s2947_s27  ;;  %6348 = vst [vmem:[#allocation61_spill] sm:$0xff] %v3681_v25  ;;  %v3716_v28 = vadd.f32 %v377_v16, %v3503_v35  ;;  %v380_v30 = vsel %vm300_vm6, %v6351_v56, %v6354_v20  ;;  %v6356_v25 = vld [vmem:[#allocation18_spill] sm:$0xff]  ;;  %vm112_vm8 = vcmp.lt.s32.totalorder %v6357_v2, 16  ;;  %v3729_v17 = vadd.f32 %v378_v41, %v3532_v43  ;;  %v6362_v41 = vld [vmem:[#allocation23_spill] sm:$0xff]  ;;  %s4322_s27 = sld [smem:[#allocation3 + $0x56]] }
  0xf7   :  { %2788 = vrot.lane.b32.xlu1 %v6335_v38, %s2948_s3  ;;  %6353 = vst [vmem:[#allocation15_spill] sm:$0xff] %v3713_v5  ;;  %v415_v57 = vsel %vm300_vm6, %v6356_v25, %v6355_v63  ;;  %v6358_v50 = vld [vmem:[#allocation30_spill] sm:$0xff]  ;;  %v3735_v35 = vmul.f32 %v1704_v32, %v3017_v11  ;;  %v3738_v16 = vmul.f32 %v1704_v32, %v3013_v10 }
  0xf8   :  { %v3695_v27 = vpop.permute.xlu0 %556  ;;  %vm113_vm9 = vcmp.lt.s32.totalorder %v6358_v50, 16  ;;  %v3741_v25 = vmul.f32 %v1704_v32, %v3623_v60  ;;  %v3748_v43 = vadd.f32 %v379_v29, %v3572_v40  ;;  %v416_v56 = vsel %vm300_vm6, %v6355_v63, %v6362_v41 }
  0xf9   :  { %v3693_v62 = vpop.permute.xlu1 %558  ;;  %6359 = vst [vmem:[#allocation12_spill] sm:$0xff] %v3735_v35  ;;  %6360 = vst [vmem:[#allocation14_spill] sm:$0xff] %v3738_v16  ;;  %v3757_v16 = vmul.f32 0.0, %v1704_v32  ;;  %v3767_v40 = vadd.f32 %v380_v30, %v3575_v6  ;;  %v3770_v63 = vadd.f32 %v415_v57, %v3505_v42  ;;  %v3773_v29 = vmul.f32 %v1742_v19, %v3017_v11  ;;  %v6369_v30 = vld [vmem:[#allocation24_spill] sm:$0xff]  ;;  %v6373_v35 = vld [vmem:[#allocation39_spill] sm:$0xff] }
  0xfa   :  { %1191 = vrot.lane.b32.xlu0 %v3013_v10, %s2948_s3  ;;  %6361 = vst [vmem:[#allocation17_spill] sm:$0xff] %v3741_v25  ;;  %v3760_v25 = vmul.f32 %v1704_v32, %v3632_v7  ;;  %v3776_v41 = vmul.f32 %v1742_v19, %v3013_v10  ;;  %v6367_v32 = vld [vmem:[#allocation25_spill] sm:$0xff]  ;;  %v2755_v57 = vunpack.i.l.bf16 %v3509_v3  ;;  %v562_v14 = vsel %vm560_vm10, %v3630_v58, %v3628_v8 }
  0xfb   :  { %1193 = vrot.lane.b32.xlu1 %v3017_v11, %s2948_s3  ;;  %6363 = vst [vmem:[#allocation18_spill] sm:$0xff] %v3757_v16  ;;  %6365 = vst [vmem:[#allocation62_spill] sm:$0xff] %v3773_v29  ;;  %v418_v42 = vsel %vm300_vm6, %v6367_v32, %v6369_v30  ;;  %v3795_v29 = vadd.f32 %v416_v56, %v3535_v34  ;;  %v6372_v16 = vld [vmem:[#allocation38_spill] sm:$0xff]  ;;  %v3816_v34 = vstv %s3702_s7  ;;  %s4372_s7 = sld [smem:[#allocation3 + $0x27]] }
  0xfc   :  { %v3755_v20 = vpop.permute.xlu0 %2763  ;;  %6364 = vst [vmem:[#allocation23_spill] sm:$0xff] %v3760_v25  ;;  %6366 = vst [vmem:[#allocation63_spill] sm:$0xff] %v3776_v41  ;;  %v6368_v25 = vld [vmem:[#allocation22_spill] sm:$0xff]  ;;  %v3792_v41 = vstv %s3667_s1  ;;  %v453_v5 = vsel %vm300_vm6, %v6373_v35, %v6372_v16  ;;  %v3819_v56 = vmul.f32 %v1742_v19, %v3623_v60  ;;  %v3821_v35 = vmul.f32 0.0, %v1742_v19  ;;  %s4347_s1 = sld [smem:[#allocation3 + $0x3f]] }
  0xfd   :  { %v3753_v37 = vpop.permute.xlu1 %625  ;;  %v417_v6 = vsel %vm300_vm6, %v6368_v25, %v6367_v32  ;;  %6370 = vst [vmem:[#allocation25_spill] sm:$0xff] %v3792_v41  ;;  %6371 = vst [vmem:[#allocation22_spill] sm:$0xff] %v3795_v29  ;;  %v3803_v25 = vstv %s3683_s4  ;;  %v3806_v32 = vstv %s3685_s5  ;;  %v3813_v41 = vstv %s3700_s6  ;;  %s4349_s4 = sld [smem:[#allocation3 + $0x58]]  ;;  %s4360_s5 = sld [smem:[#allocation3 + $0x71]] }
  0xfe   :  { %1197 = vrot.lane.b32.xlu0 %v3011_v9, %s2948_s3  ;;  %6374 = vst [vmem:[#allocation24_spill] sm:$0xff] %v3803_v25  ;;  %6375 = vst [vmem:[#allocation38_spill] sm:$0xff] %v3806_v32  ;;  %v3824_v9 = vadd.f32 %v417_v6, %v3578_v48  ;;  %v3827_v32 = vadd.f32 %v418_v42, %v3580_v51  ;;  %v6381_v25 = vld [vmem:[#allocation48_spill] sm:$0xff]  ;;  %v482_v48 = vsel %vm481_vm7, %v2755_v57, %v3507_v36  ;;  %v6387_v6 = vld [vmem:[#allocation33_spill] sm:$0xff]  ;;  %s4362_s6 = sld [smem:[#allocation3 + $0xe]] }
  0xff   :  { %1199 = vrot.lane.b32.xlu1 %v3021_v12, %s2948_s3  ;;  %6376 = vst [vmem:[#allocation39_spill] sm:$0xff] %v3813_v41  ;;  %6377 = vst [vmem:[#allocation64_spill] sm:$0xff] %v3816_v34  ;;  %v454_v22 = vsel %vm300_vm6, %v6372_v16, %v6381_v25  ;;  %v2756_v41 = vunpack.i.h.bf16 %v3509_v3  ;;  %v3834_v34 = vadd.f32 %v453_v5, %v3593_v55  ;;  %v6386_v3 = vld [vmem:[#allocation50_spill] sm:$0xff]  ;;  %vm120_vm11 = vcmp.lt.s32.totalorder %v6387_v6, 16  ;;  %s4339_s3 = sld [smem:[#allocation3 + $0x26]] }
 0x100   :  { %v3810_v12 = vpop.permute.xlu0 %627  ;;  %6378 = vst [vmem:[#allocation65_spill] sm:$0xff] %v3819_v56  ;;  %6379 = vst [vmem:[#allocation66_spill] sm:$0xff] %v3821_v35  ;;  %v6384_v56 = vld [vmem:[#allocation47_spill] sm:$0xff]  ;;  %v3844_v51 = vmul.f32 %v1742_v19, %v3632_v7  ;;  %v456_v55 = vsel %vm300_vm6, %v6383_v21, %v6386_v3  ;;  %v483_v16 = vsel %vm481_vm7, %v3507_v36, %v3547_v53  ;;  %v6388_v42 = vld [vmem:[#allocation34_spill] sm:$0xff]  ;;  %v3870_v25 = vstv %s3762_s10  ;;  %s4388_s10 = sld [smem:[#allocation3 + $0xc]] }
 0x101   :  { %v3808_v30 = vpop.permute.xlu1 %631  ;;  %6380 = vst [vmem:[#allocation67_spill] sm:$0xff] %v3824_v9  ;;  %6382 = vst [vmem:[#allocation48_spill] sm:$0xff] %v3834_v34  ;;  %v455_v35 = vsel %vm300_vm6, %v6384_v56, %v6383_v21  ;;  %v484_v5 = vsel %vm481_vm7, %v2756_v41, %v3545_v15  ;;  %vm121_vm12 = vcmp.lt.s32.totalorder %v6388_v42, 16  ;;  %v3860_v19 = vadd.f32 %v454_v22, %v3601_v24 }
 0x102   :  { %6385 = vst [vmem:[#allocation51_spill] sm:$0xff] %v3844_v51  ;;  %1326 = vrot.lane.b32.xlu0 %v3013_v10, %s2949_s14  ;;  %v3867_v41 = vstv %s3743_s8  ;;  %6391 = vst [vmem:[#allocation68_spill] sm:$0xff] %v3870_v25  ;;  %v3873_v36 = vstv %s3764_s11  ;;  %v3876_v53 = vadd.f32 %v455_v35, %v3604_v39  ;;  %v3880_v10 = vsel %vm112_vm8, %v482_v48, 0.0  ;;  %v3897_v39 = vld [vmem:[#allocation2 + $0x10] sm:$0xff]  ;;  %s4374_s8 = sld [smem:[#allocation3 + $0x61]] }
 0x103   :  { %1328 = vrot.lane.b32.xlu1 %v3017_v11, %s2949_s14  ;;  %v1780_v11 = vstv %s3745_s9  ;;  %6389 = vst [vmem:[#allocation47_spill] sm:$0xff] %v3860_v19  ;;  %6390 = vst [vmem:[#allocation50_spill] sm:$0xff] %v3867_v41  ;;  %v3883_v56 = vstv %s3778_s12  ;;  %v3886_v24 = vstv %s3780_s13  ;;  %v3889_v22 = vadd.f32 %v456_v55, %v3621_v31  ;;  %v3907_v31 = vld [vmem:[#allocation2 + $0x8] sm:$0xff]  ;;  %v6405_v41 = vld [vmem:[#allocation28_spill] sm:$0xff]  ;;  %s4386_s9 = sld [smem:[#allocation3 + $0x40]]  ;;  %s4397_s11 = sld [smem:[#allocation3 + $0x59]] }
 0x104   :  { %v3864_v57 = vpop.permute.xlu0 %633  ;;  %6392 = vst [vmem:[#allocation69_spill] sm:$0xff] %v3873_v36  ;;  %6393 = vst [vmem:[#allocation70_spill] sm:$0xff] %v3876_v53  ;;  %v492_v3 = vsel %vm112_vm8, %v484_v5, 0.0  ;;  %v491_v36 = vsel %vm113_vm9, %v483_v16, 0.0  ;;  %v3900_v35 = vmul.f32 %v3897_v39, %v1780_v11  ;;  %v485_v48 = vsel %vm481_vm7, %v3545_v15, %v3586_v54  ;;  %v3915_v16 = vld [vmem:[#allocation2] sm:$0xff]  ;;  %v6404_v54 = vld [vmem:[#allocation27_spill] sm:$0xff] }
 0x105   :  { %v3862_v21 = vpop.permute.xlu1 %2768  ;;  %6394 = vst [vmem:[#allocation71_spill] sm:$0xff] %v3880_v10  ;;  %6395 = vst [vmem:[#allocation72_spill] sm:$0xff] %v3883_v56  ;;  %v3910_v55 = vmul.f32 %v3907_v31, %v1780_v11  ;;  %v3913_v5 = vmul.f32 %v1780_v11, %v3623_v60  ;;  %v496_v25 = vmul.f32 %v6404_v54, %v3880_v10  ;;  %v6408_v53 = vld [vmem:[#allocation31_spill] sm:$0xff]  ;;  %s4399_s12 = sld [smem:[#allocation3 + $0x72]]  ;;  %s4413_s13 = sld [smem:[#allocation3 + $0x25]]  ;;  %vm1126_vm6 = vcmask 15360  }
 0x106   :  { %6396 = vst [vmem:[#allocation73_spill] sm:$0xff] %v3886_v24  ;;  %6397 = vst [vmem:[#allocation74_spill] sm:$0xff] %v3897_v39  ;;  %2793 = vrot.lane.b32.xlu0 %v6335_v38, %s2949_s14  ;;  %v3918_v24 = vmul.f32 %v3915_v16, %v1780_v11  ;;  %v3933_v51 = vmul.f32 %v1780_v11, %v3632_v7  ;;  %v497_v2 = vmul.f32 %v6404_v54, %v491_v36  ;;  %vm1201_vm7 = vcmask 7168  }
 0x107   :  { %1332 = vrot.lane.b32.xlu1 %v3623_v60, %s2949_s14  ;;  %6398 = vst [vmem:[#allocation75_spill] sm:$0xff] %v3900_v35  ;;  %6399 = vst [vmem:[#allocation76_spill] sm:$0xff] %v3907_v31  ;;  %v6406_v35 = vld [vmem:[#allocation29_spill] sm:$0xff]  ;;  %v3940_v19 = vmul.f32 %v6408_v53, %v3880_v10  ;;  %v508_v34 = vmul.f32 %v6405_v41, %v492_v3  ;;  %v3947_v1 = vmul.f32 %v6408_v53, %v492_v3 }
 0x108   :  { %6400 = vst [vmem:[#allocation77_spill] sm:$0xff] %v3910_v55  ;;  %6401 = vst [vmem:[#allocation78_spill] sm:$0xff] %v3913_v5  ;;  %v3924_v15 = vpop.permute.xlu0 %700  ;;  %v506_v55 = vmul.f32 %v6405_v41, %v3880_v10  ;;  %v516_v5 = vmul.f32 %v6406_v35, %v3880_v10  ;;  %v3944_v61 = vmul.f32 %v6406_v35, %v492_v3  ;;  %v493_v11 = vsel %vm113_vm9, %v485_v48, 0.0 }
 0x109   :  { %6402 = vst [vmem:[#allocation79_spill] sm:$0xff] %v3915_v16  ;;  %6403 = vst [vmem:[#allocation80_spill] sm:$0xff] %v3918_v24  ;;  %v3922_v56 = vpop.permute.xlu1 %702  ;;  %v498_v24 = vmul.f32 %v6404_v54, %v492_v3  ;;  %v2760_v16 = vunpack.i.l.bf16 %v3584_v44  ;;  %v507_v10 = vmul.f32 %v6405_v41, %v491_v36  ;;  %v517_v48 = vmul.f32 %v6406_v35, %v491_v36 }
 0x10a   :  { %6407 = vst [vmem:[#allocation27_spill] sm:$0xff] %v3933_v51  ;;  %6409 = vst [vmem:[#allocation28_spill] sm:$0xff] %v3940_v19  ;;  %v6411_v51 = vld [vmem:[#allocation32_spill] sm:$0xff]  ;;  %1334 = vrot.lane.b32.xlu0 %v3632_v7, %s2949_s14  ;;  %v3966_v50 = vmul.f32 %v6408_v53, %v491_v36  ;;  %v499_v8 = vmul.f32 %v6404_v54, %v493_v11  ;;  %v500_v29 = vadd.f32 %v496_v25, %v3569_v49  ;;  %s4425_s14 = sld [smem:[#allocation3 + $0xf]] }
 0x10b   :  { %6410 = vst [vmem:[#allocation29_spill] sm:$0xff] %v3947_v1  ;;  %1401 = vrot.lane.b32.xlu1 %v3907_v31, %s2950_s16  ;;  %v3954_v9 = vmul.f32 %v6411_v51, %v492_v3  ;;  %v561_v52 = vsel %vm560_vm10, %v2760_v16, %v3630_v58  ;;  %v3969_v3 = vmul.f32 %v6411_v51, %v491_v36 }
 0x10c   :  { %6413 = vst [vmem:[#allocation81_spill] sm:$0xff] %v3966_v50  ;;  %v3974_v16 = vpop.permute.xlu0 %706  ;;  %v509_v58 = vmul.f32 %v6405_v41, %v493_v11  ;;  %v501_v19 = vadd.f32 %v497_v2, %v3590_v47  ;;  %v519_v50 = vmul.f32 %v6406_v35, %v493_v11  ;;  %v529_v36 = vmul.f32 %v6408_v53, %v493_v11 }
 0x10d   :  { %6412 = vst [vmem:[#allocation31_spill] sm:$0xff] %v3954_v9  ;;  %6414 = vst [vmem:[#allocation82_spill] sm:$0xff] %v3969_v3  ;;  %v2761_v9 = vunpack.i.h.bf16 %v3584_v44  ;;  %v3972_v1 = vpop.permute.xlu1 %708  ;;  %v3984_v44 = vsel %vm120_vm11, %v561_v52, 0.0  ;;  %v3988_v3 = vsel %vm121_vm12, %v562_v14, 0.0  ;;  %v539_v41 = vmul.f32 %v6411_v51, %v493_v11  ;;  %v6416_v11 = vld [vmem:[#allocation35_spill] sm:$0xff] }
 0x10e   :  { %v564_v49 = vsel %vm560_vm10, %v3695_v27, %v3693_v62  ;;  %1403 = vrot.lane.b32.xlu0 %v3897_v39, %s2950_s16  ;;  %v502_v47 = vadd.f32 %v498_v24, %v3644_v4  ;;  %v4000_v52 = vstv %s3920_s15  ;;  %v2765_v2 = vunpack.i.l.bf16 %v3755_v20  ;;  %s4443_s15 = sld [smem:[#allocation3 + $0x10]] }
 0x10f   :  { %2798 = vrot.lane.b32.xlu1 %v6335_v38, %s2950_s16  ;;  %6415 = vst [vmem:[#allocation83_spill] sm:$0xff] %v4000_v52  ;;  %v563_v14 = vsel %vm560_vm10, %v2761_v9, %v3695_v27  ;;  %v510_v35 = vadd.f32 %v506_v55, %v3657_v0  ;;  %v511_v62 = vadd.f32 %v507_v10, %v3688_v26  ;;  %v572_v0 = vsel %vm121_vm12, %v564_v49, 0.0  ;;  %v6420_v55 = vld [vmem:[#allocation37_spill] sm:$0xff] }
 0x110   :  { %v4007_v53 = vpop.permute.xlu0 %787  ;;  %v503_v54 = vadd.f32 %v499_v8, %v3654_v45  ;;  %v575_v4 = vmul.f32 %v6416_v11, %v3984_v44  ;;  %v576_v24 = vmul.f32 %v6416_v11, %v3988_v3  ;;  %v512_v27 = vadd.f32 %v508_v34, %v3705_v33  ;;  %v6418_v33 = vld [vmem:[#allocation36_spill] sm:$0xff] }
 0x111   :  { %v4005_v25 = vpop.permute.xlu1 %789  ;;  %v513_v9 = vadd.f32 %v509_v58, %v3707_v46  ;;  %v523_v52 = vadd.f32 %v519_v50, %v3767_v40  ;;  %v4020_v51 = vadd.f32 %v529_v36, %v3827_v32  ;;  %v4027_v45 = vadd.f32 %v539_v41, %v3889_v22 }
 0x112   :  { %v571_v26 = vsel %vm120_vm11, %v563_v14, 0.0  ;;  %1407 = vrot.lane.b32.xlu0 %v3623_v60, %s2950_s16  ;;  %v585_v46 = vmul.f32 %v6418_v33, %v3984_v44  ;;  %v520_v50 = vadd.f32 %v516_v5, %v3716_v28  ;;  %v2766_v40 = vunpack.i.h.bf16 %v3755_v20 }
 0x113   :  { %1409 = vrot.lane.b32.xlu1 %v3632_v7, %s2950_s16  ;;  %6417 = vst [vmem:[#allocation35_spill] sm:$0xff] %v4027_v45  ;;  %v636_v32 = vsel %vm635_vm13, %v2765_v2, %v3753_v37  ;;  %v586_v22 = vmul.f32 %v6418_v33, %v3988_v3  ;;  %v595_v8 = vmul.f32 %v6420_v55, %v3984_v44  ;;  %s4456_s16 = sld [smem:[#allocation3 + $0x3e]]  ;;  %vm1338_vm10 = vcmask 1039360  }
 0x114   :  { %v4041_v10 = vpop.permute.xlu0 %791  ;;  %v578_v58 = vmul.f32 %v6416_v11, %v572_v0  ;;  %v579_v36 = vadd.f32 %v575_v4, %v500_v29  ;;  %v580_v28 = vadd.f32 %v576_v24, %v501_v19  ;;  %v521_v20 = vadd.f32 %v517_v48, %v3729_v17  ;;  %v6424_v4 = vld [vmem:[#allocation41_spill] sm:$0xff]  ;;  %v6431_v48 = vld [vmem:[#allocation43_spill] sm:$0xff] }
 0x115   :  { %v4039_v34 = vpop.permute.xlu1 %793  ;;  %v577_v5 = vmul.f32 %v6416_v11, %v571_v26  ;;  %v587_v41 = vmul.f32 %v6418_v33, %v571_v26  ;;  %v638_v49 = vsel %vm635_vm13, %v2766_v40, %v3808_v30  ;;  %v637_v14 = vsel %vm635_vm13, %v3753_v37, %v3810_v12  ;;  %v6422_v11 = vld [vmem:[#allocation40_spill] sm:$0xff] }
 0x116   :  { %6419 = vst [vmem:[#allocation36_spill] sm:$0xff] %v4039_v34  ;;  %v588_v29 = vmul.f32 %v6418_v33, %v572_v0  ;;  %v4060_v19 = vmul.f32 %v6420_v55, %v571_v26  ;;  %v598_v17 = vmul.f32 %v6420_v55, %v572_v0  ;;  %v4065_v2 = vsel %vm94_vm2, %v636_v32, 0.0  ;;  %1476 = vrot.lane.b32.xlu0 %v3907_v31, %s2951_s18  ;;  %v6432_v34 = vld [vmem:[#allocation44_spill] sm:$0xff] }
 0x117   :  { %1478 = vrot.lane.b32.xlu1 %v3897_v39, %s2951_s18  ;;  %v4070_v37 = vmul.f32 %v6422_v11, %v571_v26  ;;  %v4073_v12 = vmul.f32 %v6422_v11, %v572_v0  ;;  %v4076_v24 = vmul.f32 %v6424_v4, %v571_v26  ;;  %v4079_v33 = vmul.f32 %v6424_v4, %v572_v0 }
 0x118   :  { %v4083_v42 = vpop.permute.xlu0 %795  ;;  %v4087_v32 = vsel %vm94_vm2, %v638_v49, 0.0  ;;  %v4091_v45 = vsel %vm95_vm3, %v637_v14, 0.0  ;;  %v596_v26 = vmul.f32 %v6420_v55, %v3988_v3  ;;  %v589_v4 = vadd.f32 %v585_v46, %v510_v35 }
 0x119   :  { %6423 = vst [vmem:[#allocation37_spill] sm:$0xff] %v4070_v37  ;;  %6425 = vst [vmem:[#allocation40_spill] sm:$0xff] %v4076_v24  ;;  %v4081_v40 = vpop.permute.xlu1 %797  ;;  %v582_v37 = vadd.f32 %v578_v58, %v503_v54  ;;  %v6430_v24 = vld [vmem:[#allocation42_spill] sm:$0xff]  ;;  %v660_v49 = vmul.f32 %v6431_v48, %v4065_v2  ;;  %v639_v14 = vsel %vm635_vm13, %v3808_v30, %v3864_v57  ;;  %v2770_v57 = vunpack.i.l.bf16 %v3862_v21 }
 0x11a   :  { %6426 = vst [vmem:[#allocation84_spill] sm:$0xff] %v4079_v33  ;;  %6427 = vst [vmem:[#allocation85_spill] sm:$0xff] %v4081_v40  ;;  %v650_v0 = vmul.f32 %v6430_v24, %v4065_v2  ;;  %v581_v33 = vadd.f32 %v577_v5, %v502_v47  ;;  %2803 = vrot.lane.b32.xlu0 %v6335_v38, %s2951_s18  ;;  %v590_v54 = vadd.f32 %v586_v22, %v511_v62  ;;  %vm1413_vm13 = vcmask 1031168  }
 0x11b   :  { %6428 = vst [vmem:[#allocation86_spill] sm:$0xff] %v4083_v42  ;;  %1482 = vrot.lane.b32.xlu1 %v3623_v60, %s2951_s18  ;;  %v592_v55 = vadd.f32 %v588_v29, %v513_v9  ;;  %v591_v58 = vadd.f32 %v587_v41, %v512_v27  ;;  %v651_v47 = vmul.f32 %v6430_v24, %v4091_v45  ;;  %v647_v9 = vsel %vm95_vm3, %v639_v14, 0.0 }
 0x11c   :  { %v652_v5 = vmul.f32 %v6430_v24, %v4087_v32  ;;  %v4112_v46 = vpop.permute.xlu0 %826  ;;  %v599_v40 = vadd.f32 %v595_v8, %v520_v50  ;;  %v670_v30 = vmul.f32 %v6432_v34, %v4065_v2  ;;  %v600_v42 = vadd.f32 %v596_v26, %v521_v20 }
 0x11d   :  { %v4110_v35 = vpop.permute.xlu1 %828  ;;  %v602_v62 = vadd.f32 %v598_v17, %v523_v52  ;;  %v522_v27 = vadd.f32 %v3944_v61, %v3748_v43  ;;  %v654_v22 = vadd.f32 %v650_v0, %v579_v36  ;;  %v664_v41 = vadd.f32 %v660_v49, %v589_v4  ;;  %v6438_v0 = vld [vmem:[#allocation52_spill] sm:$0xff] }
 0x11e   :  { %v661_v50 = vmul.f32 %v6431_v48, %v4091_v45  ;;  %v2771_v8 = vunpack.i.h.bf16 %v3862_v21  ;;  %v711_v52 = vsel %vm710_vm14, %v2770_v57, %v3924_v15  ;;  %v712_v61 = vsel %vm710_vm14, %v3924_v15, %v3922_v56  ;;  %1484 = vrot.lane.b32.xlu0 %v3632_v7, %s2951_s18  ;;  %s4473_s18 = sld [smem:[#allocation3 + $0x28]] }
 0x11f   :  { %1551 = vrot.lane.b32.xlu1 %v3907_v31, %s2952_s17  ;;  %v662_v43 = vmul.f32 %v6431_v48, %v4087_v32  ;;  %v655_v36 = vadd.f32 %v651_v47, %v580_v28  ;;  %v656_v20 = vadd.f32 %v652_v5, %v581_v33  ;;  %v674_v21 = vadd.f32 %v670_v30, %v599_v40  ;;  %v6436_v5 = vld [vmem:[#allocation46_spill] sm:$0xff] }
 0x120   :  { %v4137_v17 = vpop.permute.xlu0 %830  ;;  %v671_v4 = vmul.f32 %v6432_v34, %v4091_v45  ;;  %v653_v26 = vmul.f32 %v6430_v24, %v647_v9  ;;  %v663_v56 = vmul.f32 %v6431_v48, %v647_v9  ;;  %v713_v15 = vsel %vm710_vm14, %v2771_v8, %v3974_v16  ;;  %v6435_v48 = vld [vmem:[#allocation45_spill] sm:$0xff] }
 0x121   :  { %v4135_v29 = vpop.permute.xlu1 %832  ;;  %v714_v28 = vsel %vm710_vm14, %v3974_v16, %v3972_v1  ;;  %v673_v33 = vmul.f32 %v6432_v34, %v647_v9  ;;  %v4151_v49 = vsel %vm102_vm4, %v711_v52, 0.0  ;;  %v4155_v14 = vsel %vm103_vm5, %v712_v61, 0.0 }
 0x122   :  { %v665_v24 = vadd.f32 %v661_v50, %v590_v54  ;;  %v4160_v47 = vmul.f32 %v6435_v48, %v647_v9  ;;  %v4163_v30 = vmul.f32 %v6436_v5, %v647_v9  ;;  %1553 = vrot.lane.b32.xlu0 %v3897_v39, %s2952_s17  ;;  %v666_v1 = vadd.f32 %v662_v43, %v591_v58  ;;  %v6437_v58 = vld [vmem:[#allocation49_spill] sm:$0xff] }
 0x123   :  { %2808 = vrot.lane.b32.xlu1 %v6335_v38, %s2952_s17  ;;  %v672_v16 = vmul.f32 %v6432_v34, %v4087_v32  ;;  %v4171_v57 = vsel %vm102_vm4, %v713_v15, 0.0  ;;  %v4175_v54 = vsel %vm103_vm5, %v714_v28, 0.0  ;;  %v675_v9 = vadd.f32 %v671_v4, %v600_v42 }
 0x124   :  { %v4179_v8 = vpop.permute.xlu0 %834  ;;  %v601_v52 = vadd.f32 %v4060_v19, %v522_v27  ;;  %v725_v61 = vmul.f32 %v6437_v58, %v4151_v49  ;;  %v726_v34 = vmul.f32 %v6437_v58, %v4155_v14  ;;  %v657_v43 = vadd.f32 %v653_v26, %v582_v37 }
 0x125   :  { %v4177_v50 = vpop.permute.xlu1 %836  ;;  %v667_v15 = vadd.f32 %v663_v56, %v592_v55  ;;  %v735_v40 = vmul.f32 %v6438_v0, %v4151_v49  ;;  %v736_v28 = vmul.f32 %v6438_v0, %v4155_v14  ;;  %v745_v42 = vmul.f32 %v3567_v59, %v4151_v49 }
 0x126   :  { %v677_v19 = vadd.f32 %v673_v33, %v602_v62  ;;  %v727_v27 = vmul.f32 %v6437_v58, %v4171_v57  ;;  %v728_v37 = vmul.f32 %v6437_v58, %v4175_v54  ;;  %1557 = vrot.lane.b32.xlu0 %v3623_v60, %s2952_s17  ;;  %v746_v55 = vmul.f32 %v3567_v59, %v4155_v14 }
 0x127   :  { %1559 = vrot.lane.b32.xlu1 %v3632_v7, %s2952_s17  ;;  %v676_v4 = vadd.f32 %v672_v16, %v601_v52  ;;  %v737_v26 = vmul.f32 %v6438_v0, %v4171_v57  ;;  %v738_v56 = vmul.f32 %v6438_v0, %v4175_v54  ;;  %v748_v58 = vmul.f32 %v3567_v59, %v4175_v54  ;;  %s4487_s17 = sld [smem:[#allocation3 + $0x29]] }
 0x128   :  { %v4208_v33 = vpop.permute.xlu0 %864  ;;  %v605_v6 = vmul.f32 %v6422_v11, %v3984_v44  ;;  %v729_v38 = vadd.f32 %v725_v61, %v654_v22  ;;  %v800_v16 = vsel %vm799_vm15, %v4007_v53, %v4005_v25  ;;  %v730_v52 = vadd.f32 %v726_v34, %v655_v36  ;;  %v6441_v34 = vld [vmem:[#allocation81_spill] sm:$0xff] }
 0x129   :  { %v4206_v62 = vpop.permute.xlu1 %866  ;;  %v755_v60 = vmul.f32 %v3611_v23, %v4151_v49  ;;  %v4219_v0 = vadd.f32 %v735_v40, %v664_v41  ;;  %v4221_v7 = vadd.f32 %v736_v28, %v665_v24  ;;  %v4223_v39 = vadd.f32 %v745_v42, %v674_v21 }
 0x12a   :  { %v747_v22 = vmul.f32 %v3567_v59, %v4171_v57  ;;  %v732_v61 = vadd.f32 %v728_v37, %v657_v43  ;;  %v731_v31 = vadd.f32 %v727_v27, %v656_v20  ;;  %1640 = vrot.lane.b32.xlu0 %v3638_v13, %s2953_s19  ;;  %v4231_v53 = vadd.f32 %v746_v55, %v675_v9  ;;  %v6439_v20 = vld [vmem:[#allocation28_spill] sm:$0xff] }
 0x12b   :  { %1642 = vrot.lane.b32.xlu1 %v3635_v18, %s2953_s19  ;;  %v606_v41 = vmul.f32 %v6422_v11, %v3988_v3  ;;  %v4235_v36 = vadd.f32 %v800_v16, %v729_v38  ;;  %v4237_v21 = vadd.f32 %v738_v56, %v667_v15  ;;  %v4239_v40 = vadd.f32 %v737_v26, %v666_v1  ;;  %v6440_v11 = vld [vmem:[#allocation22_spill] sm:$0xff]  ;;  %v6442_v43 = vld [vmem:[#allocation56_spill] sm:$0xff]  ;;  %v6444_v26 = vld [vmem:[#allocation67_spill] sm:$0xff] }
 0x12c   :  { %v4243_v24 = vpop.permute.xlu0 %868  ;;  %v4245_v59 = vadd.f32 %v748_v58, %v677_v19  ;;  %v801_v13 = vsel %vm799_vm15, %v4005_v25, %v4041_v10  ;;  %v530_v9 = vadd.f32 %v6439_v20, %v3770_v63  ;;  %v680_v38 = vmul.f32 %v6435_v48, %v4065_v2  ;;  %v6443_v10 = vld [vmem:[#allocation57_spill] sm:$0xff]  ;;  %v6446_v58 = vld [vmem:[#allocation71_spill] sm:$0xff]  ;;  %v6447_v16 = vld [vmem:[#allocation32_spill] sm:$0xff] }
 0x12d   :  { %v4241_v18 = vpop.permute.xlu1 %870  ;;  %v531_v1 = vadd.f32 %v6441_v34, %v6440_v11  ;;  %v4258_v15 = vadd.f32 %v747_v22, %v676_v4  ;;  %v681_v28 = vmul.f32 %v6435_v48, %v4091_v45  ;;  %v612_v25 = vadd.f32 %v4073_v12, %v4020_v51  ;;  %v6445_v56 = vld [vmem:[#allocation29_spill] sm:$0xff] }
 0x12e   :  { %v758_v63 = vmul.f32 %v3611_v23, %v4175_v54  ;;  %1644 = vrot.lane.b32.xlu0 %v6443_v10, %s2953_s19  ;;  %v609_v42 = vadd.f32 %v605_v6, %v530_v9  ;;  %v756_v27 = vmul.f32 %v3611_v23, %v4155_v14  ;;  %v757_v37 = vmul.f32 %v3611_v23, %v4171_v57  ;;  %v6448_v23 = vld [vmem:[#allocation86_spill] sm:$0xff] }
 0x12f   :  { %1646 = vrot.lane.b32.xlu1 %v6442_v43, %s2953_s19  ;;  %v610_v19 = vadd.f32 %v606_v41, %v531_v1  ;;  %v4274_v55 = vadd.f32 %v801_v13, %v730_v52  ;;  %v687_v12 = vadd.f32 %v4160_v47, %v612_v25  ;;  %v532_v6 = vadd.f32 %v6445_v56, %v6444_v26  ;;  %v6449_v41 = vld [vmem:[#allocation36_spill] sm:$0xff]  ;;  %v6450_v13 = vld [vmem:[#allocation85_spill] sm:$0xff]  ;;  %v6452_v25 = vld [vmem:[#allocation54_spill] sm:$0xff] }
 0x130   :  { %v4278_v51 = vpop.permute.xlu0 %872  ;;  %v536_v22 = vmul.f32 %v6447_v16, %v6446_v58  ;;  %v802_v52 = vsel %vm799_vm15, %v6449_v41, %v6448_v23  ;;  %v803_v20 = vsel %vm799_vm15, %v6448_v23, %v6450_v13  ;;  %v684_v9 = vadd.f32 %v680_v38, %v609_v42  ;;  %v6451_v1 = vld [vmem:[#allocation41_spill] sm:$0xff]  ;;  %v6455_v56 = vld [vmem:[#allocation48_spill] sm:$0xff]  ;;  %v6457_v58 = vld [vmem:[#allocation82_spill] sm:$0xff] }
 0x131   :  { %v4276_v4 = vpop.permute.xlu1 %874  ;;  %v682_v47 = vmul.f32 %v6435_v48, %v4087_v32  ;;  %v685_v11 = vadd.f32 %v681_v28, %v610_v19  ;;  %v4303_v34 = vadd.f32 %v758_v63, %v687_v12  ;;  %v615_v43 = vmul.f32 %v6451_v1, %v3984_v44  ;;  %v6453_v48 = vld [vmem:[#allocation58_spill] sm:$0xff]  ;;  %v6454_v42 = vld [vmem:[#allocation37_spill] sm:$0xff]  ;;  %v6459_v41 = vld [vmem:[#allocation35_spill] sm:$0xff] }
 0x132   :  { %v765_v26 = vmul.f32 %v6452_v25, %v4151_v49  ;;  %1648 = vrot.lane.b32.xlu0 %v6453_v48, %s2953_s19  ;;  %v4315_v38 = vadd.f32 %v755_v60, %v684_v9  ;;  %v690_v28 = vmul.f32 %v6436_v5, %v4065_v2  ;;  %v616_v44 = vmul.f32 %v6451_v1, %v3988_v3  ;;  %v6456_v2 = vld [vmem:[#allocation47_spill] sm:$0xff]  ;;  %v6462_v9 = vld [vmem:[#allocation70_spill] sm:$0xff] }
 0x133   :  { %1650 = vrot.lane.b32.xlu1 %v6443_v10, %s2953_s19  ;;  %v611_v10 = vadd.f32 %v6454_v42, %v532_v6  ;;  %v4326_v49 = vadd.f32 %v802_v52, %v731_v31  ;;  %v4328_v63 = vadd.f32 %v803_v20, %v732_v61  ;;  %v4334_v12 = vadd.f32 %v756_v27, %v685_v11  ;;  %v6460_v52 = vld [vmem:[#allocation84_spill] sm:$0xff] }
 0x134   :  { %v4332_v60 = vpop.permute.xlu0 %902  ;;  %v540_v6 = vadd.f32 %v536_v22, %v6455_v56  ;;  %v541_v16 = vadd.f32 %v6457_v58, %v6456_v2  ;;  %v691_v31 = vmul.f32 %v6436_v5, %v4091_v45  ;;  %v766_v61 = vmul.f32 %v6452_v25, %v4155_v14  ;;  %v6458_v22 = vld [vmem:[#allocation59_spill] sm:$0xff]  ;;  %v6461_v14 = vld [vmem:[#allocation60_spill] sm:$0xff] }
 0x135   :  { %v4330_v19 = vpop.permute.xlu1 %904  ;;  %v686_v3 = vadd.f32 %v682_v47, %v611_v10  ;;  %v838_v27 = vsel %vm799_vm15, %v4112_v46, %v4110_v35  ;;  %v622_v13 = vadd.f32 %v6460_v52, %v6459_v41  ;;  %v768_v45 = vmul.f32 %v6452_v25, %v4175_v54  ;;  %v6463_v47 = vld [vmem:[#allocation31_spill] sm:$0xff] }
 0x136   :  { %v619_v23 = vadd.f32 %v615_v43, %v540_v6  ;;  %1679 = vrot.lane.b32.xlu0 %v6461_v14, %s2953_s19  ;;  %v620_v46 = vadd.f32 %v616_v44, %v541_v16  ;;  %v542_v11 = vadd.f32 %v6463_v47, %v6462_v9  ;;  %v692_v1 = vmul.f32 %v6436_v5, %v4087_v32  ;;  %v6466_v6 = vld [vmem:[#allocation13_spill] sm:$0xff]  ;;  %v6468_v52 = vld [vmem:[#allocation79_spill] sm:$0xff] }
 0x137   :  { %1681 = vrot.lane.b32.xlu1 %v6458_v22, %s2953_s19  ;;  %v4366_v20 = vadd.f32 %v757_v37, %v686_v3  ;;  %v839_v54 = vsel %vm799_vm15, %v4110_v35, %v4137_v17  ;;  %v697_v42 = vadd.f32 %v4163_v30, %v622_v13  ;;  %v767_v32 = vmul.f32 %v6452_v25, %v4171_v57  ;;  %v6464_v17 = vld [vmem:[#allocation40_spill] sm:$0xff]  ;;  %v6465_v30 = vld [vmem:[#allocation61_spill] sm:$0xff] }
 0x138   :  { %v4381_v37 = vpop.permute.xlu0 %906  ;;  %v694_v48 = vadd.f32 %v690_v28, %v619_v23  ;;  %v4391_v5 = vadd.f32 %v838_v27, %v4219_v0  ;;  %v695_v35 = vadd.f32 %v691_v31, %v620_v46  ;;  %v621_v10 = vadd.f32 %v6464_v17, %v542_v11  ;;  %v6472_v46 = vld [vmem:[#allocation15_spill] sm:$0xff] }
 0x139   :  { %v4379_v43 = vpop.permute.xlu1 %908  ;;  %v4395_v44 = vstv %s4272_s20  ;;  %v4405_v0 = vadd.f32 %v768_v45, %v697_v42  ;;  %v4408_v25 = vstv %s4285_s21  ;;  %v4411_v28 = vstv %s4287_s22  ;;  %s4489_s20 = sld [smem:[#allocation3 + $0x57]]  ;;  %s4505_s21 = sld [smem:[#allocation3 + $0x70]] }
 0x13a   :  { %v4403_v57 = vadd.f32 %v765_v26, %v694_v48  ;;  %v4416_v56 = vadd.f32 %v839_v54, %v4221_v7  ;;  %1683 = vrot.lane.b32.xlu0 %v6466_v6, %s2953_s19  ;;  %v4420_v3 = vadd.f32 %v766_v61, %v695_v35  ;;  %v696_v26 = vadd.f32 %v692_v1, %v621_v10  ;;  %s4519_s22 = sld [smem:[#allocation3 + $0x2f]] }
 0x13b   :  { %1685 = vrot.lane.b32.xlu1 %v6465_v30, %s2953_s19  ;;  %v4423_v2 = vstv %s4297_s23  ;;  %v840_v58 = vsel %vm799_vm15, %v4135_v29, %v4179_v8  ;;  %v4435_v31 = vstv %s4299_s24  ;;  %v4438_v61 = vstv %s4309_s25  ;;  %v6481_v30 = vld [vmem:[#allocation76_spill] sm:$0xff]  ;;  %s4587_s23 = sld [smem:[#allocation3 + $0x41]]  ;;  %s4600_s24 = sld [smem:[#allocation3 + $0x48]] }
 0x13c   :  { %v4432_v16 = vpop.permute.xlu0 %910  ;;  %v4441_v27 = vstv %s4311_s26  ;;  %v841_v29 = vsel %vm799_vm15, %v4179_v8, %v4177_v50  ;;  %v4448_v22 = vadd.f32 %v767_v32, %v696_v26  ;;  %v4451_v23 = vstv %s4322_s27  ;;  %s4612_s25 = sld [smem:[#allocation3 + $0x42]]  ;;  %s4668_s27 = sld [smem:[#allocation3 + $0x73]] }
 0x13d   :  { %v4430_v7 = vpop.permute.xlu1 %912  ;;  %v4454_v41 = vstv %s4324_s28  ;;  %v4462_v13 = vpack.i.bf16 %v6468_v52, %v6468_v52  ;;  %v4465_v45 = vstv %s4337_s30  ;;  %v4468_v50 = vstv %s4339_s3  ;;  %s4614_s26 = sld [smem:[#allocation3 + $0x5a]]  ;;  %s4679_s28 = sld [smem:[#allocation3 + $0x5b]] }
 0x13e   :  { %6467 = vst [vmem:[#allocation42_spill] sm:$0xff] %v4454_v41  ;;  %6469 = vst [vmem:[#allocation43_spill] sm:$0xff] %v4465_v45  ;;  %v4471_v8 = vstv %s4347_s1  ;;  %v4476_v14 = vadd.f32 %v840_v58, %v4239_v40  ;;  %1687 = vrot.lane.b32.xlu0 %v6472_v46, %s2953_s19  ;;  %v4481_v9 = vstv %s4349_s4  ;;  %v4484_v47 = vstv %s4360_s5  ;;  %v6484_v58 = vld [vmem:[#allocation74_spill] sm:$0xff]  ;;  %s4694_s30 = sld [smem:[#allocation3 + $0x16]]  ;;  %s4705_s3 = sld [smem:[#allocation3 + $0x74]] }
 0x13f   :  { %1689 = vrot.lane.b32.xlu1 %v6466_v6, %s2953_s19  ;;  %6470 = vst [vmem:[#allocation44_spill] sm:$0xff] %v4468_v50  ;;  %6471 = vst [vmem:[#allocation45_spill] sm:$0xff] %v4471_v8  ;;  %v2233_v11 = vstv %s4374_s8  ;;  %v4492_v1 = vadd.f32 %v841_v29, %v4237_v21  ;;  %v876_v40 = vsel %vm799_vm15, %v4208_v33, %v4206_v62  ;;  %v4502_v42 = vstv %s4362_s6  ;;  %v6480_v33 = vld [vmem:[#allocation12_spill] sm:$0xff]  ;;  %v6547_v50 = vld [vmem:[#allocation75_spill] sm:$0xff]  ;;  %s2955_s1 = smov 110   ;;  %s2956_s4 = smov 98  }
 0x140   :  { %6473 = vst [vmem:[#allocation46_spill] sm:$0xff] %v4481_v9  ;;  %6474 = vst [vmem:[#allocation49_spill] sm:$0xff] %v4484_v47  ;;  %v4499_v48 = vpop.permute.xlu0 %940  ;;  %v1265_v32 = vstv %s4388_s10  ;;  %v4508_v35 = vstv %s4372_s7  ;;  %v4511_v17 = vstv %s4386_s9  ;;  %v4514_v21 = vstv %s4397_s11  ;;  %s2957_s5 = smov 97   ;;  %s2958_s6 = smov 95  }
 0x141   :  { %v4497_v54 = vpop.permute.xlu1 %942  ;;  %6475 = vst [vmem:[#allocation52_spill] sm:$0xff] %v4502_v42  ;;  %6476 = vst [vmem:[#allocation28_spill] sm:$0xff] %v4508_v35  ;;  %v4517_v10 = vstv %s4399_s12  ;;  %v4524_v6 = vmul.f32 %v6481_v30, %v2233_v11  ;;  %v4527_v26 = vmul.f32 %v6468_v52, %v2233_v11  ;;  %v4530_v29 = vmul.f32 %v6484_v58, %v2233_v11  ;;  %v6492_v35 = vld [vmem:[#allocation53_spill] sm:$0xff]  ;;  %s2959_s7 = smov 96   ;;  %s2960_s8 = smov 94  }
 0x142   :  { %6477 = vst [vmem:[#allocation22_spill] sm:$0xff] %v4511_v17  ;;  %6478 = vst [vmem:[#allocation81_spill] sm:$0xff] %v4514_v21  ;;  %v1275_v46 = vstv %s4413_s13  ;;  %v4534_v47 = vadd.f32 %v876_v40, %v4223_v39  ;;  %v4542_v21 = vmul.f32 %v6481_v30, %v1265_v32  ;;  %v4545_v17 = vstv %s4425_s14  ;;  %v6490_v40 = vld [vmem:[#allocation55_spill] sm:$0xff]  ;;  %s2701_s9 = sld [smem:[#allocation3 + $0x7a]]  ;;  %s2678_s11 = sld [smem:[#allocation3 + $0x2b]] }
 0x143   :  { %6479 = vst [vmem:[#allocation56_spill] sm:$0xff] %v4517_v10  ;;  %1719 = vrot.lane.b32.xlu1 %v6480_v33, %s2953_s19  ;;  %6482 = vst [vmem:[#allocation57_spill] sm:$0xff] %v4524_v6  ;;  %v877_v10 = vsel %vm799_vm15, %v4206_v62, %v4243_v24  ;;  %v6486_v33 = vld [vmem:[#allocation14_spill] sm:$0xff]  ;;  %v4552_v39 = vstv %s4443_s15  ;;  %v4555_v6 = vmul.f32 %v2233_v11, %v6490_v40  ;;  %v1285_v40 = vstv %s4456_s16  ;;  %s2677_s10 = sld [smem:[#allocation3 + $0x12]]  ;;  %s2679_s12 = sld [smem:[#allocation3 + $0x44]] }
 0x144   :  { %6483 = vst [vmem:[#allocation67_spill] sm:$0xff] %v4527_v26  ;;  %6485 = vst [vmem:[#allocation29_spill] sm:$0xff] %v4530_v29  ;;  %1717 = vrot.lane.b32.xlu0 %v6486_v33, %s2953_s19  ;;  %v4549_v29 = vpop.permute.xlu0 %944  ;;  %v4558_v62 = vmul.f32 %v2233_v11, %v6492_v35  ;;  %v4561_v24 = vmul.f32 %v6484_v58, %v1265_v32  ;;  %v2863_v33 = vld [vmem:[#allocation2 + $0x28] sm:$0xff]  ;;  %v4575_v11 = vadd.f32 %v877_v10, %v4231_v53  ;;  %v6502_v10 = vld [vmem:[#allocation18_spill] sm:$0xff]  ;;  %vm1488_vm14 = vcmask 932864   ;;  %s2680_s13 = sld [smem:[#allocation3 + $0x5d]] }
 0x145   :  { %6487 = vst [vmem:[#allocation71_spill] sm:$0xff] %v4542_v21  ;;  %6488 = vst [vmem:[#allocation32_spill] sm:$0xff] %v4545_v17  ;;  %v4547_v26 = vpop.permute.xlu1 %946  ;;  %v4563_v9 = vmul.f32 %v2863_v33, %v1265_v32  ;;  %v4565_v17 = vld [vmem:[#allocation2 + $0x30] sm:$0xff]  ;;  %v878_v53 = vsel %vm799_vm15, %v4241_v18, %v4278_v51  ;;  %v4623_v21 = vmul.f32 %v2863_v33, %v1285_v40  ;;  %s2681_s14 = sld [smem:[#allocation3 + $0x76]]  ;;  %s5612_s15 = sld [smem:[#allocation3 + $0x13]] }
 0x146   :  { %6489 = vst [vmem:[#allocation86_spill] sm:$0xff] %v4552_v39  ;;  %6491 = vst [vmem:[#allocation36_spill] sm:$0xff] %v4555_v6  ;;  %v4568_v42 = vmul.f32 %v4565_v17, %v1265_v32  ;;  %v4571_v39 = vmul.f32 %v6481_v30, %v1275_v46  ;;  %v4580_v6 = vstv %s4473_s18  ;;  %v879_v32 = vsel %vm799_vm15, %v4278_v51, %v4276_v4  ;;  %s5614_s16 = sld [smem:[#allocation3 + $0x2c]]  ;;  %s5619_s18 = sld [smem:[#allocation3 + $0x45]] }
 0x147   :  { %6493 = vst [vmem:[#allocation85_spill] sm:$0xff] %v4558_v62  ;;  %6494 = vst [vmem:[#allocation41_spill] sm:$0xff] %v4561_v24  ;;  %v6498_v62 = vld [vmem:[#allocation17_spill] sm:$0xff]  ;;  %v4585_v24 = vmul.f32 %v2863_v33, %v1275_v46  ;;  %v4607_v18 = vmul.f32 %v4565_v17, %v1275_v46  ;;  %v4617_v4 = vstv %s4505_s21  ;;  %v2157_v51 = vstv %s4519_s22  ;;  %s5629_s21 = sld [smem:[#allocation3 + $0x60]]  ;;  %s5631_s22 = sld [smem:[#allocation3 + $0x2d]] }
 0x148   :  { %6495 = vst [vmem:[#allocation54_spill] sm:$0xff] %v4563_v9  ;;  %6496 = vst [vmem:[#allocation58_spill] sm:$0xff] %v4568_v42  ;;  %1723 = vrot.lane.b32.xlu1 %v6498_v62, %s2953_s19  ;;  %v4583_v9 = vmul.f32 %v6484_v58, %v1275_v46  ;;  %1721 = vrot.lane.b32.xlu0 %v6502_v10, %s2953_s19  ;;  %v4598_v62 = vstv %s4487_s17  ;;  %v4610_v42 = vmul.f32 %v6481_v30, %v1285_v40  ;;  %s5624_s17 = sld [smem:[#allocation3 + $0x5e]] }
 0x149   :  { %6497 = vst [vmem:[#allocation37_spill] sm:$0xff] %v4571_v39  ;;  %6499 = vst [vmem:[#allocation48_spill] sm:$0xff] %v4580_v6  ;;  %v1295_v39 = vstv %s4489_s20  ;;  %v951_v6 = vpop.permute.xlu1 %950  ;;  %v4629_v46 = vadd.f32 %v878_v53, %v4258_v15  ;;  %v4654_v53 = vmul.f32 %v6484_v58, %v4617_v4  ;;  %s5626_s20 = sld [smem:[#allocation3 + $0x5f]] }
 0x14a   :  { %6500 = vst [vmem:[#allocation47_spill] sm:$0xff] %v4583_v9  ;;  %6501 = vst [vmem:[#allocation82_spill] sm:$0xff] %v4585_v24  ;;  %v914_v24 = vsel %vm799_vm15, %v4332_v60, %v4330_v19  ;;  %v949_v9 = vpop.permute.xlu0 %948  ;;  %v4626_v60 = vmul.f32 %v4565_v17, %v1285_v40  ;;  %v4640_v8 = vmul.f32 %v6484_v58, %v1295_v39 }
 0x14b   :  { %6503 = vst [vmem:[#allocation59_spill] sm:$0xff] %v4598_v62  ;;  %6504 = vst [vmem:[#allocation35_spill] sm:$0xff] %v4607_v18  ;;  %v4621_v62 = vmul.f32 %v6484_v58, %v1285_v40  ;;  %v4637_v18 = vmul.f32 %v6481_v30, %v1295_v39  ;;  %v6512_v40 = vld [vmem:[#allocation23_spill] sm:$0xff]  ;;  %v4647_v15 = vmul.f32 %v2863_v33, %v1295_v39 }
 0x14c   :  { %6505 = vst [vmem:[#allocation84_spill] sm:$0xff] %v4610_v42  ;;  %6506 = vst [vmem:[#allocation60_spill] sm:$0xff] %v4617_v4  ;;  %v4632_v42 = vadd.f32 %v879_v32, %v4245_v59  ;;  %1727 = vrot.lane.b32.xlu1 %v6502_v10, %s2953_s19  ;;  %1725 = vrot.lane.b32.xlu0 %v6512_v40, %s2953_s19  ;;  %v4650_v59 = vmul.f32 %v4565_v17, %v1295_v39 }
 0x14d   :  { %6507 = vst [vmem:[#allocation70_spill] sm:$0xff] %v4621_v62  ;;  %6508 = vst [vmem:[#allocation31_spill] sm:$0xff] %v4623_v21  ;;  %v4643_v21 = vadd.f32 %v914_v24, %v4315_v38  ;;  %v915_v32 = vsel %vm799_vm15, %v4330_v19, %v4381_v37  ;;  %v967_v10 = vpop.permute.xlu1 %966  ;;  %v4660_v24 = vmul.f32 %v6484_v58, %v2157_v51 }
 0x14e   :  { %6509 = vst [vmem:[#allocation40_spill] sm:$0xff] %v4626_v60  ;;  %6510 = vst [vmem:[#allocation61_spill] sm:$0xff] %v4637_v18  ;;  %v2774_v38 = vpop.permute.xlu0 %2773  ;;  %v4663_v40 = vmul.f32 %v6481_v30, %v2157_v51  ;;  %v4666_v39 = vmul.f32 %v2157_v51, %v6492_v35  ;;  %v917_v19 = vsel %vm799_vm15, %v4432_v16, %v4430_v7 }
 0x14f   :  { %6511 = vst [vmem:[#allocation13_spill] sm:$0xff] %v4640_v8  ;;  %6513 = vst [vmem:[#allocation79_spill] sm:$0xff] %v4647_v15  ;;  %v2775_v37 = vunpack.i.l.bf16 %v2774_v38  ;;  %v4677_v18 = vmul.f32 %v6468_v52, %v2157_v51  ;;  %v952_v35 = vsel %vm799_vm15, %v4499_v48, %v4497_v54  ;;  %v4687_v15 = vstv %s4587_s23  ;;  %s5636_s23 = sld [smem:[#allocation3 + $0x2e]] }
 0x150   :  { %6514 = vst [vmem:[#allocation15_spill] sm:$0xff] %v4650_v59  ;;  %6515 = vst [vmem:[#allocation12_spill] sm:$0xff] %v4654_v53  ;;  %v916_v53 = vsel %vm799_vm15, %v4379_v43, %v4432_v16  ;;  %v4689_v43 = vld [vmem:[#allocation2 + $0x30] sm:$0xff]  ;;  %v4697_v16 = vmul.f32 %v2863_v33, %v4617_v4  ;;  %v2776_v48 = vunpack.i.h.bf16 %v2774_v38  ;;  %v2195_v59 = vstv %s4600_s24  ;;  %s5639_s24 = sld [smem:[#allocation3 + $0x46]] }
 0x151   :  { %6516 = vst [vmem:[#allocation76_spill] sm:$0xff] %v4660_v24  ;;  %6517 = vst [vmem:[#allocation74_spill] sm:$0xff] %v4663_v40  ;;  %v4692_v7 = vmul.f32 %v4689_v43, %v2157_v51  ;;  %v4709_v40 = vmul.f32 %v4565_v17, %v4617_v4  ;;  %v924_v51 = vadd.f32 %v916_v53, %v4366_v20  ;;  %v973_v33 = vpop.permute.xlu1 %972  ;;  %v6528_v4 = vld [vmem:[#allocation65_spill] sm:$0xff] }
 0x152   :  { %6518 = vst [vmem:[#allocation14_spill] sm:$0xff] %v4666_v39  ;;  %6519 = vst [vmem:[#allocation55_spill] sm:$0xff] %v4677_v18  ;;  %v6520_v39 = vld [vmem:[#allocation62_spill] sm:$0xff]  ;;  %v4700_v18 = vadd.f32 %v915_v32, %v4334_v12  ;;  %v4716_v12 = vstv %s4612_s25  ;;  %v4719_v32 = vstv %s4614_s26  ;;  %v4722_v38 = vadd.f32 %v952_v35, %v4403_v57  ;;  %s5654_s25 = sld [smem:[#allocation3 + $0x47]]  ;;  %s5662_s26 = sld [smem:[#allocation3 + $0x14]] }
 0x153   :  { %1757 = vrot.lane.b32.xlu1 %v6520_v39, %s2953_s19  ;;  %6521 = vst [vmem:[#allocation53_spill] sm:$0xff] %v4687_v15  ;;  %6522 = vst [vmem:[#allocation17_spill] sm:$0xff] %v4692_v7  ;;  %v6524_v39 = vld [vmem:[#allocation63_spill] sm:$0xff]  ;;  %v4713_v7 = vadd.f32 %v917_v19, %v4303_v34  ;;  %v953_v17 = vsel %vm799_vm15, %v4497_v54, %v4549_v29  ;;  %v979_v20 = vsel %vm976_vm0, %v2776_v48, %v973_v33  ;;  %v6531_v29 = vld [vmem:[#allocation66_spill] sm:$0xff] }
 0x154   :  { %6523 = vst [vmem:[#allocation18_spill] sm:$0xff] %v4697_v16  ;;  %1755 = vrot.lane.b32.xlu0 %v6524_v39, %s2953_s19  ;;  %6525 = vst [vmem:[#allocation23_spill] sm:$0xff] %v4709_v40  ;;  %v969_v16 = vpop.permute.xlu0 %968  ;;  %v977_v39 = vsel %vm976_vm0, %v2775_v37, %v967_v10  ;;  %v954_v34 = vsel %vm799_vm15, %v4547_v26, %v949_v9  ;;  %v955_v53 = vsel %vm799_vm15, %v949_v9, %v951_v6  ;;  %v4745_v37 = vld [vmem:[#allocation2 + $0x28] sm:$0xff]  ;;  %v6541_v40 = vld [vmem:[#allocation38_spill] sm:$0xff]  ;;  %vm1563_vm15 = vcmask 924672  }
 0x155   :  { %6526 = vst [vmem:[#allocation62_spill] sm:$0xff] %v4716_v12  ;;  %6527 = vst [vmem:[#allocation63_spill] sm:$0xff] %v4719_v32  ;;  %v978_v19 = vsel %vm976_vm0, %v967_v10, %v969_v16  ;;  %v4736_v57 = vmul.f32 %v6484_v58, %v2195_v59  ;;  %v987_v54 = vsel %vm112_vm8, %v979_v20, 0.0  ;;  %v4743_v26 = vmul.f32 %v6481_v30, %v2195_v59  ;;  %v4756_v10 = vpop.permute.xlu1 %2778 }
 0x156   :  { %v4748_v9 = vmul.f32 %v4745_v37, %v2195_v59  ;;  %v4751_v6 = vmul.f32 %v6468_v52, %v2195_v59  ;;  %v961_v58 = vadd.f32 %v953_v17, %v4420_v3  ;;  %v4759_v30 = vmul.f32 %v4689_v43, %v2195_v59  ;;  %v6585_v52 = vld [vmem:[#allocation46_spill] sm:$0xff] }
 0x157   :  { %1761 = vrot.lane.b32.xlu1 %v6528_v4, %s2953_s19  ;;  %6529 = vst [vmem:[#allocation65_spill] sm:$0xff] %v4736_v57  ;;  %6532 = vst [vmem:[#allocation66_spill] sm:$0xff] %v4743_v26  ;;  %v985_v4 = vsel %vm112_vm8, %v977_v39, 0.0  ;;  %v4762_v48 = vstv %s4668_s27  ;;  %v962_v20 = vadd.f32 %v954_v34, %v4448_v22  ;;  %v986_v3 = vsel %vm113_vm9, %v978_v19, 0.0  ;;  %v6539_v39 = vld [vmem:[#allocation25_spill] sm:$0xff]  ;;  %v6540_v26 = vld [vmem:[#allocation24_spill] sm:$0xff] }
 0x158   :  { %1759 = vrot.lane.b32.xlu0 %v6531_v29, %s2953_s19  ;;  %6533 = vst [vmem:[#allocation87_spill] sm:$0xff] %v4748_v9  ;;  %6534 = vst [vmem:[#allocation88_spill] sm:$0xff] %v4751_v6  ;;  %v975_v16 = vpop.permute.xlu0 %974  ;;  %v4766_v9 = vadd.f32 %v955_v53, %v4405_v0  ;;  %v4771_v17 = vstv %s4679_s28  ;;  %v993_v6 = vmul.f32 %v6539_v39, %v987_v54  ;;  %v4779_v59 = vstv %s4694_s30  ;;  %v6543_v22 = vld [vmem:[#allocation39_spill] sm:$0xff]  ;;  %v6544_v0 = vld [vmem:[#allocation64_spill] sm:$0xff]  ;;  %s5664_s27 = sld [smem:[#allocation3 + $0x15]]  ;;  %s5823_s28 = sld [smem:[#allocation3 + $0x77]] }
 0x159   :  { %6535 = vst [vmem:[#allocation89_spill] sm:$0xff] %v4759_v30  ;;  %6536 = vst [vmem:[#allocation90_spill] sm:$0xff] %v4762_v48  ;;  %v1003_v57 = vmul.f32 %v6540_v26, %v987_v54  ;;  %v1013_v32 = vmul.f32 %v6541_v40, %v987_v54  ;;  %v1023_v34 = vmul.f32 %v6543_v22, %v987_v54  ;;  %v6545_v30 = vld [vmem:[#allocation51_spill] sm:$0xff]  ;;  %v4787_v48 = vstv %s4705_s3  ;;  %s5847_s30 = sld [smem:[#allocation3 + $0x62]]  ;;  %s5871_s3 = sld [smem:[#allocation3 + $0x78]] }
 0x15a   :  { %6538 = vst [vmem:[#allocation91_spill] sm:$0xff] %v4771_v17  ;;  %6542 = vst [vmem:[#allocation25_spill] sm:$0xff] %v4779_v59  ;;  %v1033_v53 = vmul.f32 %v6544_v0, %v987_v54  ;;  %v991_v19 = vmul.f32 %v6539_v39, %v985_v4  ;;  %v992_v17 = vmul.f32 %v6539_v39, %v986_v3  ;;  %v2780_v54 = vunpack.i.l.bf16 %v4756_v10 }
 0x15b   :  { %1765 = vrot.lane.b32.xlu1 %v6531_v29, %s2953_s19  ;;  %6546 = vst [vmem:[#allocation24_spill] sm:$0xff] %v4787_v48  ;;  %v1002_v24 = vmul.f32 %v6540_v26, %v986_v3  ;;  %v980_v8 = vsel %vm976_vm0, %v973_v33, %v975_v16  ;;  %v1044_v29 = vpop.permute.xlu1 %1043  ;;  %v1001_v59 = vmul.f32 %v6540_v26, %v985_v4  ;;  %vm1652_vm0 = vcmask 916480  }
 0x15c   :  { %1763 = vrot.lane.b32.xlu0 %v6545_v30, %s2953_s19  ;;  %v1042_v60 = vpop.permute.xlu0 %1041  ;;  %v1012_v12 = vmul.f32 %v6541_v40, %v986_v3  ;;  %v1011_v30 = vmul.f32 %v6541_v40, %v985_v4  ;;  %v1021_v15 = vmul.f32 %v6543_v22, %v985_v4  ;;  %v4798_v48 = vadd.f32 %v993_v6, %v4326_v49 }
 0x15d   :  { %v4801_v62 = vadd.f32 %v1003_v57, %v4476_v14  ;;  %v4804_v33 = vadd.f32 %v1013_v32, %v4629_v46  ;;  %v988_v16 = vsel %vm113_vm9, %v980_v8, 0.0  ;;  %v4810_v45 = vadd.f32 %v1023_v34, %v924_v51  ;;  %v6548_v14 = vld [vmem:[#allocation77_spill] sm:$0xff] }
 0x15e   :  { %v4812_v35 = vadd.f32 %v1033_v53, %v962_v20  ;;  %v1052_v41 = vsel %vm1051_vm1, %v2780_v54, %v1042_v60  ;;  %v1053_v49 = vsel %vm1051_vm1, %v1042_v60, %v1044_v29  ;;  %v996_v46 = vadd.f32 %v992_v17, %v4274_v55  ;;  %v6551_v29 = vld [vmem:[#allocation78_spill] sm:$0xff] }
 0x15f   :  { %1795 = vrot.lane.b32.xlu1 %v6547_v50, %s2953_s19  ;;  %v1006_v32 = vadd.f32 %v1002_v24, %v4416_v56  ;;  %v1022_v8 = vmul.f32 %v6543_v22, %v986_v3  ;;  %v1032_v57 = vmul.f32 %v6544_v0, %v986_v3  ;;  %v1050_v50 = vpop.permute.xlu1 %1049  ;;  %v1016_v6 = vadd.f32 %v1012_v12, %v4575_v11  ;;  %v4884_v24 = vld [vmem:[#allocation2 + $0x10] sm:$0xff] }
 0x160   :  { %1793 = vrot.lane.b32.xlu0 %v6548_v14, %s2953_s19  ;;  %v1048_v51 = vpop.permute.xlu0 %1047  ;;  %v2781_v20 = vunpack.i.h.bf16 %v4756_v10  ;;  %v994_v34 = vmul.f32 %v6539_v39, %v988_v16  ;;  %v995_v60 = vadd.f32 %v991_v19, %v4235_v36  ;;  %v1005_v53 = vadd.f32 %v1001_v59, %v4391_v5  ;;  %v6552_v5 = vld [vmem:[#allocation80_spill] sm:$0xff] }
 0x161   :  { %v1015_v55 = vadd.f32 %v1011_v30, %v4534_v47  ;;  %v1060_v56 = vsel %vm120_vm11, %v1052_v41, 0.0  ;;  %v1061_v3 = vsel %vm121_vm12, %v1053_v49, 0.0  ;;  %v1004_v11 = vmul.f32 %v6540_v26, %v988_v16  ;;  %v6553_v26 = vld [vmem:[#allocation50_spill] sm:$0xff] }
 0x162   :  { %v1014_v12 = vmul.f32 %v6541_v40, %v988_v16  ;;  %v1024_v10 = vmul.f32 %v6543_v22, %v988_v16  ;;  %v1034_v36 = vmul.f32 %v6544_v0, %v988_v16  ;;  %v1026_v47 = vadd.f32 %v1022_v8, %v4700_v18  ;;  %v6554_v16 = vld [vmem:[#allocation68_spill] sm:$0xff] }
 0x163   :  { %1799 = vrot.lane.b32.xlu1 %v6551_v29, %s2953_s19  ;;  %v1036_v41 = vadd.f32 %v1032_v57, %v961_v58  ;;  %v1025_v39 = vadd.f32 %v1021_v15, %v4643_v21  ;;  %v1031_v59 = vmul.f32 %v6544_v0, %v985_v4  ;;  %v4843_v19 = vpop.permute.xlu1 %1116  ;;  %v998_v40 = vadd.f32 %v994_v34, %v4328_v63  ;;  %v6555_v58 = vld [vmem:[#allocation69_spill] sm:$0xff]  ;;  %v6556_v57 = vld [vmem:[#allocation27_spill] sm:$0xff] }
 0x164   :  { %1797 = vrot.lane.b32.xlu0 %v6552_v5, %s2953_s19  ;;  %v4845_v54 = vpop.permute.xlu0 %2783  ;;  %v1066_v22 = vmul.f32 %v6553_v26, %v1060_v56  ;;  %v1067_v30 = vmul.f32 %v6553_v26, %v1061_v3  ;;  %v1076_v49 = vmul.f32 %v6554_v16, %v1060_v56  ;;  %v1077_v18 = vmul.f32 %v6554_v16, %v1061_v3 }
 0x165   :  { %v1086_v14 = vmul.f32 %v6555_v58, %v1060_v56  ;;  %v1054_v21 = vsel %vm1051_vm1, %v2781_v20, %v1048_v51  ;;  %v1055_v15 = vsel %vm1051_vm1, %v1048_v51, %v1050_v50  ;;  %v1008_v4 = vadd.f32 %v1004_v11, %v4492_v1  ;;  %v6557_v20 = vld [vmem:[#allocation72_spill] sm:$0xff] }
 0x166   :  { %v1018_v63 = vadd.f32 %v1014_v12, %v4632_v42  ;;  %v1028_v0 = vadd.f32 %v1024_v10, %v4713_v7  ;;  %v4861_v8 = vadd.f32 %v1034_v36, %v4766_v9  ;;  %v1087_v34 = vmul.f32 %v6555_v58, %v1061_v3 }
 0x167   :  { %1803 = vrot.lane.b32.xlu1 %v6552_v5, %s2953_s19  ;;  %v1096_v29 = vmul.f32 %v6557_v20, %v1060_v56  ;;  %v1062_v50 = vsel %vm120_vm11, %v1054_v21, 0.0  ;;  %v1063_v1 = vsel %vm121_vm12, %v1055_v15, 0.0  ;;  %v1123_v51 = vpop.permute.xlu1 %1122  ;;  %v1035_v7 = vadd.f32 %v1031_v59, %v4722_v38  ;;  %v6558_v21 = vld [vmem:[#allocation73_spill] sm:$0xff] }
 0x168   :  { %1801 = vrot.lane.b32.xlu0 %v6556_v57, %s2953_s19  ;;  %v1119_v42 = vpop.permute.xlu0 %1118  ;;  %v4872_v11 = vadd.f32 %v1066_v22, %v995_v60  ;;  %v4874_v9 = vadd.f32 %v1067_v30, %v996_v46  ;;  %v1097_v12 = vmul.f32 %v6557_v20, %v1061_v3  ;;  %v4877_v10 = vadd.f32 %v1076_v49, %v1005_v53  ;;  %s2954_s19 = smov 111  }
 0x169   :  { %v4879_v36 = vadd.f32 %v1077_v18, %v1006_v32  ;;  %v4881_v5 = vadd.f32 %v1086_v14, %v1015_v55  ;;  %v1106_v57 = vmul.f32 %v6558_v21, %v1060_v56  ;;  %v1107_v38 = vmul.f32 %v6558_v21, %v1061_v3  ;;  %v4892_v32 = vld [vmem:[#allocation2 + $0x8] sm:$0xff] }
 0x16a   :  { %v1068_v46 = vmul.f32 %v6553_v26, %v1062_v50  ;;  %v1069_v60 = vmul.f32 %v6553_v26, %v1063_v1  ;;  %v2786_v53 = vunpack.i.h.bf16 %v4845_v54  ;;  %v4896_v55 = vadd.f32 %v1087_v34, %v1016_v6 }
 0x16b   :  { %1819 = vrot.lane.b32.xlu1 %v4884_v24, %s2954_s19  ;;  %v4898_v56 = vadd.f32 %v1096_v29, %v1025_v39  ;;  %v1078_v59 = vmul.f32 %v6554_v16, %v1062_v50  ;;  %v1079_v22 = vmul.f32 %v6554_v16, %v1063_v1  ;;  %v4902_v3 = vpop.permute.xlu1 %2788  ;;  %v4904_v30 = vadd.f32 %v1097_v12, %v1026_v47 }
 0x16c   :  { %1817 = vrot.lane.b32.xlu0 %v4892_v32, %s2954_s19  ;;  %v1088_v26 = vmul.f32 %v6555_v58, %v1062_v50  ;;  %v1089_v49 = vmul.f32 %v6555_v58, %v1063_v1  ;;  %v1129_v18 = vsel %vm1126_vm6, %v2786_v53, %v1123_v51  ;;  %v1125_v14 = vpop.permute.xlu0 %1124  ;;  %v4909_v15 = vadd.f32 %v1106_v57, %v1035_v7 }
 0x16d   :  { %v1098_v6 = vmul.f32 %v6557_v20, %v1062_v50  ;;  %v1099_v39 = vmul.f32 %v6557_v20, %v1063_v1  ;;  %v2785_v34 = vunpack.i.l.bf16 %v4845_v54  ;;  %v1111_v47 = vadd.f32 %v1107_v38, %v1036_v41 }
 0x16e   :  { %v1072_v16 = vadd.f32 %v1068_v46, %v4798_v48  ;;  %v1073_v29 = vadd.f32 %v1069_v60, %v998_v40  ;;  %v1128_v58 = vsel %vm1126_vm6, %v4843_v19, %v1119_v42  ;;  %v6559_v7 = vmov 0.0  }
 0x16f   :  { %1823 = vrot.lane.b32.xlu1 %v4745_v37, %s2954_s19  ;;  %v1082_v12 = vadd.f32 %v1078_v59, %v4801_v62  ;;  %v1083_v57 = vadd.f32 %v1079_v22, %v1008_v4  ;;  %v1108_v20 = vmul.f32 %v6558_v21, %v1062_v50  ;;  %v1137_v53 = vsel %vm94_vm2, %v1129_v18, 0.0  ;;  %v1194_v17 = vpop.permute.xlu1 %1193 }
 0x170   :  { %2813 = vrot.lane.b32.xlu0 %v6559_v7, %s2954_s19  ;;  %v1092_v41 = vadd.f32 %v1088_v26, %v4804_v33  ;;  %v1093_v38 = vadd.f32 %v1089_v49, %v1018_v63  ;;  %v1109_v48 = vmul.f32 %v6558_v21, %v1063_v1  ;;  %v1130_v40 = vsel %vm1126_vm6, %v1123_v51, %v1125_v14  ;;  %v1192_v42 = vpop.permute.xlu0 %1191  ;;  %v6562_v33 = vld [vmem:[#allocation83_spill] sm:$0xff] }
 0x171   :  { %v1102_v46 = vadd.f32 %v1098_v6, %v4810_v45  ;;  %v4929_v60 = vadd.f32 %v1099_v39, %v1028_v0  ;;  %v1127_v62 = vsel %vm1126_vm6, %v2785_v34, %v4843_v19  ;;  %v1136_v50 = vsel %vm95_vm3, %v1128_v58, 0.0 }
 0x172   :  { %v1143_v63 = vmul.f32 %v6562_v33, %v1137_v53  ;;  %v1153_v1 = vmul.f32 %v4395_v44, %v1137_v53  ;;  %v1163_v51 = vmul.f32 %v4408_v25, %v1137_v53  ;;  %v2791_v45 = vunpack.i.h.bf16 %v4902_v3 }
 0x173   :  { %1892 = vrot.lane.b32.xlu1 %v4892_v32, %s2955_s1  ;;  %v1112_v19 = vadd.f32 %v1108_v20, %v4812_v35  ;;  %v1173_v0 = vmul.f32 %v4411_v28, %v1137_v53  ;;  %v1183_v21 = vmul.f32 %v4423_v2, %v1137_v53  ;;  %v1138_v59 = vsel %vm95_vm3, %v1130_v40, 0.0  ;;  %v1200_v22 = vpop.permute.xlu1 %1199 }
 0x174   :  { %1825 = vrot.lane.b32.xlu0 %v4689_v43, %s2954_s19  ;;  %v1113_v26 = vadd.f32 %v1109_v48, %v4861_v8  ;;  %v1135_v49 = vsel %vm94_vm2, %v1127_v62, 0.0  ;;  %v1142_v18 = vmul.f32 %v6562_v33, %v1136_v50  ;;  %v2790_v14 = vunpack.i.l.bf16 %v4902_v3  ;;  %v1198_v6 = vpop.permute.xlu0 %1197  ;;  %s5873_s19 = sld [smem:[#allocation3 + $0x79]] }
 0x175   :  { %v1152_v35 = vmul.f32 %v4395_v44, %v1136_v50  ;;  %v1162_v39 = vmul.f32 %v4408_v25, %v1136_v50  ;;  %v1172_v34 = vmul.f32 %v4411_v28, %v1136_v50  ;;  %v1182_v58 = vmul.f32 %v4423_v2, %v1136_v50 }
 0x176   :  { %v4959_v8 = vadd.f32 %v1143_v63, %v1072_v16  ;;  %v4961_v7 = vadd.f32 %v1153_v1, %v1082_v12  ;;  %v4963_v20 = vadd.f32 %v1163_v51, %v1092_v41  ;;  %v1144_v3 = vmul.f32 %v6562_v33, %v1138_v59 }
 0x177   :  { %2818 = vrot.lane.b32.xlu1 %v4462_v13, %s2955_s1  ;;  %v4968_v53 = vadd.f32 %v1173_v0, %v1102_v46  ;;  %v4970_v48 = vadd.f32 %v1183_v21, %v1112_v19  ;;  %v1154_v40 = vmul.f32 %v4395_v44, %v1138_v59  ;;  %v1141_v62 = vmul.f32 %v6562_v33, %v1135_v49  ;;  %v4974_v50 = vpop.permute.xlu1 %1328 }
 0x178   :  { %1894 = vrot.lane.b32.xlu0 %v4884_v24, %s2955_s1  ;;  %v1146_v16 = vadd.f32 %v1142_v18, %v4874_v9  ;;  %v1164_v12 = vmul.f32 %v4408_v25, %v1138_v59  ;;  %v1202_v41 = vsel %vm1201_vm7, %v2790_v14, %v1192_v42  ;;  %v1203_v63 = vsel %vm1201_vm7, %v1192_v42, %v1194_v17  ;;  %v4980_v1 = vpop.permute.xlu0 %1326 }
 0x179   :  { %v1156_v46 = vadd.f32 %v1152_v35, %v4879_v36  ;;  %v1166_v51 = vadd.f32 %v1162_v39, %v4896_v55  ;;  %v1176_v19 = vadd.f32 %v1172_v34, %v4904_v30  ;;  %v4985_v0 = vadd.f32 %v1182_v58, %v1111_v47 }
 0x17a   :  { %v4989_v9 = vadd.f32 %v1144_v3, %v1073_v29  ;;  %v1174_v33 = vmul.f32 %v4411_v28, %v1138_v59  ;;  %v4994_v17 = vsel %vm102_vm4, %v1202_v41, 0.0  ;;  %v1211_v36 = vsel %vm103_vm5, %v1203_v63, 0.0 }
 0x17b   :  { %1900 = vrot.lane.b32.xlu1 %v4689_v43, %s2955_s1  ;;  %v5000_v55 = vadd.f32 %v1154_v40, %v1083_v57  ;;  %v1184_v30 = vmul.f32 %v4423_v2, %v1138_v59  ;;  %v1145_v47 = vadd.f32 %v1141_v62, %v4872_v11  ;;  %v1151_v29 = vmul.f32 %v4395_v44, %v1135_v49  ;;  %v5005_v18 = vpop.permute.xlu1 %1332 }
 0x17c   :  { %1898 = vrot.lane.b32.xlu0 %v4745_v37, %s2955_s1  ;;  %v5007_v14 = vadd.f32 %v1164_v12, %v1093_v38  ;;  %v1161_v35 = vmul.f32 %v4408_v25, %v1135_v49  ;;  %v1171_v39 = vmul.f32 %v4411_v28, %v1135_v49  ;;  %v1181_v34 = vmul.f32 %v4423_v2, %v1135_v49  ;;  %v5012_v58 = vpop.permute.xlu0 %2793  ;;  %s2703_s1 = sld [smem:[#allocation3 + $0x30]] }
 0x17d   :  { %v1216_v57 = vmul.f32 %v4435_v31, %v4994_v17  ;;  %v1217_v59 = vmul.f32 %v4435_v31, %v1211_v36  ;;  %v1226_v44 = vmul.f32 %v4438_v61, %v4994_v17  ;;  %v1227_v11 = vmul.f32 %v4438_v61, %v1211_v36 }
 0x17e   :  { %v1236_v25 = vmul.f32 %v4441_v27, %v4994_v17  ;;  %v1237_v28 = vmul.f32 %v4441_v27, %v1211_v36  ;;  %v1204_v2 = vsel %vm1201_vm7, %v2791_v45, %v1198_v6  ;;  %v1205_v38 = vsel %vm1201_vm7, %v1198_v6, %v1200_v22 }
 0x17f   :  { %1969 = vrot.lane.b32.xlu1 %v4884_v24, %s2956_s4  ;;  %v1178_v49 = vadd.f32 %v1174_v33, %v4929_v60  ;;  %v1188_v3 = vadd.f32 %v1184_v30, %v1113_v26  ;;  %v1155_v40 = vadd.f32 %v1151_v29, %v4877_v10  ;;  %v1246_v62 = vmul.f32 %v4451_v23, %v4994_v17  ;;  %v5033_v12 = vpop.permute.xlu1 %1401 }
 0x180   :  { %1967 = vrot.lane.b32.xlu0 %v4892_v32, %s2956_s4  ;;  %v1165_v41 = vadd.f32 %v1161_v35, %v4881_v5  ;;  %v1247_v63 = vmul.f32 %v4451_v23, %v1211_v36  ;;  %v1212_v45 = vsel %vm102_vm4, %v1204_v2, 0.0  ;;  %v1213_v22 = vsel %vm103_vm5, %v1205_v38, 0.0  ;;  %v1335_v6 = vpop.permute.xlu0 %1334 }
 0x181   :  { %v1175_v60 = vadd.f32 %v1171_v39, %v4898_v56  ;;  %v5043_v10 = vadd.f32 %v1181_v34, %v4909_v15  ;;  %v5045_v26 = vadd.f32 %v1216_v57, %v1145_v47  ;;  %v5047_v33 = vadd.f32 %v1217_v59, %v1146_v16  ;;  %v6567_v15 = vld [vmem:[#allocation42_spill] sm:$0xff] }
 0x182   :  { %v5051_v5 = vadd.f32 %v1226_v44, %v1155_v40  ;;  %v5053_v30 = vadd.f32 %v1227_v11, %v1156_v46  ;;  %v5055_v29 = vadd.f32 %v1236_v25, %v1165_v41  ;;  %v5057_v35 = vadd.f32 %v1237_v28, %v1166_v51 }
 0x183   :  { %6565 = vst [vmem:[#allocation38_spill] sm:$0xff] %v5043_v10  ;;  %1973 = vrot.lane.b32.xlu1 %v4745_v37, %s2956_s4  ;;  %v5061_v56 = vadd.f32 %v1246_v62, %v1175_v60  ;;  %v1257_v16 = vmul.f32 %v6567_v15, %v1211_v36  ;;  %v1218_v47 = vmul.f32 %v4435_v31, %v1212_v45  ;;  %v2799_v34 = vpop.permute.xlu1 %2798  ;;  %vm1829_vm1 = vcmask 908288  }
 0x184   :  { %2823 = vrot.lane.b32.xlu0 %v4462_v13, %s2956_s4  ;;  %v1219_v39 = vmul.f32 %v4435_v31, %v1213_v22  ;;  %v5066_v57 = vadd.f32 %v1247_v63, %v1176_v19  ;;  %v1228_v46 = vmul.f32 %v4438_v61, %v1212_v45  ;;  %v1229_v51 = vmul.f32 %v4438_v61, %v1213_v22  ;;  %v1404_v44 = vpop.permute.xlu0 %1403 }
 0x185   :  { %6566 = vst [vmem:[#allocation39_spill] sm:$0xff] %v5061_v56  ;;  %v1339_v59 = vsel %vm1338_vm10, %v4980_v1, %v4974_v50  ;;  %v1238_v11 = vmul.f32 %v4441_v27, %v1212_v45  ;;  %v1239_v36 = vmul.f32 %v4441_v27, %v1213_v22  ;;  %v1248_v25 = vmul.f32 %v4451_v23, %v1212_v45 }
 0x186   :  { %v2796_v31 = vunpack.i.h.bf16 %v5012_v58  ;;  %v1249_v19 = vmul.f32 %v4451_v23, %v1213_v22  ;;  %v1258_v61 = vmul.f32 %v6567_v15, %v1212_v45  ;;  %v1259_v28 = vmul.f32 %v6567_v15, %v1213_v22 }
 0x187   :  { %2042 = vrot.lane.b32.xlu1 %v4892_v32, %s2957_s5  ;;  %v2795_v1 = vunpack.i.l.bf16 %v5012_v58  ;;  %v5087_v27 = vmul.f32 %v6567_v15, %v4994_v17  ;;  %v5090_v2 = vadd.f32 %v1257_v16, %v4985_v0  ;;  %v5093_v38 = vadd.f32 %v1218_v47, %v4959_v8  ;;  %v1410_v40 = vpop.permute.xlu1 %1409 }
 0x188   :  { %1975 = vrot.lane.b32.xlu0 %v4689_v43, %s2956_s4  ;;  %v5096_v23 = vadd.f32 %v1219_v39, %v4989_v9  ;;  %v5099_v62 = vadd.f32 %v1228_v46, %v4961_v7  ;;  %v5102_v58 = vadd.f32 %v1229_v51, %v5000_v55  ;;  %v1341_v17 = vsel %vm1338_vm10, %v5005_v18, %v1335_v6  ;;  %v1408_v0 = vpop.permute.xlu0 %1407  ;;  %v6580_v46 = vld [vmem:[#allocation45_spill] sm:$0xff]  ;;  %s2710_s4 = sld [smem:[#allocation3 + $0x63]] }
 0x189   :  { %6568 = vst [vmem:[#allocation64_spill] sm:$0xff] %v5087_v27  ;;  %6569 = vst [vmem:[#allocation51_spill] sm:$0xff] %v5090_v2  ;;  %v1342_v41 = vsel %vm1338_vm10, %v1335_v6, %v2796_v31  ;;  %v5108_v63 = vadd.f32 %v1238_v11, %v4963_v20  ;;  %v5111_v8 = vadd.f32 %v1239_v36, %v5007_v14  ;;  %v5118_v45 = vsel %vm112_vm8, %v1339_v59, 0.0  ;;  %v6578_v6 = vld [vmem:[#allocation43_spill] sm:$0xff] }
 0x18a   :  { %v5114_v9 = vadd.f32 %v1248_v25, %v4968_v53  ;;  %6572 = vst [vmem:[#allocation77_spill] sm:$0xff] %v5118_v45  ;;  %v5122_v55 = vadd.f32 %v1249_v19, %v1178_v49  ;;  %v5125_v18 = vadd.f32 %v1258_v61, %v4970_v48  ;;  %v5127_v20 = vadd.f32 %v1259_v28, %v1188_v3 }
 0x18b   :  { %2828 = vrot.lane.b32.xlu1 %v4462_v13, %s2957_s5  ;;  %v1340_v14 = vsel %vm1338_vm10, %v4974_v50, %v2795_v1  ;;  %v5135_v53 = vsel %vm112_vm8, %v1341_v17, 0.0  ;;  %v5139_v22 = vsel %vm113_vm9, %v1342_v41, 0.0  ;;  %v2800_v49 = vunpack.i.l.bf16 %v2799_v34  ;;  %v1479_v3 = vpop.permute.xlu1 %1478  ;;  %v6579_v50 = vld [vmem:[#allocation44_spill] sm:$0xff] }
 0x18c   :  { %6570 = vst [vmem:[#allocation75_spill] sm:$0xff] %v5114_v9  ;;  %6573 = vst [vmem:[#allocation78_spill] sm:$0xff] %v5122_v55  ;;  %2044 = vrot.lane.b32.xlu0 %v4884_v24, %s2957_s5  ;;  %v1414_v48 = vsel %vm1413_vm13, %v5033_v12, %v1404_v44  ;;  %v1353_v60 = vmul.f32 %v6578_v6, %v5118_v45  ;;  %v5147_v15 = vmul.f32 %v6579_v50, %v5118_v45  ;;  %v1477_v39 = vpop.permute.xlu0 %1476  ;;  %v6598_v55 = vld [vmem:[#allocation29_spill] sm:$0xff]  ;;  %vm1904_vm6 = vcmask 900096  }
 0x18d   :  { %6574 = vst [vmem:[#allocation80_spill] sm:$0xff] %v5125_v18  ;;  %6575 = vst [vmem:[#allocation50_spill] sm:$0xff] %v5127_v20  ;;  %v2801_v16 = vunpack.i.h.bf16 %v2799_v34  ;;  %v1416_v47 = vsel %vm1413_vm13, %v1408_v0, %v1410_v40  ;;  %v5152_v51 = vmul.f32 %v6580_v46, %v5118_v45  ;;  %v5156_v59 = vsel %vm113_vm9, %v1340_v14, 0.0  ;;  %v6589_v45 = vld [vmem:[#allocation58_spill] sm:$0xff] }
 0x18e   :  { %6576 = vst [vmem:[#allocation68_spill] sm:$0xff] %v5135_v53  ;;  %6577 = vst [vmem:[#allocation69_spill] sm:$0xff] %v5139_v22  ;;  %v1415_v12 = vsel %vm1413_vm13, %v1404_v44, %v2800_v49  ;;  %v1489_v11 = vsel %vm1488_vm14, %v1477_v39, %v1479_v3  ;;  %v1355_v34 = vmul.f32 %v6578_v6, %v5135_v53  ;;  %v5168_v31 = vsel %vm120_vm11, %v1414_v48, 0.0  ;;  %v6583_v48 = vld [vmem:[#allocation71_spill] sm:$0xff] }
 0x18f   :  { %2050 = vrot.lane.b32.xlu1 %v4689_v43, %s2957_s5  ;;  %v1356_v36 = vmul.f32 %v6578_v6, %v5139_v22  ;;  %v1417_v19 = vsel %vm1413_vm13, %v1410_v40, %v2801_v16  ;;  %v5175_v44 = vmul.f32 %v6579_v50, %v5135_v53  ;;  %v5179_v61 = vmul.f32 %v6579_v50, %v5139_v22  ;;  %v1483_v40 = vpop.permute.xlu1 %1482 }
 0x190   :  { %2048 = vrot.lane.b32.xlu0 %v4745_v37, %s2957_s5  ;;  %v5183_v28 = vsel %vm120_vm11, %v1416_v47, 0.0  ;;  %v5187_v1 = vsel %vm94_vm2, %v1489_v11, 0.0  ;;  %v5191_v17 = vmul.f32 %v6580_v46, %v5135_v53  ;;  %v5195_v41 = vmul.f32 %v6580_v46, %v5139_v22  ;;  %v2804_v49 = vpop.permute.xlu0 %2803  ;;  %v6584_v11 = vld [vmem:[#allocation52_spill] sm:$0xff]  ;;  %s2704_s5 = sld [smem:[#allocation3 + $0x49]] }
 0x191   :  { %v5199_v14 = vsel %vm121_vm12, %v1415_v12, 0.0  ;;  %v1270_v16 = vadd.f32 %v6583_v48, %v5045_v26  ;;  %v5205_v47 = vsel %vm121_vm12, %v1417_v19, 0.0  ;;  %v2805_v39 = vunpack.i.l.bf16 %v2804_v49  ;;  %v6587_v19 = vld [vmem:[#allocation32_spill] sm:$0xff] }
 0x192   :  { %v1428_v25 = vmul.f32 %v6584_v11, %v5168_v31  ;;  %v1354_v12 = vmul.f32 %v6578_v6, %v5156_v59  ;;  %v5215_v7 = vmul.f32 %v6585_v52, %v5135_v53  ;;  %v1430_v26 = vmul.f32 %v6584_v11, %v5183_v28  ;;  %v6588_v6 = vld [vmem:[#allocation41_spill] sm:$0xff] }
 0x193   :  { %2310 = vrot.lane.b32.xlu1 %v4884_v24, %s2958_s6  ;;  %v1503_v48 = vmul.f32 %v6587_v19, %v5187_v1  ;;  %v1357_v0 = vadd.f32 %v1353_v60, %v1270_v16  ;;  %v2806_v27 = vunpack.i.h.bf16 %v2804_v49  ;;  %v1490_v10 = vsel %vm1488_vm14, %v1479_v3, %v2805_v39  ;;  %v1552_v18 = vpop.permute.xlu1 %1551  ;;  %v6590_v3 = vld [vmem:[#allocation54_spill] sm:$0xff] }
 0x194   :  { %6586 = vst [vmem:[#allocation27_spill] sm:$0xff] %v5215_v7  ;;  %2308 = vrot.lane.b32.xlu0 %v4892_v32, %s2958_s6  ;;  %v1271_v20 = vadd.f32 %v6588_v6, %v5047_v33  ;;  %v1429_v53 = vmul.f32 %v6584_v11, %v5199_v14  ;;  %v5230_v2 = vsel %vm95_vm3, %v1490_v10, 0.0  ;;  %v1485_v56 = vpop.permute.xlu0 %1484  ;;  %v1273_v7 = vadd.f32 %v6589_v45, %v5096_v23  ;;  %v6591_v6 = vld [vmem:[#allocation28_spill] sm:$0xff] }
 0x195   :  { %v1431_v60 = vmul.f32 %v6584_v11, %v5205_v47  ;;  %v1272_v49 = vadd.f32 %v6590_v3, %v5093_v38  ;;  %v1491_v16 = vsel %vm1488_vm14, %v1483_v40, %v1485_v56  ;;  %v1492_v33 = vsel %vm1488_vm14, %v1485_v56, %v2806_v27 }
 0x196   :  { %v1432_v39 = vadd.f32 %v1428_v25, %v1357_v0  ;;  %v1358_v10 = vadd.f32 %v1354_v12, %v1271_v20  ;;  %v5244_v9 = vmul.f32 %v6591_v6, %v5183_v28  ;;  %v5248_v23 = vsel %vm95_vm3, %v1492_v33, 0.0 }
 0x197   :  { %2314 = vrot.lane.b32.xlu1 %v4745_v37, %s2958_s6  ;;  %v1359_v38 = vadd.f32 %v1355_v34, %v1272_v49  ;;  %v1360_v45 = vadd.f32 %v1356_v36, %v1273_v7  ;;  %v2809_v56 = vpop.permute.xlu1 %2808  ;;  %v1504_v20 = vmul.f32 %v6587_v19, %v5230_v2  ;;  %v5256_v25 = vmul.f32 %v6591_v6, %v5168_v31 }
 0x198   :  { %2833 = vrot.lane.b32.xlu0 %v4462_v13, %s2958_s6  ;;  %v1507_v27 = vadd.f32 %v1503_v48, %v1432_v39  ;;  %v1433_v40 = vadd.f32 %v1429_v53, %v1358_v10  ;;  %v5260_v0 = vsel %vm94_vm2, %v1491_v16, 0.0  ;;  %v2810_v11 = vunpack.i.l.bf16 %v2809_v56  ;;  %v1554_v12 = vpop.permute.xlu0 %1553  ;;  %v6592_v53 = vld [vmem:[#allocation57_spill] sm:$0xff]  ;;  %v6593_v48 = vld [vmem:[#allocation47_spill] sm:$0xff] }
 0x199   :  { %v1434_v3 = vadd.f32 %v1430_v26, %v1359_v38  ;;  %v1435_v33 = vadd.f32 %v1431_v60, %v1360_v45  ;;  %v2811_v34 = vunpack.i.h.bf16 %v2809_v56  ;;  %v1564_v7 = vsel %vm1563_vm15, %v1552_v18, %v1554_v12  ;;  %v6594_v45 = vld [vmem:[#allocation48_spill] sm:$0xff] }
 0x19a   :  { %v1506_v36 = vmul.f32 %v6587_v19, %v5248_v23  ;;  %v1281_v49 = vadd.f32 %v6593_v48, %v5053_v30  ;;  %v1565_v16 = vsel %vm1563_vm15, %v1554_v12, %v2810_v11  ;;  %v5272_v39 = vsel %vm102_vm4, %v1564_v7, 0.0  ;;  %v6595_v7 = vld [vmem:[#allocation86_spill] sm:$0xff] }
 0x19b   :  { %2246 = vrot.lane.b32.xlu1 %v6592_v53, %s2959_s7  ;;  %v1439_v18 = vmul.f32 %v6591_v6, %v5199_v14  ;;  %v1364_v26 = vmul.f32 %v6579_v50, %v5156_v59  ;;  %v5282_v60 = vsel %vm103_vm5, %v1565_v16, 0.0  ;;  %v1560_v30 = vpop.permute.xlu1 %1559  ;;  %v1508_v10 = vadd.f32 %v1504_v20, %v1433_v40 }
 0x19c   :  { %2316 = vrot.lane.b32.xlu0 %v4689_v43, %s2958_s6  ;;  %v1505_v38 = vmul.f32 %v6587_v19, %v5260_v0  ;;  %v1514_v56 = vmul.f32 %v6594_v45, %v5230_v2  ;;  %v1567_v11 = vsel %vm1563_vm15, %v1560_v30, %v2811_v34  ;;  %v1558_v12 = vpop.permute.xlu0 %1557  ;;  %v1578_v53 = vmul.f32 %v6595_v7, %v5272_v39  ;;  %v6596_v19 = vld [vmem:[#allocation67_spill] sm:$0xff]  ;;  %s2709_s6 = sld [smem:[#allocation3 + $0x4a]] }
 0x19d   :  { %v1579_v50 = vmul.f32 %v6595_v7, %v5282_v60  ;;  %v1368_v48 = vadd.f32 %v1364_v26, %v1281_v49  ;;  %v5295_v16 = vsel %vm103_vm5, %v1567_v11, 0.0  ;;  %v1566_v40 = vsel %vm1563_vm15, %v1558_v12, %v1560_v30  ;;  %v6597_v34 = vld [vmem:[#allocation59_spill] sm:$0xff] }
 0x19e   :  { %v1510_v20 = vadd.f32 %v1506_v36, %v1435_v33  ;;  %v1589_v4 = vmul.f32 %v6597_v34, %v5282_v60  ;;  %v5304_v54 = vsel %vm102_vm4, %v1566_v40, 0.0  ;;  %v1581_v26 = vmul.f32 %v6595_v7, %v5295_v16  ;;  %v6599_v36 = vld [vmem:[#allocation35_spill] sm:$0xff] }
 0x19f   :  { %2250 = vrot.lane.b32.xlu1 %v6596_v19, %s2959_s7  ;;  %v1583_v49 = vadd.f32 %v1579_v50, %v1508_v10  ;;  %v1443_v11 = vadd.f32 %v1439_v18, %v1368_v48  ;;  %v1643_v30 = vpop.permute.xlu1 %1642  ;;  %v1580_v12 = vmul.f32 %v6595_v7, %v5304_v54  ;;  %v1509_v33 = vadd.f32 %v1505_v38, %v1434_v3  ;;  %v6600_v50 = vld [vmem:[#allocation36_spill] sm:$0xff]  ;;  %v6601_v3 = vld [vmem:[#allocation82_spill] sm:$0xff] }
 0x1a0   :  { %2248 = vrot.lane.b32.xlu0 %v6598_v55, %s2959_s7  ;;  %v1283_v42 = vadd.f32 %v6599_v36, %v5102_v58  ;;  %v1441_v40 = vmul.f32 %v6591_v6, %v5205_v47  ;;  %v1641_v21 = vpop.permute.xlu0 %1640  ;;  %v1582_v22 = vadd.f32 %v1578_v53, %v1507_v27  ;;  %v1585_v52 = vadd.f32 %v1581_v26, %v1510_v20  ;;  %v6602_v6 = vld [vmem:[#allocation85_spill] sm:$0xff] }
 0x1a1   :  { %v1513_v55 = vmul.f32 %v6594_v45, %v5187_v1  ;;  %v1518_v10 = vadd.f32 %v1514_v56, %v1443_v11  ;;  %v1653_v18 = vsel %vm1652_vm0, %v1641_v21, %v1643_v30  ;;  %v1584_v7 = vadd.f32 %v1580_v12, %v1509_v33  ;;  %v6603_v27 = vld [vmem:[#allocation37_spill] sm:$0xff]  ;;  %v6605_v33 = vld [vmem:[#allocation22_spill] sm:$0xff] }
 0x1a2   :  { %v1282_v38 = vadd.f32 %v6601_v3, %v5099_v62  ;;  %v1370_v58 = vadd.f32 %v5179_v61, %v1283_v42  ;;  %v5324_v48 = vadd.f32 %v1653_v18, %v1582_v22  ;;  %v1280_v53 = vadd.f32 %v6603_v27, %v5051_v5  ;;  %v6604_v5 = vld [vmem:[#allocation70_spill] sm:$0xff] }
 0x1a3   :  { %2254 = vrot.lane.b32.xlu1 %v6600_v50, %s2959_s7  ;;  %v5330_v56 = vadd.f32 %v1589_v4, %v1518_v10  ;;  %v1516_v21 = vmul.f32 %v6594_v45, %v5248_v23  ;;  %v1647_v20 = vpop.permute.xlu1 %1646  ;;  %v1515_v26 = vmul.f32 %v6594_v45, %v5260_v0  ;;  %v1591_v42 = vmul.f32 %v6597_v34, %v5295_v16 }
 0x1a4   :  { %2252 = vrot.lane.b32.xlu0 %v6602_v6, %s2959_s7  ;;  %v1369_v62 = vadd.f32 %v5175_v44, %v1282_v38  ;;  %v1445_v22 = vadd.f32 %v1441_v40, %v1370_v58  ;;  %v1645_v61 = vpop.permute.xlu0 %1644  ;;  %v1367_v11 = vadd.f32 %v5147_v15, %v1280_v53  ;;  %v1590_v4 = vmul.f32 %v6597_v34, %v5304_v54 }
 0x1a5   :  { %v1291_v12 = vadd.f32 %v6604_v5, %v5057_v35  ;;  %v1449_v36 = vmul.f32 %v6605_v33, %v5199_v14  ;;  %v1654_v45 = vsel %vm1652_vm0, %v1643_v30, %v1645_v61  ;;  %v1374_v15 = vmul.f32 %v6580_v46, %v5156_v59  ;;  %v6606_v46 = vld [vmem:[#allocation53_spill] sm:$0xff]  ;;  %v6610_v61 = vld [vmem:[#allocation31_spill] sm:$0xff] }
 0x1a6   :  { %v1444_v44 = vadd.f32 %v5244_v9, %v1369_v62  ;;  %v1520_v40 = vadd.f32 %v1516_v21, %v1445_v22  ;;  %v1450_v10 = vmul.f32 %v6605_v33, %v5183_v28  ;;  %v5354_v18 = vadd.f32 %v1654_v45, %v1583_v49  ;;  %v6607_v49 = vld [vmem:[#allocation62_spill] sm:$0xff] }
 0x1a7   :  { %2383 = vrot.lane.b32.xlu1 %v4892_v32, %s2960_s8  ;;  %v1588_v35 = vmul.f32 %v6597_v34, %v5272_v39  ;;  %v1442_v30 = vadd.f32 %v5256_v25, %v1367_v11  ;;  %v1651_v50 = vpop.permute.xlu1 %1650  ;;  %v1378_v38 = vadd.f32 %v1374_v15, %v1291_v12  ;;  %v1524_v58 = vmul.f32 %v6606_v46, %v5230_v2 }
 0x1a8   :  { %2256 = vrot.lane.b32.xlu0 %v6596_v19, %s2959_s7  ;;  %v1519_v3 = vadd.f32 %v1515_v26, %v1444_v44  ;;  %v5361_v9 = vadd.f32 %v1591_v42, %v1520_v40  ;;  %v1649_v6 = vpop.permute.xlu0 %1648  ;;  %v1599_v53 = vmul.f32 %v6607_v49, %v5282_v60  ;;  %v6608_v19 = vld [vmem:[#allocation40_spill] sm:$0xff]  ;;  %v1451_v34 = vmul.f32 %v6605_v33, %v5205_v47 }
 0x1a9   :  { %v1517_v27 = vadd.f32 %v1513_v55, %v1442_v30  ;;  %v1293_v21 = vadd.f32 %v6608_v19, %v5111_v8  ;;  %v1655_v25 = vsel %vm1652_vm0, %v1647_v20, %v1649_v6  ;;  %v1656_v26 = vsel %vm1652_vm0, %v1649_v6, %v1651_v50  ;;  %v6614_v6 = vld [vmem:[#allocation46_spill] sm:$0xff] }
 0x1aa   :  { %v1594_v42 = vadd.f32 %v1590_v4, %v1519_v3  ;;  %v1453_v62 = vadd.f32 %v1449_v36, %v1378_v38  ;;  %v5375_v22 = vadd.f32 %v1655_v25, %v1584_v7  ;;  %v5377_v55 = vadd.f32 %v1656_v26, %v1585_v52  ;;  %v6611_v36 = vld [vmem:[#allocation84_spill] sm:$0xff] }
 0x1ab   :  { %2838 = vrot.lane.b32.xlu1 %v4462_v13, %s2960_s8  ;;  %v1592_v8 = vadd.f32 %v1588_v35, %v1517_v27  ;;  %v1292_v11 = vadd.f32 %v6610_v61, %v5108_v63  ;;  %v1682_v5 = vpop.permute.xlu1 %1681  ;;  %v1448_v20 = vmul.f32 %v6605_v33, %v5168_v31  ;;  %v1380_v13 = vadd.f32 %v5195_v41, %v1293_v21  ;;  %v6616_v25 = vld [vmem:[#allocation76_spill] sm:$0xff] }
 0x1ac   :  { %6609 = vst [vmem:[#allocation72_spill] sm:$0xff] %v5377_v55  ;;  %2385 = vrot.lane.b32.xlu0 %v4884_v24, %s2960_s8  ;;  %v1528_v12 = vadd.f32 %v1524_v58, %v1453_v62  ;;  %v1526_v7 = vmul.f32 %v6606_v46, %v5248_v23  ;;  %v1680_v4 = vpop.permute.xlu0 %1679  ;;  %v1523_v52 = vmul.f32 %v6606_v46, %v5187_v1  ;;  %v6617_v62 = vld [vmem:[#allocation63_spill] sm:$0xff]  ;;  %vm1979_vm7 = vcmask 801792  }
 0x1ad   :  { %v1290_v45 = vadd.f32 %v6611_v36, %v5055_v29  ;;  %v1525_v63 = vmul.f32 %v6606_v46, %v5260_v0  ;;  %v1379_v44 = vadd.f32 %v5191_v17, %v1292_v11  ;;  %v1691_v33 = vsel %vm1652_vm0, %v1680_v4, %v1682_v5  ;;  %v6613_v46 = vld [vmem:[#allocation81_spill] sm:$0xff]  ;;  %v6618_v11 = vld [vmem:[#allocation74_spill] sm:$0xff] }
 0x1ae   :  { %v5398_v41 = vadd.f32 %v1599_v53, %v1528_v12  ;;  %v1601_v40 = vmul.f32 %v6607_v49, %v5295_v16  ;;  %v1455_v15 = vadd.f32 %v1451_v34, %v1380_v13  ;;  %v5402_v35 = vadd.f32 %v1691_v33, %v1592_v8  ;;  %v6615_v53 = vld [vmem:[#allocation69_spill] sm:$0xff]  ;;  %v6620_v13 = vld [vmem:[#allocation15_spill] sm:$0xff] }
 0x1af   :  { %2391 = vrot.lane.b32.xlu1 %v4689_v43, %s2960_s8  ;;  %v1377_v29 = vadd.f32 %v5152_v51, %v1290_v45  ;;  %v1600_v17 = vmul.f32 %v6607_v49, %v5304_v54  ;;  %v1454_v30 = vadd.f32 %v1450_v10, %v1379_v44  ;;  %v1686_v50 = vpop.permute.xlu1 %1685  ;;  %v6612_v43 = vld [vmem:[#allocation13_spill] sm:$0xff]  ;;  %v1459_v58 = vmul.f32 %v6613_v46, %v5199_v14 }
 0x1b0   :  { %2389 = vrot.lane.b32.xlu0 %v4745_v37, %s2960_s8  ;;  %v1530_v3 = vadd.f32 %v1526_v7, %v1455_v15  ;;  %v1301_v38 = vadd.f32 %v6612_v43, %v5066_v57  ;;  %v1384_v27 = vmul.f32 %v6614_v6, %v5156_v59  ;;  %v1386_v37 = vmul.f32 %v6614_v6, %v6615_v53  ;;  %v1684_v19 = vpop.permute.xlu0 %1683  ;;  %v6622_v15 = vld [vmem:[#allocation75_spill] sm:$0xff]  ;;  %s2702_s8 = sld [smem:[#allocation3 + $0x17]] }
 0x1b1   :  { %v1460_v51 = vmul.f32 %v6613_v46, %v5183_v28  ;;  %v1452_v21 = vadd.f32 %v1448_v20, %v1377_v29  ;;  %v1529_v10 = vadd.f32 %v1525_v63, %v1454_v30  ;;  %v1692_v34 = vsel %vm1652_vm0, %v1682_v5, %v1684_v19  ;;  %v6619_v20 = vld [vmem:[#allocation78_spill] sm:$0xff]  ;;  %v6621_v63 = vld [vmem:[#allocation91_spill] sm:$0xff] }
 0x1b2   :  { %v5422_v57 = vadd.f32 %v1601_v40, %v1530_v3  ;;  %v1388_v26 = vadd.f32 %v1384_v27, %v1301_v38  ;;  %v1534_v8 = vmul.f32 %v6617_v62, %v5230_v2  ;;  %v5427_v61 = vadd.f32 %v1692_v34, %v5330_v56  ;;  %v6623_v29 = vld [vmem:[#allocation79_spill] sm:$0xff]  ;;  %v6627_v34 = vld [vmem:[#allocation77_spill] sm:$0xff] }
 0x1b3   :  { %2172 = vrot.lane.b32.xlu1 %v6616_v25, %s2959_s7  ;;  %v5431_v12 = vadd.f32 %v1600_v17, %v1529_v10  ;;  %v1303_v5 = vadd.f32 %v6620_v13, %v6619_v20  ;;  %v1461_v7 = vmul.f32 %v6613_v46, %v5205_v47  ;;  %v1690_v4 = vpop.permute.xlu1 %1689  ;;  %v1598_v36 = vmul.f32 %v6607_v49, %v5272_v39  ;;  %v6628_v13 = vld [vmem:[#allocation39_spill] sm:$0xff] }
 0x1b4   :  { %2170 = vrot.lane.b32.xlu0 %v6618_v11, %s2959_s7  ;;  %v1527_v45 = vadd.f32 %v1523_v52, %v1452_v21  ;;  %v1609_v56 = vmul.f32 %v6621_v63, %v5282_v60  ;;  %v1463_v44 = vadd.f32 %v1459_v58, %v1388_v26  ;;  %v1688_v33 = vpop.permute.xlu0 %1687  ;;  %v1535_v40 = vmul.f32 %v6617_v62, %v5260_v0  ;;  %v6624_v52 = vld [vmem:[#allocation14_spill] sm:$0xff]  ;;  %v6626_v21 = vld [vmem:[#allocation27_spill] sm:$0xff] }
 0x1b5   :  { %v1302_v17 = vadd.f32 %v6623_v29, %v6622_v15  ;;  %v1390_v30 = vadd.f32 %v1386_v37, %v1303_v5  ;;  %v1536_v3 = vmul.f32 %v6617_v62, %v5248_v23  ;;  %v1693_v43 = vsel %vm1652_vm0, %v1686_v50, %v1688_v33  ;;  %v6625_v37 = vld [vmem:[#allocation55_spill] sm:$0xff]  ;;  %v6633_v15 = vld [vmem:[#allocation49_spill] sm:$0xff] }
 0x1b6   :  { %v1694_v49 = vsel %vm1652_vm0, %v1688_v33, %v1690_v4  ;;  %v1538_v38 = vadd.f32 %v1534_v8, %v1463_v44  ;;  %v1611_v58 = vmul.f32 %v6621_v63, %v5295_v16  ;;  %v5453_v27 = vadd.f32 %v1693_v43, %v1594_v42 }
 0x1b7   :  { %2176 = vrot.lane.b32.xlu1 %v6624_v52, %s2959_s7  ;;  %v5456_v19 = vadd.f32 %v1694_v49, %v5361_v9  ;;  %v1389_v10 = vadd.f32 %v6626_v21, %v1302_v17  ;;  %v1465_v50 = vadd.f32 %v1461_v7, %v1390_v30  ;;  %v1383_v25 = vmul.f32 %v6614_v6, %v6627_v34  ;;  %v1720_v26 = vpop.permute.xlu1 %1719  ;;  %v6629_v9 = vld [vmem:[#allocation61_spill] sm:$0xff]  ;;  %v6630_v6 = vld [vmem:[#allocation51_spill] sm:$0xff]  ;;  %v6636_v21 = vld [vmem:[#allocation68_spill] sm:$0xff] }
 0x1b8   :  { %2174 = vrot.lane.b32.xlu0 %v6625_v37, %s2959_s7  ;;  %v1602_v11 = vadd.f32 %v1598_v36, %v1527_v45  ;;  %v1458_v8 = vmul.f32 %v6613_v46, %v5168_v31  ;;  %v5465_v20 = vadd.f32 %v1609_v56, %v1538_v38  ;;  %v1718_v42 = vpop.permute.xlu0 %1717  ;;  %v1300_v5 = vadd.f32 %v6629_v9, %v6628_v13  ;;  %v6631_v36 = vld [vmem:[#allocation12_spill] sm:$0xff] }
 0x1b9   :  { %v1610_v4 = vmul.f32 %v6621_v63, %v5304_v54  ;;  %v1464_v44 = vadd.f32 %v1460_v51, %v1389_v10  ;;  %v1540_v33 = vadd.f32 %v1536_v3, %v1465_v50  ;;  %v1729_v7 = vsel %vm1652_vm0, %v1718_v42, %v1720_v26  ;;  %v6632_v46 = vld [vmem:[#allocation56_spill] sm:$0xff]  ;;  %v6634_v51 = vld [vmem:[#allocation17_spill] sm:$0xff]  ;;  %v6638_v42 = vld [vmem:[#allocation23_spill] sm:$0xff] }
 0x1ba   :  { %v1311_v45 = vadd.f32 %v6631_v36, %v6630_v6  ;;  %v1469_v56 = vmul.f32 %v6632_v46, %v5199_v14  ;;  %v1394_v29 = vmul.f32 %v6633_v15, %v5156_v59  ;;  %v1396_v17 = vmul.f32 %v6633_v15, %v6615_v53 }
 0x1bb   :  { %2180 = vrot.lane.b32.xlu1 %v6625_v37, %s2959_s7  ;;  %v5482_v30 = vadd.f32 %v1729_v7, %v1602_v11  ;;  %v1539_v3 = vadd.f32 %v1535_v40, %v1464_v44  ;;  %v5486_v43 = vadd.f32 %v1611_v58, %v1540_v33  ;;  %v1724_v49 = vpop.permute.xlu1 %1723  ;;  %v1533_v52 = vmul.f32 %v6617_v62, %v5187_v1  ;;  %v6635_v37 = vld [vmem:[#allocation90_spill] sm:$0xff]  ;;  %v6639_v62 = vld [vmem:[#allocation65_spill] sm:$0xff] }
 0x1bc   :  { %2178 = vrot.lane.b32.xlu0 %v6634_v51, %s2959_s7  ;;  %v1387_v38 = vadd.f32 %v1383_v25, %v1300_v5  ;;  %v1398_v14 = vadd.f32 %v1394_v29, %v1311_v45  ;;  %v1544_v59 = vmul.f32 %v6635_v37, %v5230_v2  ;;  %v1395_v53 = vmul.f32 %v6633_v15, %v6636_v21  ;;  %v1722_v10 = vpop.permute.xlu0 %1721  ;;  %v6637_v11 = vld [vmem:[#allocation50_spill] sm:$0xff]  ;;  %v6640_v2 = vld [vmem:[#allocation24_spill] sm:$0xff] }
 0x1bd   :  { %v5494_v50 = vadd.f32 %v1610_v4, %v1539_v3  ;;  %v1313_v40 = vadd.f32 %v6638_v42, %v6637_v11  ;;  %v1471_v58 = vmul.f32 %v6632_v46, %v5205_v47  ;;  %v1730_v13 = vsel %vm1652_vm0, %v1720_v26, %v1722_v10  ;;  %v6641_v33 = vld [vmem:[#allocation66_spill] sm:$0xff]  ;;  %v6642_v47 = vld [vmem:[#allocation80_spill] sm:$0xff] }
 0x1be   :  { %v1462_v25 = vadd.f32 %v1458_v8, %v1387_v38  ;;  %v1619_v9 = vmul.f32 %v6640_v2, %v5282_v60  ;;  %v1473_v5 = vadd.f32 %v1469_v56, %v1398_v14  ;;  %v1470_v4 = vmul.f32 %v6632_v46, %v5183_v28  ;;  %v6643_v7 = vld [vmem:[#allocation18_spill] sm:$0xff]  ;;  %v6648_v42 = vld [vmem:[#allocation64_spill] sm:$0xff] }
 0x1bf   :  { %2210 = vrot.lane.b32.xlu1 %v6639_v62, %s2959_s7  ;;  %v5508_v44 = vadd.f32 %v1730_v13, %v5398_v41  ;;  %v1312_v26 = vadd.f32 %v6643_v7, %v6642_v47  ;;  %v1400_v6 = vadd.f32 %v1396_v17, %v1313_v40  ;;  %v1728_v36 = vpop.permute.xlu1 %1727  ;;  %v1608_v8 = vmul.f32 %v6621_v63, %v5272_v39  ;;  %v6644_v63 = vld [vmem:[#allocation87_spill] sm:$0xff]  ;;  %v6647_v11 = vld [vmem:[#allocation38_spill] sm:$0xff]  ;;  %v6649_v62 = vld [vmem:[#allocation25_spill] sm:$0xff] }
 0x1c0   :  { %2208 = vrot.lane.b32.xlu0 %v6641_v33, %s2959_s7  ;;  %v1537_v45 = vadd.f32 %v1533_v52, %v1462_v25  ;;  %v1548_v60 = vadd.f32 %v1544_v59, %v1473_v5  ;;  %v1546_v56 = vmul.f32 %v6635_v37, %v5248_v23  ;;  %v1726_v28 = vpop.permute.xlu0 %1725  ;;  %v1545_v41 = vmul.f32 %v6635_v37, %v5260_v0 }
 0x1c1   :  { %v1621_v29 = vmul.f32 %v6640_v2, %v5295_v16  ;;  %v1399_v51 = vadd.f32 %v1395_v53, %v1312_v26  ;;  %v1475_v3 = vadd.f32 %v1471_v58, %v1400_v6  ;;  %v1731_v17 = vsel %vm1652_vm0, %v1724_v49, %v1726_v28  ;;  %v6645_v16 = vld [vmem:[#allocation88_spill] sm:$0xff] }
 0x1c2   :  { %v1732_v38 = vsel %vm1652_vm0, %v1726_v28, %v1728_v36  ;;  %v5526_v52 = vadd.f32 %v1619_v9, %v1548_v60  ;;  %v1620_v23 = vmul.f32 %v6640_v2, %v5304_v54  ;;  %v5531_v14 = vadd.f32 %v1731_v17, %v5431_v12  ;;  %v6646_v53 = vld [vmem:[#allocation60_spill] sm:$0xff]  ;;  %v2871_v17 = vld [vmem:[#allocation2 + $0x30] sm:$0xff] }
 0x1c3   :  { %2214 = vrot.lane.b32.xlu1 %v6644_v63, %s2959_s7  ;;  %v5534_v0 = vadd.f32 %v1732_v38, %v5422_v57  ;;  %v1474_v49 = vadd.f32 %v1470_v4, %v1399_v51  ;;  %v1550_v59 = vadd.f32 %v1546_v56, %v1475_v3  ;;  %v1306_v10 = vmul.f32 %v4892_v32, %v6646_v53  ;;  %v6650_v4 = vld [vmem:[#allocation89_spill] sm:$0xff]  ;;  %v2870_v60 = vld [vmem:[#allocation2] sm:$0xff] }
 0x1c4   :  { %2212 = vrot.lane.b32.xlu0 %v6645_v16, %s2959_s7  ;;  %v1260_v40 = vadd.f32 %v6648_v42, %v6647_v11  ;;  %v1612_v54 = vadd.f32 %v1608_v8, %v1537_v45  ;;  %v2120_v25 = vmul.f32 %v4884_v24, %v6649_v62  ;;  %v1393_v9 = vmul.f32 %v6633_v15, %v6627_v34  ;;  %v2869_v34 = vld [vmem:[#allocation2 + $0x28] sm:$0xff] }
 0x1c5   :  { %v1758_v21 = vpop.permute.xlu1 %1757  ;;  %v1549_v13 = vadd.f32 %v1545_v41, %v1474_v49  ;;  %v5542_v12 = vadd.f32 %v1621_v29, %v1550_v59  ;;  %v2119_v33 = vmul.f32 %v4892_v32, %v6649_v62  ;;  %v1468_v6 = vmul.f32 %v6632_v46, %v5168_v31 }
 0x1c6   :  { %v1756_v58 = vpop.permute.xlu0 %1755  ;;  %v1310_v36 = vadd.f32 %v1306_v10, %v1260_v40  ;;  %v2122_v15 = vmul.f32 %v2869_v34, %v6649_v62  ;;  %v2121_v56 = vmul.f32 %v2870_v60, %v6649_v62  ;;  %v1543_v28 = vmul.f32 %v6635_v37, %v5187_v1 }
 0x1c7   :  { %v1767_v57 = vsel %vm1652_vm0, %v1756_v58, %v1758_v21  ;;  %2218 = vrot.lane.b32.xlu1 %v6645_v16, %s2959_s7  ;;  %v1624_v47 = vadd.f32 %v1620_v23, %v1549_v13  ;;  %v1618_v29 = vmul.f32 %v6640_v2, %v5272_v39  ;;  %v2123_v38 = vmul.f32 %v2871_v17, %v6649_v62 }
 0x1c8   :  { %v5551_v5 = vadd.f32 %v1767_v57, %v1612_v54  ;;  %2216 = vrot.lane.b32.xlu0 %v6650_v4, %s2959_s7  ;;  %v1397_v31 = vadd.f32 %v1393_v9, %v1310_v36  ;;  %v2271_v39 = vstv %s2701_s9  ;;  %v5604_v9 = vstv %s2678_s11  ;;  %s6085_s9 = sld [smem:[#allocation3 + $0x18]]  ;;  %s6115_s11 = sld [smem:[#allocation3 + $0x7c]] }
 0x1c9   :  { %v1762_v7 = vpop.permute.xlu1 %1761  ;;  %v2273_v59 = vmul.f32 %v4884_v24, %v2271_v39  ;;  %v2275_v11 = vmul.f32 %v2869_v34, %v2271_v39  ;;  %v2274_v24 = vmul.f32 %v2870_v60, %v2271_v39  ;;  %v5606_v4 = vstv %s2679_s12  ;;  %s2586_s12 = sld [smem:[#allocation3 + $0x7d]] }
 0x1ca   :  { %v1760_v26 = vpop.permute.xlu0 %1759  ;;  %v1472_v51 = vadd.f32 %v1468_v6, %v1397_v31  ;;  %vm2054_vm10 = vcmask 793600   ;;  %vm2320_vm13 = vcmask 777216  }
 0x1cb   :  { %v1768_v8 = vsel %vm1652_vm0, %v1758_v21, %v1760_v26  ;;  %2133 = vrot.lane.b32.xlu1 %v2120_v25, %s2959_s7  ;;  %v5602_v25 = vstv %s2677_s10  ;;  %v5608_v26 = vstv %s2681_s14  ;;  %s6101_s10 = sld [smem:[#allocation3 + $0x7b]]  ;;  %s2961_s14 = smov [#allocation8]  }
 0x1cc   :  { %v5563_v45 = vadd.f32 %v1768_v8, %v5465_v20  ;;  %2131 = vrot.lane.b32.xlu0 %v2119_v33, %s2959_s7  ;;  %v1547_v37 = vadd.f32 %v1543_v28, %v1472_v51  ;;  %v1873_v33 = vstv %s2680_s13  ;;  %s2587_s13 = sld [smem:[#allocation3 + $0x7e]] }
 0x1cd   :  { %v1766_v46 = vpop.permute.xlu1 %1765 }
 0x1ce   :  { %v1764_v41 = vpop.permute.xlu0 %1763  ;;  %v1622_v16 = vadd.f32 %v1618_v29, %v1547_v37 }
 0x1cf   :  { %v1769_v3 = vsel %vm1652_vm0, %v1762_v7, %v1764_v41  ;;  %v1770_v20 = vsel %vm1652_vm0, %v1764_v41, %v1766_v46  ;;  %2137 = vrot.lane.b32.xlu1 %v2122_v15, %s2959_s7 }
 0x1d0   :  { %v5576_v63 = vadd.f32 %v1769_v3, %v5494_v50  ;;  %v5579_v1 = vadd.f32 %v1770_v20, %v5486_v43  ;;  %2135 = vrot.lane.b32.xlu0 %v2121_v56, %s2959_s7  ;;  %v2272_v50 = vmul.f32 %v4892_v32, %v2271_v39 }
 0x1d1   :  { %v1796_v2 = vpop.permute.xlu1 %1795 }
 0x1d2   :  { %v1794_v23 = vpop.permute.xlu0 %1793 }
 0x1d3   :  { %v1805_v49 = vsel %vm1652_vm0, %v1794_v23, %v1796_v2  ;;  %2141 = vrot.lane.b32.xlu1 %v2121_v56, %s2959_s7 }
 0x1d4   :  { %v1813_v21 = vadd.f32 %v1805_v49, %v1622_v16  ;;  %2139 = vrot.lane.b32.xlu0 %v2123_v38, %s2959_s7  ;;  %v5675_v49 = vstv %s5619_s18 }
 0x1d5   :  { %v1800_v43 = vpop.permute.xlu1 %1799 }
 0x1d6   :  { %v1798_v53 = vpop.permute.xlu0 %1797 }
 0x1d7   :  { %v1806_v10 = vsel %vm1652_vm0, %v1796_v2, %v1798_v53  ;;  %2286 = vrot.lane.b32.xlu1 %v2273_v59, %s2959_s7  ;;  %v1928_v2 = vstv %s5614_s16 }
 0x1d8   :  { %v5590_v42 = vadd.f32 %v1806_v10, %v5526_v52  ;;  %2284 = vrot.lane.b32.xlu0 %v2272_v50, %s2959_s7  ;;  %v2276_v52 = vmul.f32 %v2871_v17, %v2271_v39  ;;  %v5659_v39 = vstv %s5612_s15  ;;  %s2573_s15 = sshll.u32 %s2961_s14, 4  ;;  %s2574_s15 = int_to_ptr.vmem [resolvable:$true] %s2573_s15 }
 0x1d9   :  { %v1804_v40 = vpop.permute.xlu1 %1803  ;;  %s2904_s16 = scalar_lea.vmem %s2574_s15, 256  ;;  %p2909_p12 = scmp.lt.s32.totalorder %s2574_s15, %s2574_s15 }
 0x1da   :  { %6651 = vst [vmem:[#allocation73_spill] sm:$0xff] %v5590_v42  ;;  %v1802_v32 = vpop.permute.xlu0 %1801  ;;  %p2905_p11 = scmp.ne.s32.totalorder %s2574_s15, %s2904_s16  ;;  %p2910_p13 = scmp.lt.s32.totalorder %s2904_s16, %s2904_s16 }
 0x1db   :  { %v1807_v58 = vsel %vm1652_vm0, %v1800_v43, %v1802_v32  ;;  %v1808_v54 = vsel %vm1652_vm0, %v1802_v32, %v1804_v40  ;;  %2290 = vrot.lane.b32.xlu1 %v2275_v11, %s2959_s7  ;;  %v1948_v43 = vstv %s5624_s17  ;;  %v5686_v40 = vstv %s5626_s20 }
 0x1dc   :  { %v5596_v13 = vadd.f32 %v1807_v58, %v1624_v47  ;;  %v5599_v57 = vadd.f32 %v1808_v54, %v5542_v12  ;;  %2288 = vrot.lane.b32.xlu0 %v2274_v24, %s2959_s7  ;;  %v5689_v32 = vstv %s5629_s21  ;;  %v5692_v54 = vstv %s5631_s22  ;;  %p2911_p0 = por %p2910_p13, %p2909_p12 }
 0x1dd   :  { %v1820_v62 = vpop.permute.xlu1 %1819 }
 0x1de   :  { %6652 = vst [vmem:[#allocation83_spill] sm:$0xff] %v5596_v13  ;;  %6653 = vst [vmem:[#allocation42_spill] sm:$0xff] %v5599_v57  ;;  %v1818_v7 = vpop.permute.xlu0 %1817  ;;  %p2912_p1 = pnand %p2911_p0, %p2905_p11 }
 0x1df   :  { %v1830_v47 = vsel %vm1829_vm1, %v1818_v7, %v1820_v62  ;;  %2294 = vrot.lane.b32.xlu1 %v2274_v24, %s2959_s7 }
 0x1e0   :  { %v1838_v6 = vsel %vm112_vm8, %v1830_v47, 0.0  ;;  %2292 = vrot.lane.b32.xlu0 %v2276_v52, %s2959_s7  ;;  %v5695_v52 = vstv %s5636_s23  ;;  %s2708_s7 = sld [smem:[#allocation3 + $0x31]] }
 0x1e1   :  { %v1844_v36 = vmul.f32 %v5602_v25, %v1838_v6  ;;  %v1854_v8 = vmul.f32 %v5604_v9, %v1838_v6  ;;  %v1864_v34 = vmul.f32 %v5606_v4, %v1838_v6  ;;  %v1874_v15 = vmul.f32 %v1873_v33, %v1838_v6  ;;  %v1824_v60 = vpop.permute.xlu1 %1823 }
 0x1e2   :  { %v1884_v56 = vmul.f32 %v5608_v26, %v1838_v6  ;;  %v2814_v28 = vpop.permute.xlu0 %2813 }
 0x1e3   :  { %v2815_v31 = vunpack.i.l.bf16 %v2814_v28  ;;  %v5634_v46 = vadd.f32 %v1874_v15, %v5551_v5  ;;  %v1858_v41 = vadd.f32 %v1854_v8, %v5402_v35  ;;  %v5642_v29 = vadd.f32 %v1864_v34, %v5482_v30 }
 0x1e4   :  { %v5645_v51 = vadd.f32 %v1844_v36, %v5324_v48  ;;  %v5647_v3 = vadd.f32 %v1884_v56, %v1813_v21  ;;  %v2816_v20 = vunpack.i.h.bf16 %v2814_v28 }
 0x1e5   :  { %v1831_v5 = vsel %vm1829_vm1, %v1820_v62, %v2815_v31  ;;  %v1893_v17 = vpop.permute.xlu1 %1892  ;;  %v5698_v62 = vstv %s5639_s24 }
 0x1e6   :  { %6655 = vst [vmem:[#allocation43_spill] sm:$0xff] %v5647_v3  ;;  %v5652_v37 = vsel %vm113_vm9, %v1831_v5, 0.0  ;;  %v1826_v35 = vpop.permute.xlu0 %1825 }
 0x1e7   :  { %v1832_v30 = vsel %vm1829_vm1, %v1824_v60, %v1826_v35  ;;  %v1833_v48 = vsel %vm1829_vm1, %v1826_v35, %v2816_v20  ;;  %v1875_v59 = vmul.f32 %v1873_v33, %v5652_v37  ;;  %v1855_v53 = vmul.f32 %v5604_v9, %v5652_v37 }
 0x1e8   :  { %v5668_v23 = vsel %vm112_vm8, %v1832_v30, 0.0  ;;  %v5672_v16 = vsel %vm113_vm9, %v1833_v48, 0.0  ;;  %v5723_v35 = vstv %s5662_s26 }
 0x1e9   :  { %v1856_v21 = vmul.f32 %v5604_v9, %v5668_v23  ;;  %v2819_v50 = vpop.permute.xlu1 %2818  ;;  %v1876_v10 = vmul.f32 %v1873_v33, %v5668_v23  ;;  %v1877_v11 = vmul.f32 %v1873_v33, %v5672_v16  ;;  %v1879_v47 = vadd.f32 %v1875_v59, %v5563_v45 }
 0x1ea   :  { %v1895_v24 = vpop.permute.xlu0 %1894  ;;  %v2820_v58 = vunpack.i.l.bf16 %v2819_v50  ;;  %v1859_v60 = vadd.f32 %v1855_v53, %v5427_v61  ;;  %v2821_v28 = vunpack.i.h.bf16 %v2819_v50  ;;  %v5726_v61 = vstv %s5664_s27 }
 0x1eb   :  { %v1905_v7 = vsel %vm1904_vm6, %v1893_v17, %v1895_v24  ;;  %v1880_v33 = vadd.f32 %v1876_v10, %v5576_v63  ;;  %v1881_v6 = vadd.f32 %v1877_v11, %v5579_v1  ;;  %v1860_v56 = vadd.f32 %v1856_v21, %v5453_v27 }
 0x1ec   :  { %v1906_v36 = vsel %vm1904_vm6, %v1895_v24, %v2820_v58  ;;  %v5707_v34 = vsel %vm120_vm11, %v1905_v7, 0.0  ;;  %v5717_v1 = vstv %s5654_s25  ;;  %v1865_v17 = vmul.f32 %v5606_v4, %v5652_v37 }
 0x1ed   :  { %v1901_v15 = vpop.permute.xlu1 %1900  ;;  %v5713_v45 = vsel %vm121_vm12, %v1906_v36, 0.0  ;;  %v1929_v63 = vmul.f32 %v1928_v2, %v5707_v34  ;;  %v1949_v5 = vmul.f32 %v1948_v43, %v5707_v34  ;;  %v1857_v27 = vmul.f32 %v5604_v9, %v5672_v16 }
 0x1ee   :  { %v1899_v20 = vpop.permute.xlu0 %1898  ;;  %v1930_v30 = vmul.f32 %v1928_v2, %v5713_v45  ;;  %v1950_v48 = vmul.f32 %v1948_v43, %v5713_v45  ;;  %v1908_v59 = vsel %vm1904_vm6, %v1901_v15, %v2821_v28  ;;  %v1866_v24 = vmul.f32 %v5606_v4, %v5668_v23 }
 0x1ef   :  { %v5735_v21 = vsel %vm121_vm12, %v1908_v59, 0.0  ;;  %v1907_v50 = vsel %vm1904_vm6, %v1899_v20, %v1901_v15  ;;  %v1953_v10 = vadd.f32 %v1949_v5, %v5634_v46  ;;  %v1933_v11 = vadd.f32 %v1929_v63, %v1858_v41 }
 0x1f0   :  { %6659 = vst [vmem:[#allocation44_spill] sm:$0xff] %v5735_v21  ;;  %v1867_v9 = vmul.f32 %v5606_v4, %v5672_v16  ;;  %v1919_v58 = vmul.f32 %v5659_v39, %v5707_v34  ;;  %v1952_v7 = vmul.f32 %v1948_v43, %v5735_v21  ;;  %v1939_v28 = vmul.f32 %v5675_v49, %v5707_v34 }
 0x1f1   :  { %v1970_v53 = vpop.permute.xlu1 %1969  ;;  %v5750_v15 = vsel %vm120_vm11, %v1907_v50, 0.0  ;;  %v1954_v41 = vadd.f32 %v1950_v48, %v1879_v47  ;;  %v1940_v63 = vmul.f32 %v5675_v49, %v5713_v45  ;;  %v1932_v4 = vmul.f32 %v1928_v2, %v5735_v21 }
 0x1f2   :  { %v1968_v36 = vpop.permute.xlu0 %1967  ;;  %v1931_v20 = vmul.f32 %v1928_v2, %v5750_v15  ;;  %v1951_v5 = vmul.f32 %v1948_v43, %v5750_v15  ;;  %v5760_v59 = vmul.f32 %v5675_v49, %v5735_v21  ;;  %v1956_v47 = vadd.f32 %v1952_v7, %v1881_v6 }
 0x1f3   :  { %v1980_v46 = vsel %vm1979_vm7, %v1968_v36, %v1970_v53  ;;  %v1934_v48 = vadd.f32 %v1930_v30, %v1859_v60  ;;  %v1861_v43 = vadd.f32 %v1857_v27, %v5456_v19  ;;  %v1943_v60 = vadd.f32 %v1939_v28, %v5642_v29 }
 0x1f4   :  { %v5764_v50 = vsel %vm94_vm2, %v1980_v46, 0.0  ;;  %v1955_v13 = vadd.f32 %v1951_v5, %v1880_v33  ;;  %v1935_v55 = vadd.f32 %v1931_v20, %v1860_v56  ;;  %v1869_v33 = vadd.f32 %v1865_v17, %v5508_v44 }
 0x1f5   :  { %v1974_v36 = vpop.permute.xlu1 %1973  ;;  %v2024_v57 = vmul.f32 %v5686_v40, %v5764_v50  ;;  %v2004_v2 = vmul.f32 %v5692_v54, %v5764_v50  ;;  %v2014_v46 = vmul.f32 %v5698_v62, %v5764_v50  ;;  %v1936_v6 = vadd.f32 %v1932_v4, %v1861_v43 }
 0x1f6   :  { %v2824_v8 = vpop.permute.xlu0 %2823  ;;  %v5777_v5 = vadd.f32 %v1866_v24, %v5531_v14  ;;  %v5780_v19 = vadd.f32 %v1867_v9, %v5534_v0 }
 0x1f7   :  { %v2826_v42 = vunpack.i.h.bf16 %v2824_v8  ;;  %v2825_v3 = vunpack.i.l.bf16 %v2824_v8  ;;  %v2028_v21 = vadd.f32 %v2024_v57, %v1953_v10  ;;  %v2008_v38 = vadd.f32 %v2004_v2, %v1933_v11 }
 0x1f8   :  { %v5784_v8 = vmul.f32 %v5675_v49, %v5750_v15  ;;  %v2018_v27 = vadd.f32 %v2014_v46, %v1943_v60 }
 0x1f9   :  { %v1981_v30 = vsel %vm1979_vm7, %v1970_v53, %v2825_v3  ;;  %v2043_v7 = vpop.permute.xlu1 %2042  ;;  %v5791_v3 = vadd.f32 %v1919_v58, %v5645_v51  ;;  %v1944_v51 = vadd.f32 %v1940_v63, %v1869_v33  ;;  %v1946_v33 = vadd.f32 %v5760_v59, %v5780_v19 }
 0x1fa   :  { %v5788_v56 = vsel %vm95_vm3, %v1981_v30, 0.0  ;;  %v1976_v29 = vpop.permute.xlu0 %1975 }
 0x1fb   :  { %v1982_v44 = vsel %vm1979_vm7, %v1974_v36, %v1976_v29  ;;  %v1983_v14 = vsel %vm1979_vm7, %v1976_v29, %v2826_v42  ;;  %v2025_v0 = vmul.f32 %v5686_v40, %v5788_v56  ;;  %v2005_v49 = vmul.f32 %v5692_v54, %v5788_v56 }
 0x1fc   :  { %v5801_v17 = vsel %vm94_vm2, %v1982_v44, 0.0  ;;  %v5805_v53 = vsel %vm95_vm3, %v1983_v14, 0.0  ;;  %v2015_v10 = vmul.f32 %v5698_v62, %v5788_v56  ;;  %vm2143_vm2 = vcmask 785408  }
 0x1fd   :  { %v2829_v42 = vpop.permute.xlu1 %2828  ;;  %v2029_v11 = vadd.f32 %v2025_v0, %v1954_v41  ;;  %v2026_v24 = vmul.f32 %v5686_v40, %v5801_v17  ;;  %v2027_v9 = vmul.f32 %v5686_v40, %v5805_v53  ;;  %v2009_v31 = vadd.f32 %v2005_v49, %v1934_v48 }
 0x1fe   :  { %v2831_v58 = vunpack.i.h.bf16 %v2829_v42  ;;  %v2830_v28 = vunpack.i.l.bf16 %v2829_v42  ;;  %v2045_v4 = vpop.permute.xlu0 %2044  ;;  %v2006_v20 = vmul.f32 %v5692_v54, %v5801_v17  ;;  %v2007_v63 = vmul.f32 %v5692_v54, %v5805_v53 }
 0x1ff   :  { %v2055_v36 = vsel %vm2054_vm10, %v2043_v7, %v2045_v4  ;;  %v2030_v2 = vadd.f32 %v2026_v24, %v1955_v13  ;;  %v2031_v41 = vadd.f32 %v2027_v9, %v1956_v47  ;;  %v2019_v43 = vadd.f32 %v2015_v10, %v1944_v51 }
 0x200   :  { %v2056_v46 = vsel %vm2054_vm10, %v2045_v4, %v2830_v28  ;;  %v5821_v40 = vsel %vm102_vm4, %v2055_v36, 0.0  ;;  %v2010_v48 = vadd.f32 %v2006_v20, %v1935_v55  ;;  %v2011_v30 = vadd.f32 %v2007_v63, %v1936_v6 }
 0x201   :  { %v5827_v57 = vsel %vm103_vm5, %v2056_v46, 0.0  ;;  %v2051_v54 = vpop.permute.xlu1 %2050  ;;  %v2099_v13 = vmul.f32 %v5689_v32, %v5821_v40  ;;  %v2079_v47 = vmul.f32 %v5695_v52, %v5821_v40  ;;  %v2089_v7 = vmul.f32 %v5717_v1, %v5821_v40 }
 0x202   :  { %v2058_v29 = vsel %vm2054_vm10, %v2051_v54, %v2831_v58  ;;  %v2049_v55 = vpop.permute.xlu0 %2048  ;;  %v2100_v6 = vmul.f32 %v5689_v32, %v5827_v57  ;;  %v2080_v44 = vmul.f32 %v5695_v52, %v5827_v57  ;;  %v2090_v14 = vmul.f32 %v5717_v1, %v5827_v57 }
 0x203   :  { %v5844_v0 = vsel %vm103_vm5, %v2058_v29, 0.0  ;;  %v2057_v49 = vsel %vm2054_vm10, %v2049_v55, %v2051_v54  ;;  %v5849_v51 = vadd.f32 %v2099_v13, %v2028_v21  ;;  %v5851_v10 = vadd.f32 %v2079_v47, %v2008_v38 }
 0x204   :  { %v5855_v42 = vsel %vm102_vm4, %v2057_v49, 0.0  ;;  %v5857_v24 = vadd.f32 %v2100_v6, %v2029_v11  ;;  %v2102_v9 = vmul.f32 %v5689_v32, %v5844_v0  ;;  %v5861_v58 = vadd.f32 %v2080_v44, %v2009_v31 }
 0x205   :  { %v2311_v28 = vpop.permute.xlu1 %2310  ;;  %v2101_v4 = vmul.f32 %v5689_v32, %v5855_v42  ;;  %v2081_v21 = vmul.f32 %v5695_v52, %v5855_v42  ;;  %v2082_v38 = vmul.f32 %v5695_v52, %v5844_v0  ;;  %v5869_v20 = vadd.f32 %v2089_v7, %v2018_v27 }
 0x206   :  { %v2309_v11 = vpop.permute.xlu0 %2308  ;;  %v5875_v31 = vadd.f32 %v2102_v9, %v2031_v41  ;;  %v5877_v63 = vadd.f32 %v2090_v14, %v2019_v43  ;;  %v2016_v32 = vmul.f32 %v5698_v62, %v5801_v17  ;;  %v1994_v36 = vmul.f32 %v5723_v35, %v5764_v50 }
 0x207   :  { %v2321_v52 = vsel %vm2320_vm13, %v2309_v11, %v2311_v28  ;;  %v5884_v27 = vadd.f32 %v2101_v4, %v2030_v2  ;;  %v5886_v46 = vadd.f32 %v2081_v21, %v2010_v48  ;;  %v5888_v60 = vadd.f32 %v2082_v38, %v2011_v30 }
 0x208   :  { %v2091_v41 = vmul.f32 %v5717_v1, %v5855_v42  ;;  %v1945_v43 = vadd.f32 %v5784_v8, %v5777_v5  ;;  %v1845_v54 = vmul.f32 %v5602_v25, %v5652_v37  ;;  %v1846_v2 = vmul.f32 %v5602_v25, %v5668_v23 }
 0x209   :  { %v5901_v48 = vstv %s5823_s28  ;;  %v2315_v30 = vpop.permute.xlu1 %2314  ;;  %v2092_v13 = vmul.f32 %v5717_v1, %v5844_v0  ;;  %v2017_v47 = vmul.f32 %v5698_v62, %v5805_v53  ;;  %v1920_v5 = vmul.f32 %v5659_v39, %v5713_v45 }
 0x20a   :  { %v2834_v59 = vpop.permute.xlu0 %2833  ;;  %v2020_v19 = vadd.f32 %v2016_v32, %v1945_v43  ;;  %v2069_v8 = vmul.f32 %v5726_v61, %v5821_v40  ;;  %v1998_v7 = vadd.f32 %v1994_v36, %v5791_v3  ;;  %v5913_v55 = vstv %s5847_s30 }
 0x20b   :  { %v2835_v29 = vunpack.i.l.bf16 %v2834_v59  ;;  %v2021_v1 = vadd.f32 %v2017_v47, %v1946_v33  ;;  %v1849_v44 = vadd.f32 %v1845_v54, %v5354_v18  ;;  %v1995_v14 = vmul.f32 %v5723_v35, %v5788_v56 }
 0x20c   :  { %v5915_v6 = vadd.f32 %v2091_v41, %v2020_v19  ;;  %v5917_v62 = vadd.f32 %v2069_v8, %v1998_v7  ;;  %v5926_v3 = vstv %s5871_s3  ;;  %v5929_v21 = vstv %s5873_s19 }
 0x20d   :  { %v2322_v49 = vsel %vm2320_vm13, %v2311_v28, %v2835_v29  ;;  %v2247_v9 = vpop.permute.xlu1 %2246  ;;  %v5923_v4 = vadd.f32 %v2092_v13, %v2021_v1  ;;  %v5933_v38 = vsel %vm112_vm8, %v2321_v52, 0.0  ;;  %v2070_v18 = vmul.f32 %v5726_v61, %v5827_v57 }
 0x20e   :  { %v2317_v11 = vpop.permute.xlu0 %2316  ;;  %v1924_v32 = vadd.f32 %v1920_v5, %v1849_v44  ;;  %v1850_v36 = vadd.f32 %v1846_v2, %v5375_v22  ;;  %v1847_v28 = vmul.f32 %v5602_v25, %v5672_v16  ;;  %v1886_v41 = vmul.f32 %v5608_v26, %v5668_v23  ;;  %v6665_v2 = vld [vmem:[#allocation44_spill] sm:$0xff] }
 0x20f   :  { %v1887_v43 = vmul.f32 %v5608_v26, %v5672_v16  ;;  %v1959_v52 = vmul.f32 %v5901_v48, %v5707_v34  ;;  %v1921_v33 = vmul.f32 %v5659_v39, %v5750_v15  ;;  %v2836_v54 = vunpack.i.h.bf16 %v2834_v59  ;;  %v6666_v44 = vld [vmem:[#allocation72_spill] sm:$0xff] }
 0x210   :  { %v5950_v47 = vsel %vm113_vm9, %v2322_v49, 0.0  ;;  %v1999_v22 = vadd.f32 %v1995_v14, %v1924_v32  ;;  %v1960_v25 = vmul.f32 %v5901_v48, %v5713_v45  ;;  %v1922_v23 = vmul.f32 %v5659_v39, %v6665_v2 }
 0x211   :  { %v2251_v5 = vpop.permute.xlu1 %2250  ;;  %v2365_v16 = vmul.f32 %v5913_v55, %v5933_v38  ;;  %v1996_v34 = vmul.f32 %v5723_v35, %v5801_v17  ;;  %v2323_v59 = vsel %vm2320_vm13, %v2315_v30, %v2317_v11  ;;  %v2324_v19 = vsel %vm2320_vm13, %v2317_v11, %v2836_v54 }
 0x212   :  { %v2249_v8 = vpop.permute.xlu0 %2248  ;;  %v5962_v7 = vadd.f32 %v2070_v18, %v1999_v22  ;;  %v2071_v45 = vmul.f32 %v5726_v61, %v5855_v42  ;;  %v2366_v1 = vmul.f32 %v5913_v55, %v5950_v47  ;;  %v1851_v14 = vadd.f32 %v1847_v28, %v6666_v44 }
 0x213   :  { %v2258_v29 = vsel %vm2143_vm2, %v2247_v9, %v2249_v8  ;;  %v2259_v39 = vsel %vm2143_vm2, %v2249_v8, %v2251_v5  ;;  %v1925_v11 = vadd.f32 %v1921_v33, %v1850_v36  ;;  %v1997_v18 = vmul.f32 %v5723_v35, %v5805_v53 }
 0x214   :  { %v2266_v49 = vadd.f32 %v2258_v29, %v5849_v51  ;;  %v2267_v30 = vadd.f32 %v2259_v39, %v5857_v24  ;;  %v5977_v32 = vsel %vm112_vm8, %v2323_v59, 0.0  ;;  %v2072_v54 = vmul.f32 %v5726_v61, %v5844_v0 }
 0x215   :  { %v2255_v9 = vpop.permute.xlu1 %2254  ;;  %v1926_v22 = vadd.f32 %v1922_v23, %v1851_v14  ;;  %v2034_v28 = vmul.f32 %v5926_v3, %v5764_v50  ;;  %v5985_v51 = vsel %vm113_vm9, %v2324_v19, 0.0  ;;  %v2000_v12 = vadd.f32 %v1996_v34, %v1925_v11  ;;  %v6667_v23 = vld [vmem:[#allocation43_spill] sm:$0xff]  ;;  %v6670_v11 = vld [vmem:[#allocation42_spill] sm:$0xff] }
 0x216   :  { %v5987_v24 = vadd.f32 %v2365_v16, %v2266_v49  ;;  %v5989_v36 = vadd.f32 %v2366_v1, %v2267_v30  ;;  %v2253_v35 = vpop.permute.xlu0 %2252  ;;  %v2109_v61 = vmul.f32 %v5929_v21, %v5821_v40  ;;  %v1963_v59 = vadd.f32 %v1959_v52, %v6667_v23 }
 0x217   :  { %v2260_v33 = vsel %vm2143_vm2, %v2253_v35, %v2255_v9  ;;  %v2001_v5 = vadd.f32 %v1997_v18, %v1926_v22  ;;  %v2367_v50 = vmul.f32 %v5913_v55, %v5977_v32  ;;  %v5998_v19 = vadd.f32 %v2071_v45, %v2000_v12  ;;  %v6668_v45 = vld [vmem:[#allocation73_spill] sm:$0xff] }
 0x218   :  { %v2268_v13 = vadd.f32 %v2260_v33, %v5884_v27  ;;  %v1885_v16 = vmul.f32 %v5608_v26, %v5652_v37  ;;  %v1962_v34 = vmul.f32 %v5901_v48, %v6665_v2  ;;  %v1961_v8 = vmul.f32 %v5901_v48, %v5750_v15  ;;  %v6669_v48 = vld [vmem:[#allocation83_spill] sm:$0xff] }
 0x219   :  { %v2384_v29 = vpop.permute.xlu1 %2383  ;;  %v6006_v40 = vadd.f32 %v2072_v54, %v2001_v5  ;;  %v2038_v52 = vadd.f32 %v2034_v28, %v1963_v59  ;;  %v2368_v27 = vmul.f32 %v5913_v55, %v5985_v51  ;;  %v2035_v26 = vmul.f32 %v5926_v3, %v5788_v56 }
 0x21a   :  { %v6008_v39 = vadd.f32 %v2367_v50, %v2268_v13  ;;  %v2257_v1 = vpop.permute.xlu0 %2256  ;;  %v1889_v44 = vadd.f32 %v1885_v16, %v6668_v45  ;;  %v2036_v15 = vmul.f32 %v5926_v3, %v5801_v17  ;;  %v1890_v14 = vadd.f32 %v1886_v41, %v6669_v48 }
 0x21b   :  { %v2261_v37 = vsel %vm2143_vm2, %v2255_v9, %v2257_v1  ;;  %v6016_v2 = vadd.f32 %v2109_v61, %v2038_v52  ;;  %v2110_v30 = vmul.f32 %v5929_v21, %v5827_v57  ;;  %v1891_v18 = vadd.f32 %v1887_v43, %v6670_v11 }
 0x21c   :  { %v2269_v49 = vadd.f32 %v2261_v37, %v5875_v31  ;;  %v1964_v55 = vadd.f32 %v1960_v25, %v1889_v44  ;;  %v1965_v56 = vadd.f32 %v1961_v8, %v1890_v14  ;;  %v2344_v5 = vstv %s2703_s1 }
 0x21d   :  { %v2839_v54 = vpop.permute.xlu1 %2838  ;;  %v1966_v35 = vadd.f32 %v1962_v34, %v1891_v18  ;;  %v2037_v57 = vmul.f32 %v5926_v3, %v5805_v53  ;;  %v2111_v25 = vmul.f32 %v5929_v21, %v5855_v42  ;;  %vm2395_vm3 = vcmask 769024  }
 0x21e   :  { %v6025_v22 = vadd.f32 %v2368_v27, %v2269_v49  ;;  %v2386_v9 = vpop.permute.xlu0 %2385  ;;  %v2039_v28 = vadd.f32 %v2035_v26, %v1964_v55  ;;  %v2040_v12 = vadd.f32 %v2036_v15, %v1965_v56  ;;  %v2112_v23 = vmul.f32 %v5929_v21, %v5844_v0 }
 0x21f   :  { %v2345_v59 = vmul.f32 %v2344_v5, %v5933_v38  ;;  %v2840_v13 = vunpack.i.l.bf16 %v2839_v54  ;;  %v2041_v34 = vadd.f32 %v2037_v57, %v1966_v35  ;;  %v2396_v53 = vsel %vm2395_vm3, %v2384_v29, %v2386_v9 }
 0x220   :  { %v6027_v17 = vadd.f32 %v2110_v30, %v2039_v28  ;;  %v6041_v52 = vadd.f32 %v2111_v25, %v2040_v12  ;;  %v2346_v21 = vmul.f32 %v2344_v5, %v5950_v47  ;;  %v6051_v29 = vsel %vm120_vm11, %v2396_v53, 0.0 }
 0x221   :  { %v2392_v41 = vpop.permute.xlu1 %2391  ;;  %v6044_v1 = vadd.f32 %v2112_v23, %v2041_v34  ;;  %v2397_v27 = vsel %vm2395_vm3, %v2386_v9, %v2840_v13  ;;  %v2347_v37 = vmul.f32 %v2344_v5, %v5977_v32  ;;  %v2354_v48 = vstv %s2704_s5 }
 0x222   :  { %v2390_v33 = vpop.permute.xlu0 %2389  ;;  %v2841_v14 = vunpack.i.h.bf16 %v2839_v54  ;;  %v2348_v30 = vmul.f32 %v2344_v5, %v5985_v51  ;;  %v6061_v11 = vsel %vm121_vm12, %v2397_v27, 0.0  ;;  %v2429_v25 = vstv %s2709_s6 }
 0x223   :  { %v2398_v54 = vsel %vm2395_vm3, %v2390_v33, %v2392_v41  ;;  %v2356_v53 = vmul.f32 %v2354_v48, %v5950_v47  ;;  %v2357_v45 = vmul.f32 %v2354_v48, %v5977_v32 }
 0x224   :  { %v2399_v28 = vsel %vm2395_vm3, %v2392_v41, %v2841_v14  ;;  %v6082_v33 = vsel %vm120_vm11, %v2398_v54, 0.0 }
 0x225   :  { %v2173_v31 = vpop.permute.xlu1 %2172  ;;  %v6078_v41 = vsel %vm121_vm12, %v2399_v28, 0.0 }
 0x226   :  { %v2171_v43 = vpop.permute.xlu0 %2170 }
 0x227   :  { %v2182_v61 = vsel %vm2143_vm2, %v2171_v43, %v2173_v31  ;;  %v2355_v43 = vmul.f32 %v2354_v48, %v5933_v38 }
 0x228   :  { %v2190_v50 = vadd.f32 %v2182_v61, %v5851_v10  ;;  %v2439_v10 = vstv %s2710_s4 }
 0x229   :  { %v2177_v16 = vpop.permute.xlu1 %2176  ;;  %v2440_v18 = vmul.f32 %v2439_v10, %v6051_v29  ;;  %v2441_v57 = vmul.f32 %v2439_v10, %v6061_v11 }
 0x22a   :  { %v6039_v3 = vadd.f32 %v2345_v59, %v2190_v50  ;;  %v2175_v8 = vpop.permute.xlu0 %2174  ;;  %v2430_v59 = vmul.f32 %v2429_v25, %v6051_v29 }
 0x22b   :  { %v2183_v42 = vsel %vm2143_vm2, %v2173_v31, %v2175_v8  ;;  %v2445_v8 = vadd.f32 %v2441_v57, %v5989_v36 }
 0x22c   :  { %v2191_v0 = vadd.f32 %v2183_v42, %v5861_v58 }
 0x22d   :  { %v2181_v44 = vpop.permute.xlu1 %2180 }
 0x22e   :  { %v6053_v26 = vadd.f32 %v2346_v21, %v2191_v0  ;;  %v2179_v15 = vpop.permute.xlu0 %2178  ;;  %v2419_v21 = vstv %s2708_s7 }
 0x22f   :  { %v2184_v49 = vsel %vm2143_vm2, %v2177_v16, %v2179_v15  ;;  %v2185_v58 = vsel %vm2143_vm2, %v2179_v15, %v2181_v44  ;;  %v2443_v16 = vmul.f32 %v2439_v10, %v6078_v41  ;;  %v2334_v44 = vstv %s2702_s8 }
 0x230   :  { %v2192_v56 = vadd.f32 %v2184_v49, %v5886_v46  ;;  %v2193_v9 = vadd.f32 %v2185_v58, %v5888_v60  ;;  %v2444_v60 = vadd.f32 %v2440_v18, %v5987_v24  ;;  %v2442_v24 = vmul.f32 %v2439_v10, %v6082_v33 }
 0x231   :  { %v2211_v35 = vpop.permute.xlu1 %2210  ;;  %v2431_v15 = vmul.f32 %v2429_v25, %v6061_v11  ;;  %v2358_v49 = vmul.f32 %v2354_v48, %v5985_v51  ;;  %v2447_v58 = vadd.f32 %v2443_v16, %v6025_v22  ;;  %v2479_v18 = vrot.slane %v2445_v8, 1 }
 0x232   :  { %v6068_v12 = vadd.f32 %v2347_v37, %v2192_v56  ;;  %v6070_v31 = vadd.f32 %v2348_v30, %v2193_v9  ;;  %v2209_v5 = vpop.permute.xlu0 %2208  ;;  %v2478_v0 = vrot.slane %v2444_v60, 1  ;;  %v2446_v36 = vadd.f32 %v2442_v24, %v6008_v39 }
 0x233   :  { %v2220_v46 = vsel %vm2143_vm2, %v2209_v5, %v2211_v35  ;;  %v2420_v28 = vmul.f32 %v2419_v21, %v6051_v29  ;;  %v2432_v48 = vmul.f32 %v2429_v25, %v6082_v33  ;;  %v2335_v22 = vmul.f32 %v2334_v44, %v5933_v38 }
 0x234   :  { %v2228_v61 = vadd.f32 %v2220_v46, %v5869_v20  ;;  %v2409_v39 = vstv %s6085_s9  ;;  %v2433_v5 = vmul.f32 %v2429_v25, %v6078_v41  ;;  %v2421_v60 = vmul.f32 %v2419_v21, %v6061_v11 }
 0x235   :  { %v2215_v23 = vpop.permute.xlu1 %2214  ;;  %v2410_v16 = vmul.f32 %v2409_v39, %v6051_v29 }
 0x236   :  { %v2359_v50 = vadd.f32 %v2355_v43, %v2228_v61  ;;  %v2213_v13 = vpop.permute.xlu0 %2212  ;;  %v2480_v61 = vrot.slane %v2446_v36, 1  ;;  %v2425_v25 = vadd.f32 %v2421_v60, %v6053_v26  ;;  %v2423_v26 = vmul.f32 %v2419_v21, %v6078_v41 }
 0x237   :  { %v2221_v34 = vsel %vm2143_vm2, %v2211_v35, %v2213_v13 }
 0x238   :  { %v2434_v42 = vadd.f32 %v2430_v59, %v2359_v50  ;;  %v2229_v20 = vadd.f32 %v2221_v34, %v5877_v63  ;;  %v2463_v36 = vrot.slane %v2425_v25, 1 }
 0x239   :  { %v2219_v27 = vpop.permute.xlu1 %2218 }
 0x23a   :  { %v2486_v37 = vadd.f32 %v2478_v0, %v2434_v42  ;;  %v2360_v14 = vadd.f32 %v2356_v53, %v2229_v20  ;;  %v2217_v10 = vpop.permute.xlu0 %2216  ;;  %v2336_v20 = vmul.f32 %v2334_v44, %v5950_v47 }
 0x23b   :  { %v2222_v30 = vsel %vm2143_vm2, %v2215_v23, %v2217_v10  ;;  %v2223_v63 = vsel %vm2143_vm2, %v2217_v10, %v2219_v27  ;;  %v2424_v23 = vadd.f32 %v2420_v28, %v6039_v3  ;;  %v6121_v3 = vstv %s6101_s10 }
 0x23c   :  { %v2435_v55 = vadd.f32 %v2431_v15, %v2360_v14  ;;  %v2230_v56 = vadd.f32 %v2222_v30, %v5915_v6  ;;  %v2231_v9 = vadd.f32 %v2223_v63, %v5923_v4  ;;  %v2481_v6 = vrot.slane %v2447_v58, 1 }
 0x23d   :  { %v2134_v54 = vpop.permute.xlu1 %2133  ;;  %v2462_v27 = vrot.slane %v2424_v23, 1  ;;  %v2337_v15 = vmul.f32 %v2334_v44, %v5977_v32  ;;  %v2422_v14 = vmul.f32 %v2419_v21, %v6082_v33  ;;  %v2411_v10 = vmul.f32 %v2409_v39, %v6061_v11 }
 0x23e   :  { %v2487_v35 = vadd.f32 %v2479_v18, %v2435_v55  ;;  %v2361_v57 = vadd.f32 %v2357_v45, %v2230_v56  ;;  %v2362_v43 = vadd.f32 %v2358_v49, %v2231_v9  ;;  %v2132_v46 = vpop.permute.xlu0 %2131  ;;  %v2338_v58 = vmul.f32 %v2334_v44, %v5985_v51 }
 0x23f   :  { %v2144_v4 = vsel %vm2143_vm2, %v2132_v46, %v2134_v54  ;;  %v2494_v30 = vrot.slane %v2486_v37, 2  ;;  %v2426_v56 = vadd.f32 %v2422_v14, %v6068_v12  ;;  %v2413_v37 = vmul.f32 %v2409_v39, %v6078_v41 }
 0x240   :  { %v2436_v59 = vadd.f32 %v2432_v48, %v2361_v57  ;;  %v2437_v50 = vadd.f32 %v2433_v5, %v2362_v43  ;;  %v2152_v13 = vadd.f32 %v2144_v4, %v5917_v62  ;;  %v2449_v57 = vstv %s6115_s11 }
 0x241   :  { %v2138_v24 = vpop.permute.xlu1 %2137  ;;  %v2495_v43 = vrot.slane %v2487_v35, 2  ;;  %v2375_v4 = vmul.f32 %v6121_v3, %v5933_v38  ;;  %v2450_v35 = vmul.f32 %v2449_v57, %v6051_v29  ;;  %v2376_v38 = vmul.f32 %v6121_v3, %v5950_v47 }
 0x242   :  { %v2488_v34 = vadd.f32 %v2480_v61, %v2436_v59  ;;  %v2489_v53 = vadd.f32 %v2481_v6, %v2437_v50  ;;  %v2339_v8 = vadd.f32 %v2335_v22, %v2152_v13  ;;  %v2136_v42 = vpop.permute.xlu0 %2135  ;;  %v2412_v22 = vmul.f32 %v2409_v39, %v6082_v33 }
 0x243   :  { %v2145_v0 = vsel %vm2143_vm2, %v2134_v54, %v2136_v42  ;;  %v2464_v61 = vrot.slane %v2426_v56, 1  ;;  %v2451_v29 = vmul.f32 %v2449_v57, %v6061_v11  ;;  %v2378_v47 = vmul.f32 %v6121_v3, %v5985_v51 }
 0x244   :  { %v2414_v45 = vadd.f32 %v2410_v16, %v2339_v8  ;;  %v2153_v62 = vadd.f32 %v2145_v0, %v5962_v7  ;;  %v2427_v7 = vadd.f32 %v2423_v26, %v6070_v31  ;;  %v2496_v50 = vrot.slane %v2488_v34, 2 }
 0x245   :  { %v2142_v49 = vpop.permute.xlu1 %2141  ;;  %v2497_v16 = vrot.slane %v2489_v53, 2  ;;  %v2377_v26 = vmul.f32 %v6121_v3, %v5977_v32  ;;  %v2452_v11 = vmul.f32 %v2449_v57, %v6082_v33 }
 0x246   :  { %v2470_v63 = vadd.f32 %v2462_v27, %v2414_v45  ;;  %v2340_v55 = vadd.f32 %v2336_v20, %v2153_v62  ;;  %v2140_v18 = vpop.permute.xlu0 %2139  ;;  %v2465_v6 = vrot.slane %v2427_v7, 1 }
 0x247   :  { %v2146_v9 = vsel %vm2143_vm2, %v2138_v24, %v2140_v18  ;;  %v2147_v28 = vsel %vm2143_vm2, %v2140_v18, %v2142_v49 }
 0x248   :  { %v2502_v21 = vadd.f32 %v2494_v30, %v2470_v63  ;;  %v2415_v48 = vadd.f32 %v2411_v10, %v2340_v55  ;;  %v2154_v54 = vadd.f32 %v2146_v9, %v5998_v19  ;;  %v2155_v44 = vadd.f32 %v2147_v28, %v6006_v40 }
 0x249   :  { %v2287_v5 = vpop.permute.xlu1 %2286  ;;  %v2453_v63 = vmul.f32 %v2449_v57, %v6078_v41 }
 0x24a   :  { %v2471_v12 = vadd.f32 %v2463_v36, %v2415_v48  ;;  %v2341_v46 = vadd.f32 %v2337_v15, %v2154_v54  ;;  %v2342_v31 = vadd.f32 %v2338_v58, %v2155_v44  ;;  %v2285_v60 = vpop.permute.xlu0 %2284  ;;  %v2522_v15 = vstv %s2586_s12 }
 0x24b   :  { %v2296_v19 = vsel %vm2143_vm2, %v2285_v60, %v2287_v5 }
 0x24c   :  { %v2503_v40 = vadd.f32 %v2495_v43, %v2471_v12  ;;  %v2416_v23 = vadd.f32 %v2412_v22, %v2341_v46  ;;  %v2417_v59 = vadd.f32 %v2413_v37, %v2342_v31  ;;  %v2304_v39 = vadd.f32 %v2296_v19, %v6016_v2 }
 0x24d   :  { %v2291_v13 = vpop.permute.xlu1 %2290 }
 0x24e   :  { %v2472_v24 = vadd.f32 %v2464_v61, %v2416_v23  ;;  %v2473_v25 = vadd.f32 %v2465_v6, %v2417_v59  ;;  %v2379_v8 = vadd.f32 %v2375_v4, %v2304_v39  ;;  %v2289_v42 = vpop.permute.xlu0 %2288  ;;  %v2547_v23 = vstv %s2587_s13 }
 0x24f   :  { %v2297_v0 = vsel %vm2143_vm2, %v2287_v5, %v2289_v42 }
 0x250   :  { %v2504_v20 = vadd.f32 %v2496_v50, %v2472_v24  ;;  %v2505_v27 = vadd.f32 %v2497_v16, %v2473_v25  ;;  %v2454_v45 = vadd.f32 %v2450_v35, %v2379_v8  ;;  %v2305_v62 = vadd.f32 %v2297_v0, %v6027_v17  ;;  %v2552_v35 = vld [vmem:[#allocation7] sm:$0xff]  ;;  %v2553_v0 = vld [vmem:[#allocation7 + $0x8] sm:$0xff] }
 0x251   :  { %v2295_v2 = vpop.permute.xlu1 %2294 }
 0x252   :  { %v2510_v34 = vrot.slane %v2454_v45, 4  ;;  %v2380_v53 = vadd.f32 %v2376_v38, %v2305_v62  ;;  %v2293_v14 = vpop.permute.xlu0 %2292 }
 0x253   :  { %v2298_v10 = vsel %vm2143_vm2, %v2291_v13, %v2293_v14  ;;  %v2299_v49 = vsel %vm2143_vm2, %v2293_v14, %v2295_v2 }
 0x254   :  { %v2518_v58 = vadd.f32 %v2510_v34, %v2502_v21  ;;  %v2455_v36 = vadd.f32 %v2451_v29, %v2380_v53  ;;  %v2306_v17 = vadd.f32 %v2298_v10, %v6041_v52  ;;  %v2307_v30 = vadd.f32 %v2299_v49, %v6044_v1 }
 0x256   :  { %v2523_v55 = vadd.f32 %v2522_v15, %v2518_v58  ;;  %v2511_v18 = vrot.slane %v2455_v36, 4  ;;  %v2381_v32 = vadd.f32 %v2377_v26, %v2306_v17  ;;  %v2382_v56 = vadd.f32 %v2378_v47, %v2307_v30 }
 0x258   :  { %v2527_v7 = vsub.f32 0.0, %v2523_v55  ;;  %v2519_v9 = vadd.f32 %v2511_v18, %v2503_v40  ;;  %v2456_v28 = vadd.f32 %v2452_v11, %v2381_v32  ;;  %v2457_v48 = vadd.f32 %v2453_v63, %v2382_v56 }
 0x25a   :  { %v2531_v54 = vmul.f32 1.442695, %v2527_v7  ;;  %v2524_v51 = vadd.f32 %v2522_v15, %v2519_v9  ;;  %v2512_v3 = vrot.slane %v2456_v28, 4  ;;  %v2513_v21 = vrot.slane %v2457_v48, 4 }
 0x25c   :  { %2844 = vpow2.f32 %v2531_v54  ;;  %v2528_v52 = vsub.f32 0.0, %v2524_v51  ;;  %v2520_v44 = vadd.f32 %v2512_v3, %v2504_v20  ;;  %v2521_v1 = vadd.f32 %v2513_v21, %v2505_v27 }
 0x25e   :  { %v2533_v22 = vmul.f32 1.442695, %v2528_v52  ;;  %v2525_v33 = vadd.f32 %v2522_v15, %v2520_v44  ;;  %v2526_v37 = vadd.f32 %v2522_v15, %v2521_v1 }
 0x260   :  { %2846 = vpow2.f32 %v2533_v22  ;;  %v2529_v41 = vsub.f32 0.0, %v2525_v33  ;;  %v2530_v5 = vsub.f32 0.0, %v2526_v37 }
 0x262   :  { %v2535_v57 = vmul.f32 1.442695, %v2529_v41  ;;  %v2537_v43 = vmul.f32 1.442695, %v2530_v5 }
 0x264   :  { %2848 = vpow2.f32 %v2535_v57 }
 0x265   :  { %2850 = vpow2.f32 %v2537_v43 }
 0x266   :  { %v2845_v12 = vpop.eup %2844 }
 0x267   :  { %v2539_v46 = vadd.f32 1.0, %v2845_v12 }
 0x269   :  { %2852 = vrcp.f32 %v2539_v46 }
 0x26a   :  { %v2847_v31 = vpop.eup %2846 }
 0x26b   :  { %v2540_v60 = vadd.f32 1.0, %v2847_v31 }
 0x26d   :  { %2854 = vrcp.f32 %v2540_v60 }
 0x26e   :  { %v2849_v61 = vpop.eup %2848 }
 0x26f   :  { %v2851_v6 = vpop.eup %2850  ;;  %v2541_v4 = vadd.f32 1.0, %v2849_v61 }
 0x270   :  { %v2542_v19 = vadd.f32 1.0, %v2851_v6 }
 0x271   :  { %2856 = vrcp.f32 %v2541_v4 }
 0x272   :  { %2858 = vrcp.f32 %v2542_v19 }
 0x273   :  { %v2853_v40 = vpop.eup %2852 }
 0x274   :  { %v2548_v39 = vmul.f32 %v2853_v40, %v2547_v23 }
 0x277   :  { %v2855_v59 = vpop.eup %2854 }
 0x278   :  { %v2549_v50 = vmul.f32 %v2855_v59, %v2547_v23 }
 0x27a   :  { %v2558_v13 = vcombine.low %v2548_v39, %v2549_v50 }
 0x27b   :  { %v2857_v16 = vpop.eup %2856 }
 0x27c   :  { %v2859_v24 = vpop.eup %2858  ;;  %v2550_v25 = vmul.f32 %v2857_v16, %v2547_v23  ;;  %v2562_v8 = vmul.f32 %v2558_v13, %v2552_v35 }
 0x27d   :  { %v2551_v42 = vmul.f32 %v2859_v24, %v2547_v23 }
 0x27e   :  { %v2564_v38 = vadd.f32 %v2562_v8, %v2552_v35 }
 0x27f   :  { %v2559_v20 = vcombine.low %v2550_v25, %v2551_v42 }
 0x280   :  { %2566 = vst [vmem:[#allocation8] sm:$0xff] %v2564_v38 }
 0x281   :  { %v2563_v27 = vmul.f32 %v2559_v20, %v2553_v0 }
 0x283   :  { %v2565_v45 = vadd.f32 %v2563_v27, %v2553_v0 }
 0x285   :  { %2567 = vst [vmem:[#allocation8 + $0x8] sm:$0xff] %v2565_v45 }
 0x286   :  { %2915 = shalt.err (!%p2912_p1)
}
 0x287   :  { %s2916_s20 = scalar_lea.hbm %s6175_s2, 256 }
 0x288   :  { %p2917_p2 = scmp.ne.s32.totalorder %s6175_s2, %s2916_s20  ;;  %p2920_p3 = scmp.lt.u32.totalorder %s2916_s20, %s6175_s2 }
 0x28a   :  { %p2922_p4 = pnand %p2920_p3, %p2917_p2 }
 0x28c   :  { %2925 = shalt.err (!%p2922_p4)
}
 0x28d   :  { %2579 = dma.vmem_to_hbm [thread:$0]  %s2574_s15, 256, %s6175_s2, [#allocation5], %s2934_s0, %s2934_s0, %s2935_s29  }
 0x28e   :  { %2930 = dma.done.wait [#allocation5], 256  }
 0x28f   :  { %2931 = vsyncadd [#allocation5], 4294967040 }
 0x290   :  { %2583 = vsyncpa [#allocation4], 1 }
 0x291   :  { %2584 = vsyncpa [#allocation5], 1 }
 0x292   :  { %2585 = vsyncpa [#allocation6], 1 }

</bundles_post_ra>
